<compile_context>
chip_gen: v7x
topology: tpu7x:2x2x1
jax: 0.10.0
libtpu: 0.0.40
codegen_flags: <defaults>
</compile_context>

<pallas_src>
import functools

import jax
import jax.numpy as jnp
import numpy as np
from jax.experimental import pallas as pl
from jax.experimental.pallas import tpu as pltpu

# ----------------------- small, TPU-friendly config -----------------------
BATCH = 2
SEQ = 16
HIDDEN = 256
NUM_HEADS = 4
NUM_KV_HEADS = 2
HEAD_DIM = 128            # Llama4 uses an explicit config.head_dim (=128)
INTERMEDIATE = 512        # config.intermediate_size_mlp
RMS_EPS = 1e-5            # config.rms_norm_eps
QK_NORM_EPS = 1e-6        # L2Norm default eps (rms_norm_eps is passed as `dim` in the module!)
ROPE_THETA = 500000.0
ACT_DTYPE = jnp.float32   # activations / residual stream
W_DTYPE = jnp.bfloat16    # MXU-native weight storage


# ------------------------- fused decoder-layer kernel -------------------------
def _decoder_layer_kernel(x_ref, gin_ref, gpost_ref, wqkv_ref, wo_ref,
                          wgu_ref, wd_ref, cosk_ref, sink_ref,
                          cosq_ref, sinq_ref, mask_ref,
                          o_ref, kout_ref, vout_ref, *,
                          rms_eps, qk_eps, batch, seq,
                          num_heads, num_kv_heads, head_dim, intermediate):
    """Whole decoder layer for the full (batch*seq, hidden) slab in one call."""
    BS = batch * seq
    D = head_dim
    H = num_heads
    KVH = num_kv_heads
    grp = H // KVH
    qd = H * D
    kd = KVH * D
    d2 = D // 2
    scale = 1.0 / (D ** 0.5)

    # ---- input RMSNorm (f32 elementwise) fused with QKV projection (bf16 MXU) ----
    x = x_ref[...].astype(jnp.float32)                         # (BS, hidden); also residual
    var = jnp.mean(x * x, axis=-1, keepdims=True)
    xn = x * jax.lax.rsqrt(var + rms_eps) * gin_ref[...].astype(jnp.float32)
    qkv = jnp.dot(xn.astype(jnp.bfloat16), wqkv_ref[...],
                  preferred_element_type=jnp.float32)          # (BS, (H+2*KVH)*D), f32

    cosk = cosk_ref[...]                                       # (BS, D) f32
    sink = sink_ref[...]                                       # sign-folded sin, (BS, D)
    cosq = cosq_ref[...]                                       # (grp*BS, D)
    sinq = sinq_ref[...]                                       # (grp*BS, D)
    mask_q = mask_ref[...]                                     # (grp*BS, BS) additive 0/-1e30

    def rope(t, c, s_signed):
        # rotate_half via an XLU lane-roll by D/2; the half-negation is folded into
        # the host-precomputed s_signed table.
        # TODO(synk): Llama4's "polar compatible" rope interleaves even/odd pairs;
        # this uses the equivalent split-half (HF rotate_half) layout convention.
        return t * c + pltpu.roll(t, shift=d2, axis=1) * s_signed

    def l2norm(t):
        return t * jax.lax.rsqrt(jnp.mean(t * t, axis=-1, keepdims=True) + qk_eps)

    h_acc = x   # residual + per-head o_proj contributions accumulated below
    for kvh in range(KVH):
        k_h = qkv[:, qd + kvh * D: qd + (kvh + 1) * D]                       # (BS, D)
        v_h = qkv[:, qd + kd + kvh * D: qd + kd + (kvh + 1) * D]             # (BS, D)
        k_rot = l2norm(rope(k_h, cosk, sink))                                # (BS, D) f32

        # Emit K/V caches directly in (B, KVH, S, D) layout (no relayout outside).
        for b in range(batch):
            kout_ref[b, kvh, :, :] = k_rot[b * seq:(b + 1) * seq, :].astype(kout_ref.dtype)
            vout_ref[b, kvh, :, :] = v_h[b * seq:(b + 1) * seq, :].astype(vout_ref.dtype)

        # Stack the `grp` query heads sharing this KV head along rows -> (grp*BS, D),
        # then a single RoPE/L2Norm and a single score/PV matmul pair covers both
        # batches and both heads (cross-batch entries killed by the block-diag mask).
        q_stack = jnp.concatenate(
            [qkv[:, (kvh * grp + g) * D: (kvh * grp + g + 1) * D] for g in range(grp)],
            axis=0)
        q_rot = l2norm(rope(q_stack, cosq, sinq))                            # (grp*BS, D)

        scores = jax.lax.dot_general(
            q_rot.astype(jnp.bfloat16), k_rot.astype(jnp.bfloat16),
            (((1,), (1,)), ((), ())),
            preferred_element_type=jnp.float32) * scale                      # (grp*BS, BS)
        scores = scores + mask_q
        m = jnp.max(scores, axis=-1, keepdims=True)
        p = jnp.exp(scores - m)
        p = p * pl.reciprocal(jnp.sum(p, axis=-1, keepdims=True), approx=True)
        ctx = jnp.dot(p.astype(jnp.bfloat16), v_h.astype(jnp.bfloat16),
                      preferred_element_type=jnp.float32)                    # (grp*BS, D)

        # Per-head o_proj accumulation (no lane-concat of the attention output).
        for g in range(grp):
            head = kvh * grp + g
            h_acc = h_acc + jnp.dot(
                ctx[g * BS:(g + 1) * BS, :].astype(jnp.bfloat16),
                wo_ref[head * D:(head + 1) * D, :],
                preferred_element_type=jnp.float32)

    # ---- post-attention RMSNorm + SwiGLU MLP (packed gate|up) + final residual ----
    var2 = jnp.mean(h_acc * h_acc, axis=-1, keepdims=True)
    hn = (h_acc * jax.lax.rsqrt(var2 + rms_eps) *
          gpost_ref[...].astype(jnp.float32)).astype(jnp.bfloat16)
    gu = jnp.dot(hn, wgu_ref[...], preferred_element_type=jnp.float32)       # (BS, 2*I)
    gate = gu[:, :intermediate]
    up = gu[:, intermediate:]
    act = ((gate * jax.nn.sigmoid(gate)) * up).astype(jnp.bfloat16)
    down = jnp.dot(act, wd_ref[...], preferred_element_type=jnp.float32)
    o_ref[...] = (h_acc + down).astype(o_ref.dtype)


# ------------------------------ glue / wrapper ------------------------------
def rope_tables(position_ids, dim, theta):
    inv_freq = 1.0 / (theta ** (jnp.arange(0, dim, 2, dtype=jnp.float32) / dim))
    freqs = position_ids.astype(jnp.float32)[:, None] * inv_freq[None, :]    # (S, D/2)
    cos = jnp.cos(jnp.concatenate([freqs, freqs], axis=-1))                  # (S, D)
    sin = jnp.sin(jnp.concatenate([freqs, freqs], axis=-1))                  # (S, D)
    # Sign-folded sin for the roll-based rotate_half: rot(t)*sin_signed == rotate_half(t)*sin.
    sin_signed = jnp.concatenate([-jnp.sin(freqs), jnp.sin(freqs)], axis=-1)
    return cos, sin, sin_signed


def decoder_layer_forward(params, hidden_states, attention_mask, position_ids):
    """Pallas implementation of NeuronLlamaDecoderLayer.forward (dense MLP branch)."""
    B, S, Hd = hidden_states.shape
    grp = NUM_HEADS // NUM_KV_HEADS
    BS = B * S

    x2d = hidden_states.reshape(BS, Hd)
    cos, sin, sin_signed = rope_tables(position_ids, HEAD_DIM, ROPE_THETA)

    # Grid-invariant RoPE tables, replicated on the host (no in-kernel concats):
    cosk = jnp.tile(cos, (B, 1))                   # (B*S, D) for K
    sink = jnp.tile(sin_signed, (B, 1))
    cosq = jnp.tile(cosk, (grp, 1))                # (grp*B*S, D) for row-stacked Q
    sinq = jnp.tile(sink, (grp, 1))

    # Block-diagonal (per-batch) causal additive mask for the row-stacked queries.
    blockdiag = jnp.kron(jnp.eye(B, dtype=attention_mask.dtype), attention_mask)
    add_mask = jnp.where(blockdiag > 0, 0.0, -1e30).astype(jnp.float32)      # (B*S, B*S)
    mask_q = jnp.tile(add_mask, (grp, 1))                                    # (grp*B*S, B*S)

    kernel = functools.partial(
        _decoder_layer_kernel, rms_eps=RMS_EPS, qk_eps=QK_NORM_EPS,
        batch=B, seq=S, num_heads=NUM_HEADS, num_kv_heads=NUM_KV_HEADS,
        head_dim=HEAD_DIM, intermediate=INTERMEDIATE)

    # No grid: single invocation, whole arrays resident in VMEM (single-buffered).
    out2d, k_cache, v_cache = pl.pallas_call(
        kernel,
        out_shape=(
            jax.ShapeDtypeStruct((BS, Hd), hidden_states.dtype),
            jax.ShapeDtypeStruct((B, NUM_KV_HEADS, S, HEAD_DIM), hidden_states.dtype),
            jax.ShapeDtypeStruct((B, NUM_KV_HEADS, S, HEAD_DIM), hidden_states.dtype),
        ),
    )(x2d, params["input_ln_w"].reshape(1, -1), params["post_ln_w"].reshape(1, -1),
      params["wqkv"], params["wo"], params["wgu"], params["wd"],
      cosk, sink, cosq, sinq, mask_q)

    hidden_out = out2d.reshape(B, S, Hd)
    # TODO(synk): in-place KV-cache update of past_key_value is handled outside this
    # kernel; K returned here is post-RoPE + post-qk-norm (HF Llama4 cache convention).
    return hidden_out, (k_cache, v_cache), cos, sin, None


# ------------------------------ pure-JAX reference ------------------------------
def reference_forward(params, hs, mask, pos_ids):
    def rmsnorm(h, w, eps):
        var = jnp.mean(h * h, axis=-1, keepdims=True)
        return w * (h * jax.lax.rsqrt(var + eps))

    B, S, Hd = hs.shape
    wqkv = params["wqkv"].astype(jnp.float32)
    wo = params["wo"].astype(jnp.float32)
    wgu = params["wgu"].astype(jnp.float32)
    wg = wgu[:, :INTERMEDIATE]
    wu = wgu[:, INTERMEDIATE:]
    wd = params["wd"].astype(jnp.float32)

    f32 = hs.astype(jnp.float32)
    residual = f32.reshape(B * S, Hd)
    h = rmsnorm(f32, params["input_ln_w"], RMS_EPS).reshape(B * S, Hd)
    qkv = h @ wqkv
    qd, kd = NUM_HEADS * HEAD_DIM, NUM_KV_HEADS * HEAD_DIM
    q = qkv[:, :qd].reshape(B, S, NUM_HEADS, HEAD_DIM).transpose(0, 2, 1, 3)
    k = qkv[:, qd:qd + kd].reshape(B, S, NUM_KV_HEADS, HEAD_DIM).transpose(0, 2, 1, 3)
    v = qkv[:, qd + kd:].reshape(B, S, NUM_KV_HEADS, HEAD_DIM).transpose(0, 2, 1, 3)

    cos, sin, _ = rope_tables(pos_ids, HEAD_DIM, ROPE_THETA)

    def rotate_half(x):
        x1, x2 = jnp.split(x, 2, axis=-1)
        return jnp.concatenate([-x2, x1], axis=-1)

    q = q * cos + rotate_half(q) * sin
    k = k * cos + rotate_half(k) * sin

    def l2n(x):
        return x * jax.lax.rsqrt(jnp.mean(x * x, axis=-1, keepdims=True) + QK_NORM_EPS)

    q, k = l2n(q), l2n(k)
    grp = NUM_HEADS // NUM_KV_HEADS
    k_r, v_r = jnp.repeat(k, grp, axis=1), jnp.repeat(v, grp, axis=1)
    scores = jnp.einsum("bhqd,bhkd->bhqk", q, k_r) / (HEAD_DIM ** 0.5)
    scores = jnp.where(mask[None, None] > 0, scores, jnp.float32(-1e30))
    p = jax.nn.softmax(scores, axis=-1)
    attn = jnp.einsum("bhqk,bhkd->bhqd", p, v_r)
    attn2d = attn.transpose(0, 2, 1, 3).reshape(B * S, NUM_HEADS * HEAD_DIM)

    h = residual + attn2d @ wo
    residual2 = h
    hn = rmsnorm(h, params["post_ln_w"], RMS_EPS)
    g, u = hn @ wg, hn @ wu
    mlp = (g * jax.nn.sigmoid(g) * u) @ wd
    return (residual2 + mlp).reshape(B, S, Hd)


# ----------------------------------- main -----------------------------------
if __name__ == "__main__":
    key = jax.random.PRNGKey(0)
    k_x, k_q, k_k, k_v, k_o, k_g, k_u, k_d = jax.random.split(key, 8)
    scale = 0.02

    wq = scale * jax.random.normal(k_q, (HIDDEN, NUM_HEADS * HEAD_DIM), jnp.float32)
    wk = scale * jax.random.normal(k_k, (HIDDEN, NUM_KV_HEADS * HEAD_DIM), jnp.float32)
    wv = scale * jax.random.normal(k_v, (HIDDEN, NUM_KV_HEADS * HEAD_DIM), jnp.float32)
    wg = scale * jax.random.normal(k_g, (HIDDEN, INTERMEDIATE), jnp.float32)
    wu = scale * jax.random.normal(k_u, (HIDDEN, INTERMEDIATE), jnp.float32)
    params = {
        "input_ln_w": jnp.ones((HIDDEN,), jnp.float32),        # LlamaRMSNormV2 init = ones
        "post_ln_w": jnp.ones((HIDDEN,), jnp.float32),
        "wqkv": jnp.concatenate([wq, wk, wv], axis=1).astype(W_DTYPE),
        "wo": (scale * jax.random.normal(k_o, (NUM_HEADS * HEAD_DIM, HIDDEN),
                                         jnp.float32)).astype(W_DTYPE),
        "wgu": jnp.concatenate([wg, wu], axis=1).astype(W_DTYPE),   # packed gate|up
        "wd": (scale * jax.random.normal(k_d, (INTERMEDIATE, HIDDEN),
                                         jnp.float32)).astype(W_DTYPE),
    }

    hidden_states = jax.random.normal(k_x, (BATCH, SEQ, HIDDEN), ACT_DTYPE)
    position_ids = jnp.arange(SEQ, dtype=jnp.int32)
    attention_mask = jnp.tril(jnp.ones((SEQ, SEQ), jnp.float32))   # causal, 1.0 = attend

    out, present_kv, cos_cache, sin_cache, _ = decoder_layer_forward(
        params, hidden_states, attention_mask, position_ids)
    out = jax.block_until_ready(out)

    ref = jax.block_until_ready(
        reference_forward(params, hidden_states, attention_mask, position_ids))

    assert out.shape == (BATCH, SEQ, HIDDEN) and bool(jnp.all(jnp.isfinite(out)))
    assert present_kv[0].shape == (BATCH, NUM_KV_HEADS, SEQ, HEAD_DIM)
    assert present_kv[1].shape == (BATCH, NUM_KV_HEADS, SEQ, HEAD_DIM)
    np.testing.assert_allclose(np.asarray(out), np.asarray(ref), rtol=2e-2, atol=2e-2)
    print("KERNEL_OK")
</pallas_src>

<mosaic_0001>
module attributes {stable_mosaic.version = 11 : i64} {
  func.func @_decoder_layer_kernel(%arg0: memref<32x256xf32, #tpu.memory_space<vmem>>, %arg1: memref<1x256xf32, #tpu.memory_space<vmem>>, %arg2: memref<1x256xf32, #tpu.memory_space<vmem>>, %arg3: memref<256x1024xbf16, #tpu.memory_space<vmem>>, %arg4: memref<512x256xbf16, #tpu.memory_space<vmem>>, %arg5: memref<256x1024xbf16, #tpu.memory_space<vmem>>, %arg6: memref<512x256xbf16, #tpu.memory_space<vmem>>, %arg7: memref<32x128xf32, #tpu.memory_space<vmem>>, %arg8: memref<32x128xf32, #tpu.memory_space<vmem>>, %arg9: memref<64x128xf32, #tpu.memory_space<vmem>>, %arg10: memref<64x128xf32, #tpu.memory_space<vmem>>, %arg11: memref<64x32xf32, #tpu.memory_space<vmem>>, %arg12: memref<32x256xf32, #tpu.memory_space<vmem>>, %arg13: memref<2x2x16x128xf32, #tpu.memory_space<vmem>>, %arg14: memref<2x2x16x128xf32, #tpu.memory_space<vmem>>) attributes {dimension_semantics = [], scalar_prefetch = 0 : i64, scratch_operands = 0 : i64, tpu.core_type = #tpu.core_type<tc>} {
    %c0 = arith.constant 0 : index
    %c0_0 = arith.constant 0 : index
    %0 = vector.load %arg0[%c0, %c0_0] : memref<32x256xf32, #tpu.memory_space<vmem>>, vector<32x256xf32>
    %1 = arith.mulf %0, %0 : vector<32x256xf32>
    %cst = arith.constant dense<0.000000e+00> : vector<32xf32>
    %2 = vector.multi_reduction <add>, %1, %cst [1] : vector<32x256xf32> to vector<32xf32>
    %3 = vector.shape_cast %2 : vector<32xf32> to vector<32x1xf32>
    %cst_1 = arith.constant 2.560000e+02 : f32
    %4 = vector.broadcast %cst_1 : f32 to vector<32x1xf32>
    %5 = arith.divf %3, %4 : vector<32x1xf32>
    %cst_2 = arith.constant 9.99999974E-6 : f32
    %6 = vector.broadcast %cst_2 : f32 to vector<32x1xf32>
    %7 = arith.addf %5, %6 : vector<32x1xf32>
    %8 = math.rsqrt %7 : vector<32x1xf32>
    %9 = vector.broadcast %8 : vector<32x1xf32> to vector<32x256xf32>
    %10 = arith.mulf %0, %9 : vector<32x256xf32>
    %c0_3 = arith.constant 0 : index
    %c0_4 = arith.constant 0 : index
    %11 = vector.load %arg1[%c0_3, %c0_4] : memref<1x256xf32, #tpu.memory_space<vmem>>, vector<1x256xf32>
    %12 = vector.broadcast %11 : vector<1x256xf32> to vector<32x256xf32>
    %13 = arith.mulf %10, %12 : vector<32x256xf32>
    %14 = arith.truncf %13 : vector<32x256xf32> to vector<32x256xbf16>
    %c0_5 = arith.constant 0 : index
    %c0_6 = arith.constant 0 : index
    %15 = vector.load %arg3[%c0_5, %c0_6] : memref<256x1024xbf16, #tpu.memory_space<vmem>>, vector<256x1024xbf16>
    %cst_7 = arith.constant dense<0.000000e+00> : vector<32x1024xf32>
    %16 = tpu.matmul %14, %15, %cst_7 {dimension_numbers = #tpu.dot_dimension_numbers<[1], [0], [0], [1], [0, 0, 1, 1], [], []>} : vector<32x256xbf16>, vector<256x1024xbf16>, vector<32x1024xf32> -> vector<32x1024xf32>
    %c0_8 = arith.constant 0 : index
    %c0_9 = arith.constant 0 : index
    %17 = vector.load %arg7[%c0_8, %c0_9] : memref<32x128xf32, #tpu.memory_space<vmem>>, vector<32x128xf32>
    %c0_10 = arith.constant 0 : index
    %c0_11 = arith.constant 0 : index
    %18 = vector.load %arg8[%c0_10, %c0_11] : memref<32x128xf32, #tpu.memory_space<vmem>>, vector<32x128xf32>
    %c0_12 = arith.constant 0 : index
    %c0_13 = arith.constant 0 : index
    %19 = vector.load %arg9[%c0_12, %c0_13] : memref<64x128xf32, #tpu.memory_space<vmem>>, vector<64x128xf32>
    %c0_14 = arith.constant 0 : index
    %c0_15 = arith.constant 0 : index
    %20 = vector.load %arg10[%c0_14, %c0_15] : memref<64x128xf32, #tpu.memory_space<vmem>>, vector<64x128xf32>
    %c0_16 = arith.constant 0 : index
    %c0_17 = arith.constant 0 : index
    %21 = vector.load %arg11[%c0_16, %c0_17] : memref<64x32xf32, #tpu.memory_space<vmem>>, vector<64x32xf32>
    %22 = vector.extract_strided_slice %16 {offsets = [0, 512], sizes = [32, 128], strides = [1, 1]} : vector<32x1024xf32> to vector<32x128xf32>
    %23 = vector.extract_strided_slice %16 {offsets = [0, 768], sizes = [32, 128], strides = [1, 1]} : vector<32x1024xf32> to vector<32x128xf32>
    %24 = arith.mulf %22, %17 : vector<32x128xf32>
    %c64_i32 = arith.constant 64 : i32
    %25 = tpu.dynamic_rotate %22 by %c64_i32 dim 1 : vector<32x128xf32>, i32 -> vector<32x128xf32>
    %26 = arith.mulf %25, %18 : vector<32x128xf32>
    %27 = arith.addf %24, %26 : vector<32x128xf32>
    %28 = arith.mulf %27, %27 : vector<32x128xf32>
    %cst_18 = arith.constant dense<0.000000e+00> : vector<32xf32>
    %29 = vector.multi_reduction <add>, %28, %cst_18 [1] : vector<32x128xf32> to vector<32xf32>
    %30 = vector.shape_cast %29 : vector<32xf32> to vector<32x1xf32>
    %cst_19 = arith.constant 1.280000e+02 : f32
    %31 = vector.broadcast %cst_19 : f32 to vector<32x1xf32>
    %32 = arith.divf %30, %31 : vector<32x1xf32>
    %cst_20 = arith.constant 9.99999997E-7 : f32
    %33 = vector.broadcast %cst_20 : f32 to vector<32x1xf32>
    %34 = arith.addf %32, %33 : vector<32x1xf32>
    %35 = math.rsqrt %34 : vector<32x1xf32>
    %36 = vector.broadcast %35 : vector<32x1xf32> to vector<32x128xf32>
    %37 = arith.mulf %27, %36 : vector<32x128xf32>
    %38 = vector.extract_strided_slice %37 {offsets = [0, 0], sizes = [16, 128], strides = [1, 1]} : vector<32x128xf32> to vector<16x128xf32>
    %c0_21 = arith.constant 0 : index
    %c0_22 = arith.constant 0 : index
    %c0_23 = arith.constant 0 : index
    %c0_24 = arith.constant 0 : index
    %39 = vector.load %arg13[%c0_21, %c0_22, %c0_23, %c0_24] : memref<2x2x16x128xf32, #tpu.memory_space<vmem>>, vector<1x1x16x128xf32>
    %40 = vector.shape_cast %39 : vector<1x1x16x128xf32> to vector<16x128xf32>
    %41 = vector.shape_cast %38 : vector<16x128xf32> to vector<1x1x16x128xf32>
    tpu.vector_store %arg13[%c0_21, %c0_22, %c0_23, %c0_24], %41 {strides = array<i32>} : memref<2x2x16x128xf32, #tpu.memory_space<vmem>>, vector<1x1x16x128xf32>,
    %42 = vector.extract_strided_slice %23 {offsets = [0, 0], sizes = [16, 128], strides = [1, 1]} : vector<32x128xf32> to vector<16x128xf32>
    %c0_25 = arith.constant 0 : index
    %c0_26 = arith.constant 0 : index
    %c0_27 = arith.constant 0 : index
    %c0_28 = arith.constant 0 : index
    %43 = vector.load %arg14[%c0_25, %c0_26, %c0_27, %c0_28] : memref<2x2x16x128xf32, #tpu.memory_space<vmem>>, vector<1x1x16x128xf32>
    %44 = vector.shape_cast %43 : vector<1x1x16x128xf32> to vector<16x128xf32>
    %45 = vector.shape_cast %42 : vector<16x128xf32> to vector<1x1x16x128xf32>
    tpu.vector_store %arg14[%c0_25, %c0_26, %c0_27, %c0_28], %45 {strides = array<i32>} : memref<2x2x16x128xf32, #tpu.memory_space<vmem>>, vector<1x1x16x128xf32>,
    %46 = vector.extract_strided_slice %37 {offsets = [16, 0], sizes = [16, 128], strides = [1, 1]} : vector<32x128xf32> to vector<16x128xf32>
    %c1 = arith.constant 1 : index
    %c0_29 = arith.constant 0 : index
    %c0_30 = arith.constant 0 : index
    %c0_31 = arith.constant 0 : index
    %47 = vector.load %arg13[%c1, %c0_29, %c0_30, %c0_31] : memref<2x2x16x128xf32, #tpu.memory_space<vmem>>, vector<1x1x16x128xf32>
    %48 = vector.shape_cast %47 : vector<1x1x16x128xf32> to vector<16x128xf32>
    %49 = vector.shape_cast %46 : vector<16x128xf32> to vector<1x1x16x128xf32>
    tpu.vector_store %arg13[%c1, %c0_29, %c0_30, %c0_31], %49 {strides = array<i32>} : memref<2x2x16x128xf32, #tpu.memory_space<vmem>>, vector<1x1x16x128xf32>,
    %50 = vector.extract_strided_slice %23 {offsets = [16, 0], sizes = [16, 128], strides = [1, 1]} : vector<32x128xf32> to vector<16x128xf32>
    %c1_32 = arith.constant 1 : index
    %c0_33 = arith.constant 0 : index
    %c0_34 = arith.constant 0 : index
    %c0_35 = arith.constant 0 : index
    %51 = vector.load %arg14[%c1_32, %c0_33, %c0_34, %c0_35] : memref<2x2x16x128xf32, #tpu.memory_space<vmem>>, vector<1x1x16x128xf32>
    %52 = vector.shape_cast %51 : vector<1x1x16x128xf32> to vector<16x128xf32>
    %53 = vector.shape_cast %50 : vector<16x128xf32> to vector<1x1x16x128xf32>
    tpu.vector_store %arg14[%c1_32, %c0_33, %c0_34, %c0_35], %53 {strides = array<i32>} : memref<2x2x16x128xf32, #tpu.memory_space<vmem>>, vector<1x1x16x128xf32>,
    %54 = vector.extract_strided_slice %16 {offsets = [0, 0], sizes = [32, 128], strides = [1, 1]} : vector<32x1024xf32> to vector<32x128xf32>
    %55 = vector.extract_strided_slice %16 {offsets = [0, 128], sizes = [32, 128], strides = [1, 1]} : vector<32x1024xf32> to vector<32x128xf32>
    %56 = tpu.concatenate %54, %55 in 0 : vector<32x128xf32>, vector<32x128xf32> -> vector<64x128xf32>
    %57 = arith.mulf %56, %19 : vector<64x128xf32>
    %c64_i32_36 = arith.constant 64 : i32
    %58 = tpu.dynamic_rotate %56 by %c64_i32_36 dim 1 : vector<64x128xf32>, i32 -> vector<64x128xf32>
    %59 = arith.mulf %58, %20 : vector<64x128xf32>
    %60 = arith.addf %57, %59 : vector<64x128xf32>
    %61 = arith.mulf %60, %60 : vector<64x128xf32>
    %cst_37 = arith.constant dense<0.000000e+00> : vector<64xf32>
    %62 = vector.multi_reduction <add>, %61, %cst_37 [1] : vector<64x128xf32> to vector<64xf32>
    %63 = vector.shape_cast %62 : vector<64xf32> to vector<64x1xf32>
    %cst_38 = arith.constant 1.280000e+02 : f32
    %64 = vector.broadcast %cst_38 : f32 to vector<64x1xf32>
    %65 = arith.divf %63, %64 : vector<64x1xf32>
    %cst_39 = arith.constant 9.99999997E-7 : f32
    %66 = vector.broadcast %cst_39 : f32 to vector<64x1xf32>
    %67 = arith.addf %65, %66 : vector<64x1xf32>
    %68 = math.rsqrt %67 : vector<64x1xf32>
    %69 = vector.broadcast %68 : vector<64x1xf32> to vector<64x128xf32>
    %70 = arith.mulf %60, %69 : vector<64x128xf32>
    %71 = arith.truncf %70 : vector<64x128xf32> to vector<64x128xbf16>
    %72 = arith.truncf %37 : vector<32x128xf32> to vector<32x128xbf16>
    %cst_40 = arith.constant dense<0.000000e+00> : vector<64x32xf32>
    %73 = tpu.matmul %71, %72, %cst_40 {dimension_numbers = #tpu.dot_dimension_numbers<[1], [1], [0], [0], [0, 0, 1, 0], [], []>} : vector<64x128xbf16>, vector<32x128xbf16>, vector<64x32xf32> -> vector<64x32xf32>
    %cst_41 = arith.constant 0.0883883461 : f32
    %74 = vector.broadcast %cst_41 : f32 to vector<64x32xf32>
    %75 = arith.mulf %73, %74 : vector<64x32xf32>
    %76 = arith.addf %75, %21 : vector<64x32xf32>
    %cst_42 = arith.constant dense<0xFF800000> : vector<64xf32>
    %77 = vector.multi_reduction <maximumf>, %76, %cst_42 [1] : vector<64x32xf32> to vector<64xf32>
    %78 = vector.shape_cast %77 : vector<64xf32> to vector<64x1xf32>
    %79 = vector.broadcast %78 : vector<64x1xf32> to vector<64x32xf32>
    %80 = arith.subf %76, %79 : vector<64x32xf32>
    %81 = math.exp %80 : vector<64x32xf32>
    %cst_43 = arith.constant dense<0.000000e+00> : vector<64xf32>
    %82 = vector.multi_reduction <add>, %81, %cst_43 [1] : vector<64x32xf32> to vector<64xf32>
    %83 = vector.shape_cast %82 : vector<64xf32> to vector<64x1xf32>
    %84 = tpu.reciprocal %83 {approx = true} : vector<64x1xf32> -> vector<64x1xf32>
    %85 = vector.broadcast %84 : vector<64x1xf32> to vector<64x32xf32>
    %86 = arith.mulf %81, %85 : vector<64x32xf32>
    %87 = arith.truncf %86 : vector<64x32xf32> to vector<64x32xbf16>
    %88 = arith.truncf %23 : vector<32x128xf32> to vector<32x128xbf16>
    %cst_44 = arith.constant dense<0.000000e+00> : vector<64x128xf32>
    %89 = tpu.matmul %87, %88, %cst_44 {dimension_numbers = #tpu.dot_dimension_numbers<[1], [0], [0], [1], [0, 0, 1, 1], [], []>} : vector<64x32xbf16>, vector<32x128xbf16>, vector<64x128xf32> -> vector<64x128xf32>
    %90 = vector.extract_strided_slice %89 {offsets = [0, 0], sizes = [32, 128], strides = [1, 1]} : vector<64x128xf32> to vector<32x128xf32>
    %91 = arith.truncf %90 : vector<32x128xf32> to vector<32x128xbf16>
    %c0_45 = arith.constant 0 : index
    %c0_46 = arith.constant 0 : index
    %92 = vector.load %arg4[%c0_45, %c0_46] : memref<512x256xbf16, #tpu.memory_space<vmem>>, vector<128x256xbf16>
    %cst_47 = arith.constant dense<0.000000e+00> : vector<32x256xf32>
    %93 = tpu.matmul %91, %92, %cst_47 {dimension_numbers = #tpu.dot_dimension_numbers<[1], [0], [0], [1], [0, 0, 1, 1], [], []>} : vector<32x128xbf16>, vector<128x256xbf16>, vector<32x256xf32> -> vector<32x256xf32>
    %94 = arith.addf %0, %93 : vector<32x256xf32>
    %95 = vector.extract_strided_slice %89 {offsets = [32, 0], sizes = [32, 128], strides = [1, 1]} : vector<64x128xf32> to vector<32x128xf32>
    %96 = arith.truncf %95 : vector<32x128xf32> to vector<32x128xbf16>
    %c128 = arith.constant 128 : index
    %c0_48 = arith.constant 0 : index
    %97 = vector.load %arg4[%c128, %c0_48] : memref<512x256xbf16, #tpu.memory_space<vmem>>, vector<128x256xbf16>
    %cst_49 = arith.constant dense<0.000000e+00> : vector<32x256xf32>
    %98 = tpu.matmul %96, %97, %cst_49 {dimension_numbers = #tpu.dot_dimension_numbers<[1], [0], [0], [1], [0, 0, 1, 1], [], []>} : vector<32x128xbf16>, vector<128x256xbf16>, vector<32x256xf32> -> vector<32x256xf32>
    %99 = arith.addf %94, %98 : vector<32x256xf32>
    %100 = vector.extract_strided_slice %16 {offsets = [0, 640], sizes = [32, 128], strides = [1, 1]} : vector<32x1024xf32> to vector<32x128xf32>
    %101 = vector.extract_strided_slice %16 {offsets = [0, 896], sizes = [32, 128], strides = [1, 1]} : vector<32x1024xf32> to vector<32x128xf32>
    %102 = arith.mulf %100, %17 : vector<32x128xf32>
    %c64_i32_50 = arith.constant 64 : i32
    %103 = tpu.dynamic_rotate %100 by %c64_i32_50 dim 1 : vector<32x128xf32>, i32 -> vector<32x128xf32>
    %104 = arith.mulf %103, %18 : vector<32x128xf32>
    %105 = arith.addf %102, %104 : vector<32x128xf32>
    %106 = arith.mulf %105, %105 : vector<32x128xf32>
    %cst_51 = arith.constant dense<0.000000e+00> : vector<32xf32>
    %107 = vector.multi_reduction <add>, %106, %cst_51 [1] : vector<32x128xf32> to vector<32xf32>
    %108 = vector.shape_cast %107 : vector<32xf32> to vector<32x1xf32>
    %cst_52 = arith.constant 1.280000e+02 : f32
    %109 = vector.broadcast %cst_52 : f32 to vector<32x1xf32>
    %110 = arith.divf %108, %109 : vector<32x1xf32>
    %cst_53 = arith.constant 9.99999997E-7 : f32
    %111 = vector.broadcast %cst_53 : f32 to vector<32x1xf32>
    %112 = arith.addf %110, %111 : vector<32x1xf32>
    %113 = math.rsqrt %112 : vector<32x1xf32>
    %114 = vector.broadcast %113 : vector<32x1xf32> to vector<32x128xf32>
    %115 = arith.mulf %105, %114 : vector<32x128xf32>
    %116 = vector.extract_strided_slice %115 {offsets = [0, 0], sizes = [16, 128], strides = [1, 1]} : vector<32x128xf32> to vector<16x128xf32>
    %c0_54 = arith.constant 0 : index
    %c1_55 = arith.constant 1 : index
    %c0_56 = arith.constant 0 : index
    %c0_57 = arith.constant 0 : index
    %117 = vector.load %arg13[%c0_54, %c1_55, %c0_56, %c0_57] : memref<2x2x16x128xf32, #tpu.memory_space<vmem>>, vector<1x1x16x128xf32>
    %118 = vector.shape_cast %117 : vector<1x1x16x128xf32> to vector<16x128xf32>
    %119 = vector.shape_cast %116 : vector<16x128xf32> to vector<1x1x16x128xf32>
    tpu.vector_store %arg13[%c0_54, %c1_55, %c0_56, %c0_57], %119 {strides = array<i32>} : memref<2x2x16x128xf32, #tpu.memory_space<vmem>>, vector<1x1x16x128xf32>,
    %120 = vector.extract_strided_slice %101 {offsets = [0, 0], sizes = [16, 128], strides = [1, 1]} : vector<32x128xf32> to vector<16x128xf32>
    %c0_58 = arith.constant 0 : index
    %c1_59 = arith.constant 1 : index
    %c0_60 = arith.constant 0 : index
    %c0_61 = arith.constant 0 : index
    %121 = vector.load %arg14[%c0_58, %c1_59, %c0_60, %c0_61] : memref<2x2x16x128xf32, #tpu.memory_space<vmem>>, vector<1x1x16x128xf32>
    %122 = vector.shape_cast %121 : vector<1x1x16x128xf32> to vector<16x128xf32>
    %123 = vector.shape_cast %120 : vector<16x128xf32> to vector<1x1x16x128xf32>
    tpu.vector_store %arg14[%c0_58, %c1_59, %c0_60, %c0_61], %123 {strides = array<i32>} : memref<2x2x16x128xf32, #tpu.memory_space<vmem>>, vector<1x1x16x128xf32>,
    %124 = vector.extract_strided_slice %115 {offsets = [16, 0], sizes = [16, 128], strides = [1, 1]} : vector<32x128xf32> to vector<16x128xf32>
    %c1_62 = arith.constant 1 : index
    %c1_63 = arith.constant 1 : index
    %c0_64 = arith.constant 0 : index
    %c0_65 = arith.constant 0 : index
    %125 = vector.load %arg13[%c1_62, %c1_63, %c0_64, %c0_65] : memref<2x2x16x128xf32, #tpu.memory_space<vmem>>, vector<1x1x16x128xf32>
    %126 = vector.shape_cast %125 : vector<1x1x16x128xf32> to vector<16x128xf32>
    %127 = vector.shape_cast %124 : vector<16x128xf32> to vector<1x1x16x128xf32>
    tpu.vector_store %arg13[%c1_62, %c1_63, %c0_64, %c0_65], %127 {strides = array<i32>} : memref<2x2x16x128xf32, #tpu.memory_space<vmem>>, vector<1x1x16x128xf32>,
    %128 = vector.extract_strided_slice %101 {offsets = [16, 0], sizes = [16, 128], strides = [1, 1]} : vector<32x128xf32> to vector<16x128xf32>
    %c1_66 = arith.constant 1 : index
    %c1_67 = arith.constant 1 : index
    %c0_68 = arith.constant 0 : index
    %c0_69 = arith.constant 0 : index
    %129 = vector.load %arg14[%c1_66, %c1_67, %c0_68, %c0_69] : memref<2x2x16x128xf32, #tpu.memory_space<vmem>>, vector<1x1x16x128xf32>
    %130 = vector.shape_cast %129 : vector<1x1x16x128xf32> to vector<16x128xf32>
    %131 = vector.shape_cast %128 : vector<16x128xf32> to vector<1x1x16x128xf32>
    tpu.vector_store %arg14[%c1_66, %c1_67, %c0_68, %c0_69], %131 {strides = array<i32>} : memref<2x2x16x128xf32, #tpu.memory_space<vmem>>, vector<1x1x16x128xf32>,
    %132 = vector.extract_strided_slice %16 {offsets = [0, 256], sizes = [32, 128], strides = [1, 1]} : vector<32x1024xf32> to vector<32x128xf32>
    %133 = vector.extract_strided_slice %16 {offsets = [0, 384], sizes = [32, 128], strides = [1, 1]} : vector<32x1024xf32> to vector<32x128xf32>
    %134 = tpu.concatenate %132, %133 in 0 : vector<32x128xf32>, vector<32x128xf32> -> vector<64x128xf32>
    %135 = arith.mulf %134, %19 : vector<64x128xf32>
    %c64_i32_70 = arith.constant 64 : i32
    %136 = tpu.dynamic_rotate %134 by %c64_i32_70 dim 1 : vector<64x128xf32>, i32 -> vector<64x128xf32>
    %137 = arith.mulf %136, %20 : vector<64x128xf32>
    %138 = arith.addf %135, %137 : vector<64x128xf32>
    %139 = arith.mulf %138, %138 : vector<64x128xf32>
    %cst_71 = arith.constant dense<0.000000e+00> : vector<64xf32>
    %140 = vector.multi_reduction <add>, %139, %cst_71 [1] : vector<64x128xf32> to vector<64xf32>
    %141 = vector.shape_cast %140 : vector<64xf32> to vector<64x1xf32>
    %cst_72 = arith.constant 1.280000e+02 : f32
    %142 = vector.broadcast %cst_72 : f32 to vector<64x1xf32>
    %143 = arith.divf %141, %142 : vector<64x1xf32>
    %cst_73 = arith.constant 9.99999997E-7 : f32
    %144 = vector.broadcast %cst_73 : f32 to vector<64x1xf32>
    %145 = arith.addf %143, %144 : vector<64x1xf32>
    %146 = math.rsqrt %145 : vector<64x1xf32>
    %147 = vector.broadcast %146 : vector<64x1xf32> to vector<64x128xf32>
    %148 = arith.mulf %138, %147 : vector<64x128xf32>
    %149 = arith.truncf %148 : vector<64x128xf32> to vector<64x128xbf16>
    %150 = arith.truncf %115 : vector<32x128xf32> to vector<32x128xbf16>
    %cst_74 = arith.constant dense<0.000000e+00> : vector<64x32xf32>
    %151 = tpu.matmul %149, %150, %cst_74 {dimension_numbers = #tpu.dot_dimension_numbers<[1], [1], [0], [0], [0, 0, 1, 0], [], []>} : vector<64x128xbf16>, vector<32x128xbf16>, vector<64x32xf32> -> vector<64x32xf32>
    %cst_75 = arith.constant 0.0883883461 : f32
    %152 = vector.broadcast %cst_75 : f32 to vector<64x32xf32>
    %153 = arith.mulf %151, %152 : vector<64x32xf32>
    %154 = arith.addf %153, %21 : vector<64x32xf32>
    %cst_76 = arith.constant dense<0xFF800000> : vector<64xf32>
    %155 = vector.multi_reduction <maximumf>, %154, %cst_76 [1] : vector<64x32xf32> to vector<64xf32>
    %156 = vector.shape_cast %155 : vector<64xf32> to vector<64x1xf32>
    %157 = vector.broadcast %156 : vector<64x1xf32> to vector<64x32xf32>
    %158 = arith.subf %154, %157 : vector<64x32xf32>
    %159 = math.exp %158 : vector<64x32xf32>
    %cst_77 = arith.constant dense<0.000000e+00> : vector<64xf32>
    %160 = vector.multi_reduction <add>, %159, %cst_77 [1] : vector<64x32xf32> to vector<64xf32>
    %161 = vector.shape_cast %160 : vector<64xf32> to vector<64x1xf32>
    %162 = tpu.reciprocal %161 {approx = true} : vector<64x1xf32> -> vector<64x1xf32>
    %163 = vector.broadcast %162 : vector<64x1xf32> to vector<64x32xf32>
    %164 = arith.mulf %159, %163 : vector<64x32xf32>
    %165 = arith.truncf %164 : vector<64x32xf32> to vector<64x32xbf16>
    %166 = arith.truncf %101 : vector<32x128xf32> to vector<32x128xbf16>
    %cst_78 = arith.constant dense<0.000000e+00> : vector<64x128xf32>
    %167 = tpu.matmul %165, %166, %cst_78 {dimension_numbers = #tpu.dot_dimension_numbers<[1], [0], [0], [1], [0, 0, 1, 1], [], []>} : vector<64x32xbf16>, vector<32x128xbf16>, vector<64x128xf32> -> vector<64x128xf32>
    %168 = vector.extract_strided_slice %167 {offsets = [0, 0], sizes = [32, 128], strides = [1, 1]} : vector<64x128xf32> to vector<32x128xf32>
    %169 = arith.truncf %168 : vector<32x128xf32> to vector<32x128xbf16>
    %c256 = arith.constant 256 : index
    %c0_79 = arith.constant 0 : index
    %170 = vector.load %arg4[%c256, %c0_79] : memref<512x256xbf16, #tpu.memory_space<vmem>>, vector<128x256xbf16>
    %cst_80 = arith.constant dense<0.000000e+00> : vector<32x256xf32>
    %171 = tpu.matmul %169, %170, %cst_80 {dimension_numbers = #tpu.dot_dimension_numbers<[1], [0], [0], [1], [0, 0, 1, 1], [], []>} : vector<32x128xbf16>, vector<128x256xbf16>, vector<32x256xf32> -> vector<32x256xf32>
    %172 = arith.addf %99, %171 : vector<32x256xf32>
    %173 = vector.extract_strided_slice %167 {offsets = [32, 0], sizes = [32, 128], strides = [1, 1]} : vector<64x128xf32> to vector<32x128xf32>
    %174 = arith.truncf %173 : vector<32x128xf32> to vector<32x128xbf16>
    %c384 = arith.constant 384 : index
    %c0_81 = arith.constant 0 : index
    %175 = vector.load %arg4[%c384, %c0_81] : memref<512x256xbf16, #tpu.memory_space<vmem>>, vector<128x256xbf16>
    %cst_82 = arith.constant dense<0.000000e+00> : vector<32x256xf32>
    %176 = tpu.matmul %174, %175, %cst_82 {dimension_numbers = #tpu.dot_dimension_numbers<[1], [0], [0], [1], [0, 0, 1, 1], [], []>} : vector<32x128xbf16>, vector<128x256xbf16>, vector<32x256xf32> -> vector<32x256xf32>
    %177 = arith.addf %172, %176 : vector<32x256xf32>
    %178 = arith.mulf %177, %177 : vector<32x256xf32>
    %cst_83 = arith.constant dense<0.000000e+00> : vector<32xf32>
    %179 = vector.multi_reduction <add>, %178, %cst_83 [1] : vector<32x256xf32> to vector<32xf32>
    %180 = vector.shape_cast %179 : vector<32xf32> to vector<32x1xf32>
    %cst_84 = arith.constant 2.560000e+02 : f32
    %181 = vector.broadcast %cst_84 : f32 to vector<32x1xf32>
    %182 = arith.divf %180, %181 : vector<32x1xf32>
    %cst_85 = arith.constant 9.99999974E-6 : f32
    %183 = vector.broadcast %cst_85 : f32 to vector<32x1xf32>
    %184 = arith.addf %182, %183 : vector<32x1xf32>
    %185 = math.rsqrt %184 : vector<32x1xf32>
    %186 = vector.broadcast %185 : vector<32x1xf32> to vector<32x256xf32>
    %187 = arith.mulf %177, %186 : vector<32x256xf32>
    %c0_86 = arith.constant 0 : index
    %c0_87 = arith.constant 0 : index
    %188 = vector.load %arg2[%c0_86, %c0_87] : memref<1x256xf32, #tpu.memory_space<vmem>>, vector<1x256xf32>
    %189 = vector.broadcast %188 : vector<1x256xf32> to vector<32x256xf32>
    %190 = arith.mulf %187, %189 : vector<32x256xf32>
    %191 = arith.truncf %190 : vector<32x256xf32> to vector<32x256xbf16>
    %c0_88 = arith.constant 0 : index
    %c0_89 = arith.constant 0 : index
    %192 = vector.load %arg5[%c0_88, %c0_89] : memref<256x1024xbf16, #tpu.memory_space<vmem>>, vector<256x1024xbf16>
    %cst_90 = arith.constant dense<0.000000e+00> : vector<32x1024xf32>
    %193 = tpu.matmul %191, %192, %cst_90 {dimension_numbers = #tpu.dot_dimension_numbers<[1], [0], [0], [1], [0, 0, 1, 1], [], []>} : vector<32x256xbf16>, vector<256x1024xbf16>, vector<32x1024xf32> -> vector<32x1024xf32>
    %194 = vector.extract_strided_slice %193 {offsets = [0, 0], sizes = [32, 512], strides = [1, 1]} : vector<32x1024xf32> to vector<32x512xf32>
    %195 = vector.extract_strided_slice %193 {offsets = [0, 512], sizes = [32, 512], strides = [1, 1]} : vector<32x1024xf32> to vector<32x512xf32>
    %196 = arith.negf %194 : vector<32x512xf32>
    %197 = math.exp %196 : vector<32x512xf32>
    %cst_91 = arith.constant 1.000000e+00 : f32
    %198 = vector.broadcast %cst_91 : f32 to vector<32x512xf32>
    %199 = arith.addf %198, %197 : vector<32x512xf32>
    %200 = arith.divf %198, %199 : vector<32x512xf32>
    %201 = arith.mulf %194, %200 : vector<32x512xf32>
    %202 = arith.mulf %201, %195 : vector<32x512xf32>
    %203 = arith.truncf %202 : vector<32x512xf32> to vector<32x512xbf16>
    %c0_92 = arith.constant 0 : index
    %c0_93 = arith.constant 0 : index
    %204 = vector.load %arg6[%c0_92, %c0_93] : memref<512x256xbf16, #tpu.memory_space<vmem>>, vector<512x256xbf16>
    %cst_94 = arith.constant dense<0.000000e+00> : vector<32x256xf32>
    %205 = tpu.matmul %203, %204, %cst_94 {dimension_numbers = #tpu.dot_dimension_numbers<[1], [0], [0], [1], [0, 0, 1, 1], [], []>} : vector<32x512xbf16>, vector<512x256xbf16>, vector<32x256xf32> -> vector<32x256xf32>
    %206 = arith.addf %177, %205 : vector<32x256xf32>
    %c0_95 = arith.constant 0 : index
    %c0_96 = arith.constant 0 : index
    %207 = vector.load %arg12[%c0_95, %c0_96] : memref<32x256xf32, #tpu.memory_space<vmem>>, vector<32x256xf32>
    tpu.vector_store %arg12[%c0_95, %c0_96], %206 {strides = array<i32>} : memref<32x256xf32, #tpu.memory_space<vmem>>, vector<32x256xf32>,
    return
  }
}

</mosaic_0001>

<bundles_post_ra>
// kernel: tpu_custom_call.1
= control target key start
LH: loop header
LB: loop body
LE: loop exit
PB: predicated region body
PF: predicated region fallthrough
CT: control target
= control target key end

     0   :  { %20 = vsyncpa [#allocation3], 0  ;;  %s6691_s0 = inlined_call_operand.vmem [shape: f32[32,256], index: 0, kind: input, shape index: {}]   ;;  %s6692_s1 = inlined_call_operand.vmem [shape: f32[1,256], index: 1, kind: input, shape index: {}]   ;;  %s6693_s2 = inlined_call_operand.hbm [shape: f32[1,256], index: 2, kind: input, shape index: {}]   ;;  %s6694_s3 = inlined_call_operand.hbm [shape: bf16[256,1024], index: 3, kind: input, shape index: {}]   ;;  %s6695_s4 = inlined_call_operand.hbm [shape: bf16[512,256], index: 4, kind: input, shape index: {}]   ;;  %s6696_s5 = inlined_call_operand.hbm [shape: bf16[256,1024], index: 5, kind: input, shape index: {}]   ;;  %s6697_s6 = inlined_call_operand.hbm [shape: bf16[512,256], index: 6, kind: input, shape index: {}]   ;;  %s6698_s7 = inlined_call_operand.hbm [shape: f32[32,128], index: 7, kind: input, shape index: {}]   ;;  %s6699_s8 = inlined_call_operand.hbm [shape: f32[32,128], index: 8, kind: input, shape index: {}]   ;;  %s6700_s9 = inlined_call_operand.vmem [shape: f32[64,128], index: 9, kind: input, shape index: {}]   ;;  %s6701_s10 = inlined_call_operand.hbm [shape: f32[64,128], index: 10, kind: input, shape index: {}]   ;;  %s6702_s11 = inlined_call_operand.vmem [shape: f32[64,32], index: 11, kind: input, shape index: {}]   ;;  %s6703_s12 = inlined_call_operand.hbm [shape: f32[32,256], index: 12, kind: output, shape index: {0}]   ;;  %s6704_s13 = inlined_call_operand.hbm [shape: f32[2,2,16,128], index: 13, kind: output, shape index: {1}]   ;;  %s6705_s14 = inlined_call_operand.hbm [shape: f32[2,2,16,128], index: 14, kind: output, shape index: {2}]  }
   0x1   :  { %21 = vsyncpa [#allocation6], 0 }
   0x2   :  { %22 = vsyncpa [#allocation9], 0 }
   0x3   :  { %23 = vsyncpa [#allocation12], 0 }
   0x4   :  { %24 = vsyncpa [#allocation15], 0 }
   0x5   :  { %25 = vsyncpa [#allocation4], 0 }
   0x6   :  { %26 = vsyncpa [#allocation18], 0  ;;  %s5628_s29 = smov [#allocation5]   ;;  %s5372_s17 = scalar_lea.hbm %s6694_s3, 16384 }
   0x7   :  { %s46_s30 = sshll.u32 %s5628_s29, 4  ;;  %p5373_p0 = scmp.ne.s32.totalorder %s6694_s3, %s5372_s17  ;;  %s47_s30 = int_to_ptr.vmem [resolvable:$true] %s46_s30 }
   0x8   :  { %p5376_p1 = scmp.lt.u32.totalorder %s5372_s17, %s6694_s3 }
   0xa   :  { %p5378_p2 = pnand %p5376_p1, %p5373_p0 }
   0xc   :  { %5381 = shalt.err (!%p5378_p2)
}
   0xd   :  { %s5382_s22 = scalar_lea.vmem %s47_s30, 16384  ;;  %p5387_p4 = scmp.lt.s32.totalorder %s47_s30, %s47_s30 }
   0xe   :  { %p5383_p3 = scmp.ne.s32.totalorder %s47_s30, %s5382_s22  ;;  %p5388_p5 = scmp.lt.s32.totalorder %s5382_s22, %s5382_s22 }
  0x10   :  { %p5389_p6 = por %p5388_p5, %p5387_p4 }
  0x12   :  { %p5390_p7 = pnand %p5389_p6, %p5383_p3 }
  0x14   :  { %5393 = shalt.err (!%p5390_p7)
}
  0x15   :  { %s5629_s23 = smov 512   ;;  %s5630_s24 = smov 32  }
  0x16   :  { %52 = dma.hbm_to_vmem [thread:$0]  %s6694_s3, 16384, %s47_s30, [#allocation6], %s5629_s23, %s5629_s23, %s5630_s24  }
  0x17   :  { %s5631_s27 = smov [#allocation8]   ;;  %s5394_s16 = scalar_lea.hbm %s6696_s5, 16384 }
  0x18   :  { %s70_s28 = sshll.u32 %s5631_s27, 4  ;;  %p5395_p8 = scmp.ne.s32.totalorder %s6696_s5, %s5394_s16  ;;  %s71_s28 = int_to_ptr.vmem [resolvable:$true] %s70_s28 }
  0x19   :  { %p5398_p9 = scmp.lt.u32.totalorder %s5394_s16, %s6696_s5 }
  0x1b   :  { %p5400_p10 = pnand %p5398_p9, %p5395_p8 }
  0x1d   :  { %5403 = shalt.err (!%p5400_p10)
}
  0x1e   :  { %s5404_s21 = scalar_lea.vmem %s71_s28, 16384  ;;  %p5409_p12 = scmp.lt.s32.totalorder %s71_s28, %s71_s28 }
  0x1f   :  { %p5405_p11 = scmp.ne.s32.totalorder %s71_s28, %s5404_s21  ;;  %p5410_p13 = scmp.lt.s32.totalorder %s5404_s21, %s5404_s21 }
  0x21   :  { %p5411_p0 = por %p5410_p13, %p5409_p12 }
  0x23   :  { %p5412_p1 = pnand %p5411_p0, %p5405_p11 }
  0x25   :  { %5415 = shalt.err (!%p5412_p1)
}
  0x26   :  { %76 = dma.hbm_to_vmem [thread:$0]  %s6696_s5, 16384, %s71_s28, [#allocation9], %s5629_s23, %s5629_s23, %s5630_s24  }
  0x27   :  { %s5632_s22 = smov [#allocation11]   ;;  %s5633_s26 = smov [#allocation2]  }
  0x28   :  { %s94_s25 = sshll.u32 %s5632_s22, 4  ;;  %s37_s27 = sshll.u32 %s5633_s26, 4  ;;  %s95_s25 = int_to_ptr.vmem [resolvable:$true] %s94_s25  ;;  %s38_s27 = int_to_ptr.vmem [resolvable:$true] %s37_s27 }
  0x29   :  { %s5416_s16 = scalar_lea.hbm %s6698_s7, 512 }
  0x2a   :  { %p5417_p2 = scmp.ne.s32.totalorder %s6698_s7, %s5416_s16  ;;  %p5420_p3 = scmp.lt.u32.totalorder %s5416_s16, %s6698_s7 }
  0x2c   :  { %p5422_p4 = pnand %p5420_p3, %p5417_p2 }
  0x2e   :  { %5425 = shalt.err (!%p5422_p4)
}
  0x2f   :  { %s5426_s5 = scalar_lea.vmem %s95_s25, 512  ;;  %p5431_p6 = scmp.lt.s32.totalorder %s95_s25, %s95_s25 }
  0x30   :  { %p5427_p5 = scmp.ne.s32.totalorder %s95_s25, %s5426_s5  ;;  %p5432_p7 = scmp.lt.s32.totalorder %s5426_s5, %s5426_s5 }
  0x32   :  { %p5433_p8 = por %p5432_p7, %p5431_p6 }
  0x34   :  { %p5434_p9 = pnand %p5433_p8, %p5427_p5 }
  0x36   :  { %5437 = shalt.err (!%p5434_p9)
}
  0x37   :  { %s5634_s23 = smov 128   ;;  %s5635_s24 = smov 8  }
  0x38   :  { %100 = dma.hbm_to_vmem [thread:$0]  %s6698_s7, 512, %s95_s25, [#allocation12], %s5634_s23, %s5634_s23, %s5635_s24  }
  0x39   :  { %s5438_s22 = scalar_lea.hbm %s6693_s2, 32 }
  0x3a   :  { %p5439_p10 = scmp.ne.s32.totalorder %s6693_s2, %s5438_s22  ;;  %p5442_p11 = scmp.lt.u32.totalorder %s5438_s22, %s6693_s2 }
  0x3c   :  { %p5444_p12 = pnand %p5442_p11, %p5439_p10 }
  0x3e   :  { %5447 = shalt.err (!%p5444_p12)
}
  0x3f   :  { %s5448_s17 = scalar_lea.vmem %s38_s27, 32  ;;  %p5453_p0 = scmp.lt.s32.totalorder %s38_s27, %s38_s27 }
  0x40   :  { %p5449_p13 = scmp.ne.s32.totalorder %s38_s27, %s5448_s17  ;;  %p5454_p1 = scmp.lt.s32.totalorder %s5448_s17, %s5448_s17 }
  0x42   :  { %p5455_p2 = por %p5454_p1, %p5453_p0 }
  0x44   :  { %p5456_p3 = pnand %p5455_p2, %p5449_p13 }
  0x46   :  { %5459 = shalt.err (!%p5456_p3)
}
  0x47   :  { %40 = dma.hbm_to_vmem [thread:$0]  %s6693_s2, 32, %s38_s27, [#allocation3]  }
  0x48   :  { %s5636_s18 = smov [#allocation7]   ;;  %s5637_s20 = smov [#allocation10]  }
  0x49   :  { %s58_s19 = sshll.u32 %s5636_s18, 4  ;;  %s82_s5 = sshll.u32 %s5637_s20, 4  ;;  %s59_s19 = int_to_ptr.vmem [resolvable:$true] %s58_s19  ;;  %s5773_s5 = int_to_ptr.vmem [resolvable:$true] %s82_s5 }
  0x4a   :  { %s5460_s3 = scalar_lea.hbm %s6695_s4, 8192 }
  0x4b   :  { %p5461_p4 = scmp.ne.s32.totalorder %s6695_s4, %s5460_s3  ;;  %p5464_p5 = scmp.lt.u32.totalorder %s5460_s3, %s6695_s4 }
  0x4d   :  { %p5466_p6 = pnand %p5464_p5, %p5461_p4 }
  0x4f   :  { %5469 = shalt.err (!%p5466_p6)
}
  0x50   :  { %s5470_s2 = scalar_lea.vmem %s59_s19, 8192  ;;  %p5475_p8 = scmp.lt.s32.totalorder %s59_s19, %s59_s19 }
  0x51   :  { %p5471_p7 = scmp.ne.s32.totalorder %s59_s19, %s5470_s2  ;;  %p5476_p9 = scmp.lt.s32.totalorder %s5470_s2, %s5470_s2 }
  0x53   :  { %p5477_p10 = por %p5476_p9, %p5475_p8 }
  0x55   :  { %p5478_p11 = pnand %p5477_p10, %p5471_p7 }
  0x57   :  { %5481 = shalt.err (!%p5478_p11)
}
  0x58   :  { %64 = dma.hbm_to_vmem [thread:$0]  %s6695_s4, 8192, %s59_s19, [#allocation6], %s5634_s23, %s5634_s23, %s5635_s24  }
  0x59   :  { %s5482_s7 = scalar_lea.hbm %s6697_s6, 8192 }
  0x5a   :  { %p5483_p12 = scmp.ne.s32.totalorder %s6697_s6, %s5482_s7  ;;  %p5486_p13 = scmp.lt.u32.totalorder %s5482_s7, %s6697_s6 }
  0x5c   :  { %p5488_p0 = pnand %p5486_p13, %p5483_p12 }
  0x5e   :  { %5491 = shalt.err (!%p5488_p0)
}
  0x5f   :  { %s5492_s21 = scalar_lea.vmem %s5773_s5, 8192  ;;  %p5497_p2 = scmp.lt.s32.totalorder %s5773_s5, %s5773_s5 }
  0x60   :  { %p5493_p1 = scmp.ne.s32.totalorder %s5773_s5, %s5492_s21  ;;  %p5498_p3 = scmp.lt.s32.totalorder %s5492_s21, %s5492_s21 }
  0x62   :  { %p5499_p4 = por %p5498_p3, %p5497_p2 }
  0x64   :  { %p5500_p5 = pnand %p5499_p4, %p5493_p1 }
  0x66   :  { %5503 = shalt.err (!%p5500_p5)
}
  0x67   :  { %88 = dma.hbm_to_vmem [thread:$0]  %s6697_s6, 8192, %s5773_s5, [#allocation9], %s5634_s23, %s5634_s23, %s5635_s24  }
  0x68   :  { %s5638_s3 = smov [#allocation13]   ;;  %s5639_s22 = smov [#allocation14]  }
  0x69   :  { %s106_s30 = sshll.u32 %s5638_s3, 4  ;;  %s120_s26 = sshll.u32 %s5639_s22, 4  ;;  %s107_s30 = int_to_ptr.vmem [resolvable:$true] %s106_s30  ;;  %s5810_s26 = int_to_ptr.vmem [resolvable:$true] %s120_s26 }
  0x6a   :  { %s5504_s27 = scalar_lea.hbm %s6699_s8, 512 }
  0x6b   :  { %p5505_p6 = scmp.ne.s32.totalorder %s6699_s8, %s5504_s27  ;;  %p5508_p7 = scmp.lt.u32.totalorder %s5504_s27, %s6699_s8 }
  0x6d   :  { %p5510_p8 = pnand %p5508_p7, %p5505_p6 }
  0x6f   :  { %5513 = shalt.err (!%p5510_p8)
}
  0x70   :  { %s5514_s6 = scalar_lea.vmem %s107_s30, 512  ;;  %p5519_p10 = scmp.lt.s32.totalorder %s107_s30, %s107_s30 }
  0x71   :  { %p5515_p9 = scmp.ne.s32.totalorder %s107_s30, %s5514_s6  ;;  %p5520_p11 = scmp.lt.s32.totalorder %s5514_s6, %s5514_s6 }
  0x73   :  { %p5521_p12 = por %p5520_p11, %p5519_p10 }
  0x75   :  { %p5522_p13 = pnand %p5521_p12, %p5515_p9 }
  0x77   :  { %5525 = shalt.err (!%p5522_p13)
}
  0x78   :  { %112 = dma.hbm_to_vmem [thread:$0]  %s6699_s8, 512, %s107_s30, [#allocation12], %s5634_s23, %s5634_s23, %s5635_s24  }
  0x79   :  { %s5526_s28 = scalar_lea.hbm %s6701_s10, 1024 }
  0x7a   :  { %p5527_p0 = scmp.ne.s32.totalorder %s6701_s10, %s5526_s28  ;;  %p5530_p1 = scmp.lt.u32.totalorder %s5526_s28, %s6701_s10 }
  0x7c   :  { %p5532_p2 = pnand %p5530_p1, %p5527_p0 }
  0x7e   :  { %5535 = shalt.err (!%p5532_p2)
}
  0x7f   :  { %s5536_s22 = scalar_lea.vmem %s5810_s26, 1024  ;;  %p5541_p4 = scmp.lt.s32.totalorder %s5810_s26, %s5810_s26 }
  0x80   :  { %p5537_p3 = scmp.ne.s32.totalorder %s5810_s26, %s5536_s22  ;;  %p5542_p5 = scmp.lt.s32.totalorder %s5536_s22, %s5536_s22 }
  0x82   :  { %p5543_p6 = por %p5542_p5, %p5541_p4 }
  0x84   :  { %p5544_p7 = pnand %p5543_p6, %p5537_p3 }
  0x86   :  { %5547 = shalt.err (!%p5544_p7)
}
  0x87   :  { %126 = dma.hbm_to_vmem [thread:$0]  %s6701_s10, 1024, %s5810_s26, [#allocation15], %s5634_s23, %s5634_s23, %s5635_s24  }
  0x88   :  { %5614 = dma.done.wait [#allocation3], 32  }
  0x89   :  { %5615 = vsyncadd [#allocation3], 4294967264 }
  0x8a   :  { %5616 = dma.done.wait [#allocation6], 24576  }
  0x8b   :  { %5617 = vsyncadd [#allocation6], 4294942720 }
  0x8c   :  { %5618 = dma.done.wait [#allocation9], 24576  }
  0x8d   :  { %5619 = vsyncadd [#allocation9], 4294942720 }
  0x8e   :  { %5620 = dma.done.wait [#allocation12], 1024  }
  0x8f   :  { %5621 = vsyncadd [#allocation12], 4294966272 }
  0x90   :  { %5622 = dma.done.wait [#allocation15], 1024  }
  0x91   :  { %5623 = vsyncadd [#allocation15], 4294966272  ;;  %v5850_v0 = vld [vmem:[%s6691_s0] sm:$0xff]  ;;  %v5855_v1 = vld [vmem:[%s6691_s0 + $0x8] sm:$0xff]  ;;  %vm1481_vm0 = vcmask 261120  }
  0x92   :  { %v5860_v2 = vld [vmem:[%s6691_s0 + $0x10] sm:$0xff]  ;;  %v162_v3 = vmul.f32 %v5850_v0, %v5850_v0  ;;  %v163_v4 = vmul.f32 %v5855_v1, %v5855_v1  ;;  %v5869_v5 = vld [vmem:[%s6691_s0 + $0x18] sm:$0xff]  ;;  %v5876_v7 = vld [vmem:[%s6691_s0 + $0x20] sm:$0xff] }
  0x93   :  { %v164_v6 = vmul.f32 %v5860_v2, %v5860_v2  ;;  %v5881_v8 = vld [vmem:[%s6691_s0 + $0x28] sm:$0xff]  ;;  %v165_v9 = vmul.f32 %v5869_v5, %v5869_v5  ;;  %v166_v10 = vmul.f32 %v5876_v7, %v5876_v7  ;;  %v5892_v12 = vld [vmem:[%s6691_s0 + $0x30] sm:$0xff]  ;;  %v5897_v13 = vld [vmem:[%s6691_s0 + $0x38] sm:$0xff] }
  0x94   :  { %v167_v11 = vmul.f32 %v5881_v8, %v5881_v8  ;;  %v227_v14 = vld [vmem:[#allocation5] sm:$0xff]  ;;  %v170_v15 = vadd.f32 %v163_v4, %v162_v3  ;;  %v168_v16 = vmul.f32 %v5892_v12, %v5892_v12  ;;  %v169_v17 = vmul.f32 %v5897_v13, %v5897_v13  ;;  %v229_v19 = vld [vmem:[#allocation5 + $0x10] sm:$0xff] }
  0x95   :  { %v231_v18 = vld [vmem:[#allocation5 + $0x20] sm:$0xff]  ;;  %v233_v20 = vld [vmem:[#allocation5 + $0x30] sm:$0xff]  ;;  %v173_v27 = vadd.f32 %v165_v9, %v164_v6 }
  0x96   :  { %v176_v21 = vadd.f32 %v167_v11, %v166_v10  ;;  %v4442_v22 = vcombine.high %v227_v14, %v231_v18  ;;  %v4441_v23 = vcombine.low %v227_v14, %v231_v18  ;;  %v235_v24 = vld [vmem:[#allocation5 + $0x40] sm:$0xff]  ;;  %v237_v26 = vld [vmem:[#allocation5 + $0x50] sm:$0xff]  ;;  %171 = vadd.xlane.f32.xlu0 %v170_v15  ;;  %v4446_v28 = vcombine.high %v229_v19, %v233_v20 }
  0x97   :  { %v239_v25 = vld [vmem:[#allocation5 + $0x60] sm:$0xff]  ;;  %v4445_v29 = vcombine.low %v229_v19, %v233_v20  ;;  %v241_v31 = vld [vmem:[#allocation5 + $0x70] sm:$0xff]  ;;  %v179_v34 = vadd.f32 %v169_v17, %v168_v16 }
  0x98   :  { %v4450_v30 = vcombine.high %v235_v24, %v239_v25  ;;  %v243_v32 = vld [vmem:[#allocation5 + $0x80] sm:$0xff]  ;;  %177 = vadd.xlane.f32.xlu1 %v176_v21  ;;  %995 = vmatprep.subr.bf16.mxu1 %v4442_v22  ;;  %v4454_v35 = vcombine.high %v237_v26, %v241_v31  ;;  %v245_v36 = vld [vmem:[#allocation5 + $0x90] sm:$0xff]  ;;  %v4449_v38 = vcombine.low %v235_v24, %v239_v25 }
  0x99   :  { %v247_v33 = vld [vmem:[#allocation5 + $0xa0] sm:$0xff]  ;;  %v249_v37 = vld [vmem:[#allocation5 + $0xb0] sm:$0xff]  ;;  %996 = vmatpush1.bf16.msra.mxu1 %v4441_v23  ;;  %1101 = vmatprep.subr.bf16.mxu0 %v4446_v28  ;;  %v4453_v39 = vcombine.low %v237_v26, %v241_v31 }
  0x9a   :  { %1102 = vmatpush1.bf16.msra.mxu0 %v4445_v29  ;;  %997 = vmatprep.subr.bf16.mxu1 %v4450_v30  ;;  %v4458_v40 = vcombine.high %v243_v32, %v247_v33  ;;  %v4462_v41 = vcombine.high %v245_v36, %v249_v37  ;;  %v251_v42 = vld [vmem:[#allocation5 + $0xc0] sm:$0xff]  ;;  %v253_v44 = vld [vmem:[#allocation5 + $0xd0] sm:$0xff]  ;;  %v4457_v46 = vcombine.low %v243_v32, %v247_v33 }
  0x9b   :  { %174 = vadd.xlane.f32.xlu0 %v173_v27  ;;  %1103 = vmatprep.subr.bf16.mxu0 %v4454_v35  ;;  %v255_v43 = vld [vmem:[#allocation5 + $0xe0] sm:$0xff]  ;;  %v257_v45 = vld [vmem:[#allocation5 + $0xf0] sm:$0xff]  ;;  %v4461_v47 = vcombine.low %v245_v36, %v249_v37 }
  0x9c   :  { %180 = vadd.xlane.f32.xlu1 %v179_v34  ;;  %v4466_v48 = vcombine.high %v251_v42, %v255_v43  ;;  %v4470_v49 = vcombine.high %v253_v44, %v257_v45  ;;  %v259_v50 = vld [vmem:[#allocation5 + $0x100] sm:$0xff]  ;;  %v261_v52 = vld [vmem:[#allocation5 + $0x110] sm:$0xff]  ;;  %v4465_v54 = vcombine.low %v251_v42, %v255_v43  ;;  %v4469_v55 = vcombine.low %v253_v44, %v257_v45 }
  0x9d   :  { %998 = vmatpush1.bf16.msra.mxu1 %v4449_v38  ;;  %v263_v51 = vld [vmem:[#allocation5 + $0x120] sm:$0xff]  ;;  %v265_v53 = vld [vmem:[#allocation5 + $0x130] sm:$0xff] }
  0x9e   :  { %1104 = vmatpush1.bf16.msra.mxu0 %v4453_v39  ;;  %999 = vmatprep.subr.bf16.mxu1 %v4458_v40  ;;  %v4474_v56 = vcombine.high %v259_v50, %v263_v51  ;;  %v4478_v57 = vcombine.high %v261_v52, %v265_v53  ;;  %v267_v58 = vld [vmem:[#allocation5 + $0x140] sm:$0xff]  ;;  %v269_v60 = vld [vmem:[#allocation5 + $0x150] sm:$0xff]  ;;  %v4473_v62 = vcombine.low %v259_v50, %v263_v51 }
  0x9f   :  { %1105 = vmatprep.subr.bf16.mxu0 %v4462_v41  ;;  %v271_v59 = vld [vmem:[#allocation5 + $0x160] sm:$0xff]  ;;  %v273_v61 = vld [vmem:[#allocation5 + $0x170] sm:$0xff]  ;;  %v4477_v63 = vcombine.low %v261_v52, %v265_v53 }
  0xa0   :  { %v4482_v3 = vcombine.high %v267_v58, %v271_v59  ;;  %v4486_v4 = vcombine.high %v269_v60, %v273_v61  ;;  %v275_v6 = vld [vmem:[#allocation5 + $0x180] sm:$0xff]  ;;  %v277_v10 = vld [vmem:[#allocation5 + $0x190] sm:$0xff]  ;;  %v4481_v14 = vcombine.low %v267_v58, %v271_v59  ;;  %v4485_v15 = vcombine.low %v269_v60, %v273_v61 }
  0xa1   :  { %1000 = vmatpush1.bf16.msra.mxu1 %v4457_v46  ;;  %v279_v9 = vld [vmem:[#allocation5 + $0x1a0] sm:$0xff]  ;;  %v281_v11 = vld [vmem:[#allocation5 + $0x1b0] sm:$0xff] }
  0xa2   :  { %1106 = vmatpush1.bf16.msra.mxu0 %v4461_v47  ;;  %1001 = vmatprep.subr.bf16.mxu1 %v4466_v48  ;;  %v4490_v16 = vcombine.high %v275_v6, %v279_v9  ;;  %v4494_v17 = vcombine.high %v277_v10, %v281_v11  ;;  %v283_v18 = vld [vmem:[#allocation5 + $0x1c0] sm:$0xff]  ;;  %v285_v20 = vld [vmem:[#allocation5 + $0x1d0] sm:$0xff]  ;;  %v4489_v22 = vcombine.low %v275_v6, %v279_v9 }
  0xa3   :  { %1107 = vmatprep.subr.bf16.mxu0 %v4470_v49  ;;  %v287_v19 = vld [vmem:[#allocation5 + $0x1e0] sm:$0xff]  ;;  %v289_v21 = vld [vmem:[#allocation5 + $0x1f0] sm:$0xff]  ;;  %v4493_v23 = vcombine.low %v277_v10, %v281_v11 }
  0xa4   :  { %v4498_v24 = vcombine.high %v283_v18, %v287_v19  ;;  %v4502_v25 = vcombine.high %v285_v20, %v289_v21  ;;  %v291_v26 = vld [vmem:[#allocation5 + $0x200] sm:$0xff]  ;;  %v293_v28 = vld [vmem:[#allocation5 + $0x210] sm:$0xff]  ;;  %v4497_v30 = vcombine.low %v283_v18, %v287_v19  ;;  %v4501_v33 = vcombine.low %v285_v20, %v289_v21 }
  0xa5   :  { %1002 = vmatpush1.bf16.msra.mxu1 %v4465_v54  ;;  %v295_v27 = vld [vmem:[#allocation5 + $0x220] sm:$0xff]  ;;  %v297_v29 = vld [vmem:[#allocation5 + $0x230] sm:$0xff]  ;;  %v5903_v54 = vld [vmem:[#allocation5 + $0x8] sm:$0xff] }
  0xa6   :  { %1108 = vmatpush1.bf16.msra.mxu0 %v4469_v55  ;;  %1003 = vmatprep.subr.bf16.mxu1 %v4474_v56  ;;  %v299_v31 = vld [vmem:[#allocation5 + $0x240] sm:$0xff]  ;;  %v4506_v34 = vcombine.high %v291_v26, %v295_v27  ;;  %v301_v35 = vld [vmem:[#allocation5 + $0x250] sm:$0xff]  ;;  %v4510_v36 = vcombine.high %v293_v28, %v297_v29  ;;  %v4505_v38 = vcombine.low %v291_v26, %v295_v27  ;;  %v5905_v55 = vld [vmem:[#allocation5 + $0x28] sm:$0xff] }
  0xa7   :  { %1109 = vmatprep.subr.bf16.mxu0 %v4478_v57  ;;  %v303_v32 = vld [vmem:[#allocation5 + $0x260] sm:$0xff]  ;;  %v305_v37 = vld [vmem:[#allocation5 + $0x270] sm:$0xff]  ;;  %v4509_v41 = vcombine.low %v293_v28, %v297_v29  ;;  %v4443_v59 = vcombine.low %v5903_v54, %v5905_v55 }
  0xa8   :  { %v307_v39 = vld [vmem:[#allocation5 + $0x280] sm:$0xff]  ;;  %v4514_v42 = vcombine.high %v299_v31, %v303_v32  ;;  %v309_v43 = vld [vmem:[#allocation5 + $0x290] sm:$0xff]  ;;  %v4518_v45 = vcombine.high %v301_v35, %v305_v37  ;;  %v4513_v46 = vcombine.low %v299_v31, %v303_v32  ;;  %v4517_v49 = vcombine.low %v301_v35, %v305_v37 }
  0xa9   :  { %1004 = vmatpush1.bf16.msra.mxu1 %v4473_v62  ;;  %v311_v40 = vld [vmem:[#allocation5 + $0x2a0] sm:$0xff]  ;;  %v313_v44 = vld [vmem:[#allocation5 + $0x2b0] sm:$0xff] }
  0xaa   :  { %1110 = vmatpush1.bf16.msra.mxu0 %v4477_v63  ;;  %1005 = vmatprep.subr.bf16.mxu1 %v4482_v3  ;;  %v315_v47 = vld [vmem:[#allocation5 + $0x2c0] sm:$0xff]  ;;  %v4522_v50 = vcombine.high %v307_v39, %v311_v40  ;;  %v317_v51 = vld [vmem:[#allocation5 + $0x2d0] sm:$0xff]  ;;  %v4526_v53 = vcombine.high %v309_v43, %v313_v44  ;;  %v4521_v56 = vcombine.low %v307_v39, %v311_v40 }
  0xab   :  { %1111 = vmatprep.subr.bf16.mxu0 %v4486_v4  ;;  %v319_v48 = vld [vmem:[#allocation5 + $0x2e0] sm:$0xff]  ;;  %v321_v52 = vld [vmem:[#allocation5 + $0x2f0] sm:$0xff]  ;;  %v4525_v60 = vcombine.low %v309_v43, %v313_v44  ;;  %v4444_v39 = vcombine.high %v5903_v54, %v5905_v55 }
  0xac   :  { %v323_v57 = vld [vmem:[#allocation5 + $0x300] sm:$0xff]  ;;  %v4530_v61 = vcombine.high %v315_v47, %v319_v48  ;;  %v4534_v62 = vcombine.high %v317_v51, %v321_v52  ;;  %v325_v63 = vld [vmem:[#allocation5 + $0x310] sm:$0xff]  ;;  %v4529_v4 = vcombine.low %v315_v47, %v319_v48  ;;  %v4533_v10 = vcombine.low %v317_v51, %v321_v52 }
  0xad   :  { %1006 = vmatpush1.bf16.msra.mxu1 %v4481_v14  ;;  %v327_v58 = vld [vmem:[#allocation5 + $0x320] sm:$0xff]  ;;  %v329_v3 = vld [vmem:[#allocation5 + $0x330] sm:$0xff] }
  0xae   :  { %1112 = vmatpush1.bf16.msra.mxu0 %v4485_v15  ;;  %1007 = vmatprep.subr.bf16.mxu1 %v4490_v16  ;;  %v331_v6 = vld [vmem:[#allocation5 + $0x340] sm:$0xff]  ;;  %v4538_v11 = vcombine.high %v323_v57, %v327_v58  ;;  %v4542_v14 = vcombine.high %v325_v63, %v329_v3  ;;  %v333_v15 = vld [vmem:[#allocation5 + $0x350] sm:$0xff]  ;;  %v4541_v20 = vcombine.low %v325_v63, %v329_v3 }
  0xaf   :  { %1113 = vmatprep.subr.bf16.mxu0 %v4494_v17  ;;  %v335_v9 = vld [vmem:[#allocation5 + $0x360] sm:$0xff]  ;;  %v337_v16 = vld [vmem:[#allocation5 + $0x370] sm:$0xff]  ;;  %v4537_v17 = vcombine.low %v323_v57, %v327_v58 }
  0xb0   :  { %v339_v18 = vld [vmem:[#allocation5 + $0x380] sm:$0xff]  ;;  %v4546_v21 = vcombine.high %v331_v6, %v335_v9  ;;  %v4549_v28 = vcombine.low %v333_v15, %v337_v16  ;;  %v349_v31 = vld [vmem:[#allocation5 + $0x3d0] sm:$0xff] }
  0xb1   :  { %1008 = vmatpush1.bf16.msra.mxu1 %v4489_v22  ;;  %v343_v19 = vld [vmem:[#allocation5 + $0x3a0] sm:$0xff]  ;;  %v4550_v22 = vcombine.high %v333_v15, %v337_v16  ;;  %v353_v32 = vld [vmem:[#allocation5 + $0x3f0] sm:$0xff] }
  0xb2   :  { %1114 = vmatpush1.bf16.msra.mxu0 %v4493_v23  ;;  %1009 = vmatprep.subr.bf16.mxu1 %v4498_v24  ;;  %v341_v23 = vld [vmem:[#allocation5 + $0x390] sm:$0xff]  ;;  %v347_v26 = vld [vmem:[#allocation5 + $0x3c0] sm:$0xff]  ;;  %v4554_v29 = vcombine.high %v339_v18, %v343_v19 }
  0xb3   :  { %1115 = vmatprep.subr.bf16.mxu0 %v4502_v25  ;;  %v345_v24 = vld [vmem:[#allocation5 + $0x3b0] sm:$0xff]  ;;  %v4545_v25 = vcombine.low %v331_v6, %v335_v9  ;;  %v351_v27 = vld [vmem:[#allocation5 + $0x3e0] sm:$0xff] }
  0xb4   :  { %v4562_v35 = vcombine.high %v347_v26, %v351_v27  ;;  %v4561_v37 = vcombine.low %v347_v26, %v351_v27 }
  0xb5   :  { %1010 = vmatpush1.bf16.msra.mxu1 %v4497_v30  ;;  %v4558_v30 = vcombine.high %v341_v23, %v345_v24 }
  0xb6   :  { %1116 = vmatpush1.bf16.msra.mxu0 %v4501_v33  ;;  %1011 = vmatprep.subr.bf16.mxu1 %v4506_v34  ;;  %v4553_v33 = vcombine.low %v339_v18, %v343_v19  ;;  %v4557_v34 = vcombine.low %v341_v23, %v345_v24  ;;  %v236_v19 = vld [vmem:[#allocation5 + $0x48] sm:$0xff] }
  0xb7   :  { %1117 = vmatprep.subr.bf16.mxu0 %v4510_v36  ;;  %v4566_v36 = vcombine.high %v349_v31, %v353_v32 }
  0xb9   :  { %1012 = vmatpush1.bf16.msra.mxu1 %v4505_v38  ;;  %v4565_v38 = vcombine.low %v349_v31, %v353_v32 }
  0xba   :  { %1118 = vmatpush1.bf16.msra.mxu0 %v4509_v41  ;;  %1013 = vmatprep.subr.bf16.mxu1 %v4514_v42 }
  0xbb   :  { %1119 = vmatprep.subr.bf16.mxu0 %v4518_v45 }
  0xbd   :  { %1014 = vmatpush1.bf16.msra.mxu1 %v4513_v46 }
  0xbe   :  { %1120 = vmatpush1.bf16.msra.mxu0 %v4517_v49  ;;  %1015 = vmatprep.subr.bf16.mxu1 %v4522_v50  ;;  %v205_v50 = vlaneseq }
  0xbf   :  { %1121 = vmatprep.subr.bf16.mxu0 %v4526_v53 }
  0xc0   :  { %v5911_v53 = vshrl.u32 %v205_v50, 7  ;;  %v300_v50 = vld [vmem:[#allocation5 + $0x248] sm:$0xff] }
  0xc1   :  { %1016 = vmatpush1.bf16.msra.mxu1 %v4521_v56 }
  0xc2   :  { %1122 = vmatpush1.bf16.msra.mxu0 %v4525_v60  ;;  %1017 = vmatprep.subr.bf16.mxu1 %v4530_v61  ;;  %v211_v56 = vsub.s32 1, %v5911_v53  ;;  %v207_v57 = vsub.s32 0, %v5911_v53  ;;  %v203_v60 = vld [vmem:[%s6692_s1] sm:$0x3]  ;;  %s5640_s1 = smov 64  }
  0xc3   :  { %1123 = vmatprep.subr.bf16.mxu0 %v4534_v62 }
  0xc4   :  { %v212_v3 = vrot.slane %v203_v60, %v211_v56  ;;  %v208_v6 = vrot.slane %v203_v60, %v207_v57  ;;  %v308_v60 = vld [vmem:[#allocation5 + $0x288] sm:$0xff] }
  0xc5   :  { %1018 = vmatpush1.bf16.msra.mxu1 %v4529_v4 }
  0xc6   :  { %1124 = vmatpush1.bf16.msra.mxu0 %v4533_v10  ;;  %1019 = vmatprep.subr.bf16.mxu1 %v4538_v11 }
  0xc7   :  { %1125 = vmatprep.subr.bf16.mxu0 %v4542_v14 }
  0xc9   :  { %1020 = vmatpush1.bf16.msra.mxu1 %v4537_v17 }
  0xca   :  { %1126 = vmatpush1.bf16.msra.mxu0 %v4541_v20  ;;  %1021 = vmatprep.subr.bf16.mxu1 %v4546_v21  ;;  %v240_v20 = vld [vmem:[#allocation5 + $0x68] sm:$0xff] }
  0xcb   :  { %1127 = vmatprep.subr.bf16.mxu0 %v4550_v22 }
  0xcd   :  { %1022 = vmatpush1.bf16.msra.mxu1 %v4545_v25  ;;  %v248_v25 = vld [vmem:[#allocation5 + $0xa8] sm:$0xff] }
  0xce   :  { %1128 = vmatpush1.bf16.msra.mxu0 %v4549_v28  ;;  %1023 = vmatprep.subr.bf16.mxu1 %v4554_v29  ;;  %v252_v28 = vld [vmem:[#allocation5 + $0xc8] sm:$0xff] }
  0xcf   :  { %1129 = vmatprep.subr.bf16.mxu0 %v4558_v30  ;;  %v256_v29 = vld [vmem:[#allocation5 + $0xe8] sm:$0xff] }
  0xd0   :  { %v4468_v32 = vcombine.high %v252_v28, %v256_v29  ;;  %v4467_v54 = vcombine.low %v252_v28, %v256_v29  ;;  %v242_v28 = vld [vmem:[#allocation5 + $0x78] sm:$0xff] }
  0xd1   :  { %1024 = vmatpush1.bf16.msra.mxu1 %v4553_v33  ;;  %v260_v33 = vld [vmem:[#allocation5 + $0x108] sm:$0xff] }
  0xd2   :  { %1130 = vmatpush1.bf16.msra.mxu0 %v4557_v34  ;;  %1025 = vmatprep.subr.bf16.mxu1 %v4562_v35  ;;  %v264_v34 = vld [vmem:[#allocation5 + $0x128] sm:$0xff] }
  0xd3   :  { %1131 = vmatprep.subr.bf16.mxu0 %v4566_v36  ;;  %v4476_v55 = vcombine.high %v260_v33, %v264_v34  ;;  %v272_v35 = vld [vmem:[#allocation5 + $0x168] sm:$0xff]  ;;  %v4475_v36 = vcombine.low %v260_v33, %v264_v34  ;;  %v250_v33 = vld [vmem:[#allocation5 + $0xb8] sm:$0xff] }
  0xd5   :  { %1026 = vmatpush1.bf16.msra.mxu1 %v4561_v37 }
  0xd6   :  { %1132 = vmatpush1.bf16.msra.mxu0 %v4565_v38  ;;  %1048 = vmatprep.subr.bf16.mxu1 %v4444_v39  ;;  %v276_v38 = vld [vmem:[#allocation5 + $0x188] sm:$0xff] }
  0xd7   :  { %v280_v39 = vld [vmem:[#allocation5 + $0x1a8] sm:$0xff] }
 0x123   :  { %v172_v40 = vpop.xlane.xlu0 %171 }
 0x124   :  { %v183_v41 = vmul.f32 0.00390625, %v172_v40 }
 0x125   :  { %v178_v42 = vpop.xlane.xlu1 %177 }
 0x126   :  { %v185_v43 = vmul.f32 0.00390625, %v178_v42  ;;  %v187_v44 = vadd.f32 1e-05, %v183_v41  ;;  %v4492_v41 = vcombine.high %v276_v38, %v280_v39  ;;  %v284_v42 = vld [vmem:[#allocation5 + $0x1c8] sm:$0xff] }
 0x128   :  { %v175_v45 = vpop.xlane.xlu0 %174  ;;  %v189_v46 = vadd.f32 1e-05, %v185_v43  ;;  %5172 = vrsqrt.f32 %v187_v44  ;;  %v288_v43 = vld [vmem:[#allocation5 + $0x1e8] sm:$0xff]  ;;  %v4491_v44 = vcombine.low %v276_v38, %v280_v39  ;;  %v266_v38 = vld [vmem:[#allocation5 + $0x138] sm:$0xff] }
 0x129   :  { %v184_v47 = vmul.f32 0.00390625, %v175_v45  ;;  %v181_v48 = vpop.xlane.xlu1 %180  ;;  %v4500_v45 = vcombine.high %v284_v42, %v288_v43 }
 0x12a   :  { %5174 = vrsqrt.f32 %v189_v46  ;;  %v186_v49 = vmul.f32 0.00390625, %v181_v48  ;;  %v292_v46 = vld [vmem:[#allocation5 + $0x208] sm:$0xff]  ;;  %v4499_v48 = vcombine.low %v284_v42, %v288_v43  ;;  %v274_v42 = vld [vmem:[#allocation5 + $0x178] sm:$0xff] }
 0x12b   :  { %v188_v51 = vadd.f32 1e-05, %v184_v47  ;;  %v296_v47 = vld [vmem:[#allocation5 + $0x228] sm:$0xff] }
 0x12c   :  { %v190_v52 = vadd.f32 1e-05, %v186_v49  ;;  %v4508_v49 = vcombine.high %v292_v46, %v296_v47 }
 0x12d   :  { %5176 = vrsqrt.f32 %v188_v51  ;;  %v304_v51 = vld [vmem:[#allocation5 + $0x268] sm:$0xff] }
 0x12e   :  { %5178 = vrsqrt.f32 %v190_v52  ;;  %v4507_v52 = vcombine.low %v292_v46, %v296_v47  ;;  %v282_v46 = vld [vmem:[#allocation5 + $0x1b8] sm:$0xff] }
 0x132   :  { %v5173_v58 = vpop.eup %5172 }
 0x133   :  { %v196_v63 = vmul.f32 %v5173_v58, %v5855_v1  ;;  %v195_v4 = vmul.f32 %v5173_v58, %v5850_v0  ;;  %v4516_v58 = vcombine.high %v300_v50, %v304_v51 }
 0x134   :  { %v5175_v61 = vpop.eup %5174 }
 0x135   :  { %v200_v62 = vmul.f32 %v5175_v61, %v5881_v8  ;;  %v216_v8 = vmul.f32 %v212_v3, %v196_v63  ;;  %v215_v1 = vmul.f32 %v208_v6, %v195_v4  ;;  %v199_v0 = vmul.f32 %v5175_v61, %v5876_v7  ;;  %v312_v61 = vld [vmem:[#allocation5 + $0x2a8] sm:$0xff] }
 0x136   :  { %v4524_v63 = vcombine.high %v308_v60, %v312_v61  ;;  %v320_v4 = vld [vmem:[#allocation5 + $0x2e8] sm:$0xff] }
 0x137   :  { %v5177_v9 = vpop.eup %5176  ;;  %v220_v16 = vmul.f32 %v212_v3, %v200_v62  ;;  %v219_v7 = vmul.f32 %v208_v6, %v199_v0  ;;  %v4515_v62 = vcombine.low %v300_v50, %v304_v51  ;;  %v348_v0 = vld [vmem:[#allocation5 + $0x3c8] sm:$0xff]  ;;  %v290_v50 = vld [vmem:[#allocation5 + $0x1f8] sm:$0xff] }
 0x138   :  { %v5179_v10 = vpop.eup %5178  ;;  %v198_v11 = vmul.f32 %v5177_v9, %v5869_v5  ;;  %v197_v14 = vmul.f32 %v5177_v9, %v5860_v2  ;;  %v4452_v5 = vcombine.high %v236_v19, %v240_v20 }
 0x139   :  { %v202_v15 = vmul.f32 %v5179_v10, %v5897_v13  ;;  %v201_v22 = vmul.f32 %v5179_v10, %v5892_v12  ;;  %v244_v13 = vld [vmem:[#allocation5 + $0x88] sm:$0xff]  ;;  %v4451_v12 = vcombine.low %v236_v19, %v240_v20 }
 0x13a   :  { %v218_v17 = vmul.f32 %v212_v3, %v198_v11  ;;  %v217_v18 = vmul.f32 %v208_v6, %v197_v14  ;;  %v4460_v27 = vcombine.high %v244_v13, %v248_v25  ;;  %v4459_v31 = vcombine.low %v244_v13, %v248_v25  ;;  %v324_v10 = vld [vmem:[#allocation5 + $0x308] sm:$0xff]  ;;  %v230_v25 = vld [vmem:[#allocation5 + $0x18] sm:$0xff] }
 0x13b   :  { %v222_v21 = vmul.f32 %v212_v3, %v202_v15  ;;  %v221_v26 = vmul.f32 %v208_v6, %v201_v22  ;;  %v316_v3 = vld [vmem:[#allocation5 + $0x2c8] sm:$0xff]  ;;  %v4523_v6 = vcombine.low %v308_v60, %v312_v61 }
 0x13c   :  { %v5930_v23 = vpack.c.bf16 %v218_v17, %v216_v8  ;;  %v5932_v24 = vpack.c.bf16 %v217_v18, %v215_v1  ;;  %v4532_v9 = vcombine.high %v316_v3, %v320_v4  ;;  %v328_v11 = vld [vmem:[#allocation5 + $0x328] sm:$0xff]  ;;  %v4531_v14 = vcombine.low %v316_v3, %v320_v4 }
 0x13d   :  { %v5934_v2 = vpack.c.bf16 %v222_v21, %v220_v16  ;;  %v5945_v30 = vpack.c.bf16 %v221_v26, %v219_v7  ;;  %v4540_v15 = vcombine.high %v324_v10, %v328_v11  ;;  %v332_v16 = vld [vmem:[#allocation5 + $0x348] sm:$0xff]  ;;  %v4539_v17 = vcombine.low %v324_v10, %v328_v11  ;;  %v234_v7 = vld [vmem:[#allocation5 + $0x38] sm:$0xff] }
 0x13e   :  { %1027 = vmatprep.mubr.bf16.mxu1 %v5930_v23  ;;  %1133 = vmatprep.mubr.bf16.mxu0 %v5930_v23  ;;  %v336_v8 = vld [vmem:[#allocation5 + $0x368] sm:$0xff]  ;;  %v4447_v29 = vcombine.low %v230_v25, %v234_v7 }
 0x13f   :  { %1028 = vmatmul.mubr.bf16.vlgmr.msra.gmra.mrb[0].mxu1 %v5932_v24  ;;  %1134 = vmatmul.mubr.bf16.vlgmr.msra.gmra.mrb[0].mxu0 %v5932_v24  ;;  %v4548_v1 = vcombine.high %v332_v16, %v336_v8  ;;  %v340_v18 = vld [vmem:[#allocation5 + $0x388] sm:$0xff]  ;;  %v4547_v20 = vcombine.low %v332_v16, %v336_v8 }
 0x140   :  { %1049 = vmatpush1.bf16.msra.mxu1 %v4443_v59  ;;  %1037 = vmatprep.mubr.bf16.mxu1 %v5934_v2  ;;  %v268_v59 = vld [vmem:[#allocation5 + $0x148] sm:$0xff] }
 0x141   :  { %1050 = vmatprep.subr.bf16.mxu1 %v4452_v5  ;;  %1143 = vmatprep.mubr.bf16.mxu0 %v5934_v2  ;;  %v4484_v37 = vcombine.high %v268_v59, %v272_v35  ;;  %v4483_v40 = vcombine.low %v268_v59, %v272_v35  ;;  %v344_v19 = vld [vmem:[#allocation5 + $0x3a8] sm:$0xff]  ;;  %v258_v59 = vld [vmem:[#allocation5 + $0xf8] sm:$0xff] }
 0x142   :  { %v4556_v21 = vcombine.high %v340_v18, %v344_v19  ;;  %v352_v22 = vld [vmem:[#allocation5 + $0x3e8] sm:$0xff]  ;;  %v4555_v5 = vcombine.low %v340_v18, %v344_v19 }
 0x143   :  { %v4564_v13 = vcombine.high %v348_v0, %v352_v22  ;;  %v4563_v26 = vcombine.low %v348_v0, %v352_v22 }
 0x144   :  { %1051 = vmatpush1.bf16.msra.mxu1 %v4451_v12  ;;  %v4448_v12 = vcombine.high %v230_v25, %v234_v7 }
 0x145   :  { %1052 = vmatprep.subr.bf16.mxu1 %v4460_v27  ;;  %v238_v27 = vld [vmem:[#allocation5 + $0x58] sm:$0xff] }
 0x146   :  { %v4455_v34 = vcombine.low %v238_v27, %v242_v28 }
 0x147   :  { %1038 = vmatmul.mubr.bf16.gmra.mrb[4].mxu1 %v5945_v30  ;;  %1144 = vmatmul.mubr.bf16.gmra.mrb[4].mxu0 %v5945_v30 }
 0x148   :  { %1053 = vmatpush1.bf16.msra.mxu1 %v4459_v31  ;;  %1080 = vmatprep.mubr.bf16.mxu1 %v5930_v23  ;;  %v4456_v31 = vcombine.high %v238_v27, %v242_v28 }
 0x149   :  { %1054 = vmatprep.subr.bf16.mxu1 %v4468_v32  ;;  %v246_v32 = vld [vmem:[#allocation5 + $0x98] sm:$0xff] }
 0x14a   :  { %v4463_v35 = vcombine.low %v246_v32, %v250_v33 }
 0x14c   :  { %1055 = vmatpush1.bf16.msra.mxu1 %v4467_v54  ;;  %v4464_v54 = vcombine.high %v246_v32, %v250_v33 }
 0x14d   :  { %1056 = vmatprep.subr.bf16.mxu1 %v4476_v55  ;;  %v254_v55 = vld [vmem:[#allocation5 + $0xd8] sm:$0xff] }
 0x14e   :  { %v4471_v39 = vcombine.low %v254_v55, %v258_v59 }
 0x150   :  { %1057 = vmatpush1.bf16.msra.mxu1 %v4475_v36  ;;  %v4472_v36 = vcombine.high %v254_v55, %v258_v59  ;;  %v5967_v55 = vld [vmem:[#allocation11 + $0x8] sm:$0xff] }
 0x151   :  { %1058 = vmatprep.subr.bf16.mxu1 %v4484_v37  ;;  %v262_v37 = vld [vmem:[#allocation5 + $0x118] sm:$0xff] }
 0x152   :  { %v4479_v43 = vcombine.low %v262_v37, %v266_v38 }
 0x154   :  { %1059 = vmatpush1.bf16.msra.mxu1 %v4483_v40  ;;  %v4480_v40 = vcombine.high %v262_v37, %v266_v38  ;;  %v5987_v37 = vld [vmem:[#allocation11 + $0x10] sm:$0xff] }
 0x155   :  { %1060 = vmatprep.subr.bf16.mxu1 %v4492_v41  ;;  %v270_v41 = vld [vmem:[#allocation5 + $0x158] sm:$0xff] }
 0x156   :  { %v4487_v47 = vcombine.low %v270_v41, %v274_v42 }
 0x158   :  { %1061 = vmatpush1.bf16.msra.mxu1 %v4491_v44  ;;  %v4488_v44 = vcombine.high %v270_v41, %v274_v42 }
 0x159   :  { %1062 = vmatprep.subr.bf16.mxu1 %v4500_v45  ;;  %v278_v45 = vld [vmem:[#allocation5 + $0x198] sm:$0xff] }
 0x15a   :  { %v4495_v51 = vcombine.low %v278_v45, %v282_v46 }
 0x15c   :  { %1063 = vmatpush1.bf16.msra.mxu1 %v4499_v48  ;;  %v4496_v48 = vcombine.high %v278_v45, %v282_v46 }
 0x15d   :  { %1064 = vmatprep.subr.bf16.mxu1 %v4508_v49  ;;  %v286_v49 = vld [vmem:[#allocation5 + $0x1d8] sm:$0xff] }
 0x15e   :  { %v4503_v60 = vcombine.low %v286_v49, %v290_v50 }
 0x160   :  { %1065 = vmatpush1.bf16.msra.mxu1 %v4507_v52  ;;  %v294_v52 = vld [vmem:[#allocation5 + $0x218] sm:$0xff] }
 0x161   :  { %1066 = vmatprep.subr.bf16.mxu1 %v4516_v58  ;;  %v298_v58 = vld [vmem:[#allocation5 + $0x238] sm:$0xff] }
 0x162   :  { %v4512_v61 = vcombine.high %v294_v52, %v298_v58  ;;  %v4511_v3 = vcombine.low %v294_v52, %v298_v58 }
 0x164   :  { %1067 = vmatpush1.bf16.msra.mxu1 %v4515_v62  ;;  %v302_v62 = vld [vmem:[#allocation5 + $0x258] sm:$0xff] }
 0x165   :  { %1068 = vmatprep.subr.bf16.mxu1 %v4524_v63  ;;  %v306_v63 = vld [vmem:[#allocation5 + $0x278] sm:$0xff] }
 0x166   :  { %v4520_v4 = vcombine.high %v302_v62, %v306_v63  ;;  %v4519_v10 = vcombine.low %v302_v62, %v306_v63 }
 0x168   :  { %1069 = vmatpush1.bf16.msra.mxu1 %v4523_v6  ;;  %v310_v6 = vld [vmem:[#allocation5 + $0x298] sm:$0xff] }
 0x169   :  { %1070 = vmatprep.subr.bf16.mxu1 %v4532_v9  ;;  %v314_v9 = vld [vmem:[#allocation5 + $0x2b8] sm:$0xff] }
 0x16a   :  { %v4528_v11 = vcombine.high %v310_v6, %v314_v9  ;;  %v4527_v16 = vcombine.low %v310_v6, %v314_v9  ;;  %v6059_v6 = vld [vmem:[%s6700_s9 + $0x30] sm:$0xff] }
 0x16c   :  { %1071 = vmatpush1.bf16.msra.mxu1 %v4531_v14  ;;  %v318_v14 = vld [vmem:[#allocation5 + $0x2d8] sm:$0xff] }
 0x16d   :  { %1072 = vmatprep.subr.bf16.mxu1 %v4540_v15  ;;  %v322_v15 = vld [vmem:[#allocation5 + $0x2f8] sm:$0xff] }
 0x16e   :  { %v4536_v8 = vcombine.high %v318_v14, %v322_v15  ;;  %v4535_v18 = vcombine.low %v318_v14, %v322_v15 }
 0x170   :  { %1073 = vmatpush1.bf16.msra.mxu1 %v4539_v17  ;;  %v326_v17 = vld [vmem:[#allocation5 + $0x318] sm:$0xff] }
 0x171   :  { %1074 = vmatprep.subr.bf16.mxu1 %v4548_v1  ;;  %v330_v1 = vld [vmem:[#allocation5 + $0x338] sm:$0xff] }
 0x172   :  { %v4544_v19 = vcombine.high %v326_v17, %v330_v1  ;;  %v4543_v0 = vcombine.low %v326_v17, %v330_v1 }
 0x174   :  { %1075 = vmatpush1.bf16.msra.mxu1 %v4547_v20  ;;  %v334_v20 = vld [vmem:[#allocation5 + $0x358] sm:$0xff] }
 0x175   :  { %1076 = vmatprep.subr.bf16.mxu1 %v4556_v21  ;;  %v338_v21 = vld [vmem:[#allocation5 + $0x378] sm:$0xff] }
 0x176   :  { %v4552_v22 = vcombine.high %v334_v20, %v338_v21  ;;  %v4551_v25 = vcombine.low %v334_v20, %v338_v21  ;;  %v1212_v20 = vld [vmem:[#allocation13 + $0x8] sm:$0xff] }
 0x178   :  { %1077 = vmatpush1.bf16.msra.mxu1 %v4555_v5  ;;  %v342_v5 = vld [vmem:[#allocation5 + $0x398] sm:$0xff] }
 0x179   :  { %1078 = vmatprep.subr.bf16.mxu1 %v4564_v13  ;;  %v346_v13 = vld [vmem:[#allocation5 + $0x3b8] sm:$0xff] }
 0x17a   :  { %v4560_v7 = vcombine.high %v342_v5, %v346_v13  ;;  %v4559_v27 = vcombine.low %v342_v5, %v346_v13  ;;  %v6093_v5 = vld [vmem:[#allocation14] sm:$0xff] }
 0x17c   :  { %1079 = vmatpush1.bf16.msra.mxu1 %v4563_v26  ;;  %v350_v26 = vld [vmem:[#allocation5 + $0x3d8] sm:$0xff] }
 0x17d   :  { %1154 = vmatprep.subr.bf16.mxu1 %v4448_v12  ;;  %v354_v12 = vld [vmem:[#allocation5 + $0x3f8] sm:$0xff] }
 0x17e   :  { %v4568_v28 = vcombine.high %v350_v26, %v354_v12 }
 0x17f   :  { %1081 = vmatmul.mubr.bf16.vlgmr.msra.gmra.mrb[8].mxu1 %v5932_v24 }
 0x180   :  { %1090 = vmatprep.mubr.bf16.mxu1 %v5934_v2  ;;  %1155 = vmatpush1.bf16.msra.mxu1 %v4447_v29  ;;  %v4567_v29 = vcombine.low %v350_v26, %v354_v12  ;;  %v6099_v12 = vld [vmem:[#allocation14 + $0x8] sm:$0xff] }
 0x181   :  { %1156 = vmatprep.subr.bf16.mxu1 %v4456_v31  ;;  %v5957_v31 = vld [vmem:[#allocation11] sm:$0xff] }
 0x184   :  { %1157 = vmatpush1.bf16.msra.mxu1 %v4455_v34 }
 0x185   :  { %1158 = vmatprep.subr.bf16.mxu1 %v4464_v54 }
 0x187   :  { %1091 = vmatmul.mubr.bf16.gmra.mrb[12].mxu1 %v5945_v30 }
 0x188   :  { %1159 = vmatpush1.bf16.msra.mxu1 %v4463_v35  ;;  %1186 = vmatprep.mubr.bf16.mxu1 %v5930_v23  ;;  %v4504_v23 = vcombine.high %v286_v49, %v290_v50  ;;  %v1219_v49 = vld [vmem:[%s6700_s9 + $0x20] sm:$0xff] }
 0x189   :  { %1160 = vmatprep.subr.bf16.mxu1 %v4472_v36 }
 0x18c   :  { %1161 = vmatpush1.bf16.msra.mxu1 %v4471_v39 }
 0x18d   :  { %1162 = vmatprep.subr.bf16.mxu1 %v4480_v40 }
 0x190   :  { %1163 = vmatpush1.bf16.msra.mxu1 %v4479_v43 }
 0x191   :  { %1164 = vmatprep.subr.bf16.mxu1 %v4488_v44 }
 0x194   :  { %1165 = vmatpush1.bf16.msra.mxu1 %v4487_v47  ;;  %v1215_v47 = vld [vmem:[%s6700_s9] sm:$0xff] }
 0x195   :  { %1166 = vmatprep.subr.bf16.mxu1 %v4496_v48 }
 0x198   :  { %1167 = vmatpush1.bf16.msra.mxu1 %v4495_v51 }
 0x199   :  { %1168 = vmatprep.subr.bf16.mxu1 %v4504_v23  ;;  %v1216_v23 = vld [vmem:[%s6700_s9 + $0x8] sm:$0xff] }
 0x19c   :  { %1169 = vmatpush1.bf16.msra.mxu1 %v4503_v60  ;;  %v1220_v60 = vld [vmem:[%s6700_s9 + $0x28] sm:$0xff] }
 0x19d   :  { %1170 = vmatprep.subr.bf16.mxu1 %v4512_v61 }
 0x1a0   :  { %1171 = vmatpush1.bf16.msra.mxu1 %v4511_v3  ;;  %v6054_v3 = vld [vmem:[%s6700_s9 + $0x10] sm:$0xff] }
 0x1a1   :  { %1172 = vmatprep.subr.bf16.mxu1 %v4520_v4 }
 0x1a4   :  { %1173 = vmatpush1.bf16.msra.mxu1 %v4519_v10 }
 0x1a5   :  { %1174 = vmatprep.subr.bf16.mxu1 %v4528_v11  ;;  %v6070_v11 = vld [vmem:[%s6700_s9 + $0x18] sm:$0xff] }
 0x1a8   :  { %1175 = vmatpush1.bf16.msra.mxu1 %v4527_v16  ;;  %v6079_v16 = vld [vmem:[%s6700_s9 + $0x38] sm:$0xff] }
 0x1a9   :  { %1176 = vmatprep.subr.bf16.mxu1 %v4536_v8 }
 0x1ac   :  { %1177 = vmatpush1.bf16.msra.mxu1 %v4535_v18  ;;  %v1211_v18 = vld [vmem:[#allocation13] sm:$0xff] }
 0x1ad   :  { %1178 = vmatprep.subr.bf16.mxu1 %v4544_v19 }
 0x1b0   :  { %1179 = vmatpush1.bf16.msra.mxu1 %v4543_v0 }
 0x1b1   :  { %1180 = vmatprep.subr.bf16.mxu1 %v4552_v22 }
 0x1b4   :  { %1181 = vmatpush1.bf16.msra.mxu1 %v4551_v25 }
 0x1b5   :  { %1182 = vmatprep.subr.bf16.mxu1 %v4560_v7 }
 0x1b8   :  { %1183 = vmatpush1.bf16.msra.mxu1 %v4559_v27 }
 0x1b9   :  { %1184 = vmatprep.subr.bf16.mxu1 %v4568_v28 }
 0x1bc   :  { %1185 = vmatpush1.bf16.msra.mxu1 %v4567_v29 }
 0x1bf   :  { %1187 = vmatmul.mubr.bf16.vlgmr.msra.gmra.mrb[16].mxu1 %v5932_v24 }
 0x1c0   :  { %1196 = vmatprep.mubr.bf16.mxu1 %v5934_v2 }
 0x1c7   :  { %1197 = vmatmul.mubr.bf16.gmra.mrb[20].mxu1 %v5945_v30 }
 0x212   :  { %v5959_v32 = vpop.f32.mrb[0].mxu1  ;;  %v5961_v33 = vpop.f32.mrb[0].mxu0 }
 0x213   :  { %1243 = vrot.lane.b32.xlu0 %v5961_v33, %s5640_s1  ;;  %v5965_v34 = vpop.f32.mrb[1].mxu1  ;;  %v1137_v54 = vpop.f32.mrb[1].mxu0  ;;  %v1239_v21 = vmul.f32 %v5957_v31, %v5961_v33  ;;  %v1298_v27 = vmul.f32 %v1215_v47, %v5959_v32 }
 0x214   :  { %v5970_v24 = vmul.f32 %v5957_v31, %v1137_v54  ;;  %v5972_v2 = vpop.f32.mrb[2].mxu1  ;;  %v5974_v30 = vpop.f32.mrb[2].mxu0 }
 0x215   :  { %1245 = vrot.lane.b32.xlu1 %v5974_v30, %s5640_s1  ;;  %v5978_v59 = vpop.f32.mrb[3].mxu1  ;;  %v1141_v35 = vpop.f32.mrb[3].mxu0  ;;  %v1240_v13 = vmul.f32 %v5967_v55, %v5974_v30 }
 0x216   :  { %v5981_v36 = vmul.f32 %v5967_v55, %v1141_v35  ;;  %v1299_v55 = vmul.f32 %v1216_v23, %v5972_v2 }
 0x217   :  { %1306 = vrot.lane.b32.xlu0 %v5959_v32, %s5640_s1 }
 0x219   :  { %1308 = vrot.lane.b32.xlu1 %v5972_v2, %s5640_s1 }
 0x21a   :  { %v5989_v38 = vpop.f32.mrb[4].mxu1  ;;  %v5991_v39 = vpop.f32.mrb[4].mxu0 }
 0x21b   :  { %1314 = vrot.lane.b32.xlu0 %v5965_v34, %s5640_s1  ;;  %v1147_v40 = vpop.f32.mrb[5].mxu0  ;;  %v5995_v41 = vpop.f32.mrb[5].mxu1 }
 0x21c   :  { %v5998_v42 = vmul.f32 %v5987_v37, %v1147_v40  ;;  %v6000_v43 = vpop.f32.mrb[6].mxu1  ;;  %v6002_v44 = vpop.f32.mrb[6].mxu0 }
 0x21d   :  { %1316 = vrot.lane.b32.xlu1 %v5978_v59, %s5640_s1  ;;  %v6006_v45 = vpop.f32.mrb[7].mxu0  ;;  %v6008_v46 = vpop.f32.mrb[7].mxu1 }
 0x21f   :  { %1975 = vrot.lane.b32.xlu0 %v1137_v54, %s5640_s1  ;;  %v6107_v54 = vld [vmem:[#allocation14 + $0x20] sm:$0xff] }
 0x221   :  { %1977 = vrot.lane.b32.xlu1 %v1141_v35, %s5640_s1 }
 0x223   :  { %1310 = vrot.lane.b32.xlu0 %v5989_v38, %s5640_s1 }
 0x225   :  { %1247 = vrot.lane.b32.xlu1 %v5991_v39, %s5640_s1 }
 0x227   :  { %1318 = vrot.lane.b32.xlu0 %v5995_v41, %s5640_s1 }
 0x229   :  { %1249 = vrot.lane.b32.xlu1 %v6002_v44, %s5640_s1 }
 0x22b   :  { %1979 = vrot.lane.b32.xlu0 %v1147_v40, %s5640_s1 }
 0x22d   :  { %1312 = vrot.lane.b32.xlu1 %v6000_v43, %s5640_s1 }
 0x231   :  { %1320 = vrot.lane.b32.xlu1 %v6008_v46, %s5640_s1 }
 0x235   :  { %1981 = vrot.lane.b32.xlu1 %v6006_v45, %s5640_s1 }
 0x252   :  { %v1082_v48 = vpop.f32.mrb[8].mxu1 }
 0x253   :  { %v6033_v50 = vmul.f32 %v1215_v47, %v1082_v48  ;;  %2039 = vrot.lane.b32.xlu0 %v1082_v48, %s5640_s1  ;;  %v1084_v51 = vpop.f32.mrb[9].mxu1  ;;  %v6115_v47 = vld [vmem:[#allocation14 + $0x28] sm:$0xff]  ;;  %v1302_v48 = vmul.f32 %v1219_v49, %v5965_v34 }
 0x254   :  { %v6039_v52 = vmul.f32 %v1219_v49, %v1084_v51  ;;  %v1086_v58 = vpop.f32.mrb[10].mxu1 }
 0x255   :  { %v6044_v61 = vmul.f32 %v1216_v23, %v1086_v58  ;;  %2041 = vrot.lane.b32.xlu1 %v1086_v58, %s5640_s1  ;;  %v1088_v62 = vpop.f32.mrb[11].mxu1 }
 0x256   :  { %v6047_v63 = vmul.f32 %v1220_v60, %v1088_v62 }
 0x257   :  { %2047 = vrot.lane.b32.xlu0 %v1084_v51, %s5640_s1 }
 0x259   :  { %2049 = vrot.lane.b32.xlu1 %v1088_v62, %s5640_s1  ;;  %v1303_v62 = vmul.f32 %v1220_v60, %v5978_v59 }
 0x25a   :  { %v1092_v4 = vpop.f32.mrb[12].mxu1 }
 0x25b   :  { %v6062_v9 = vmul.f32 %v6054_v3, %v1092_v4  ;;  %2043 = vrot.lane.b32.xlu0 %v1092_v4, %s5640_s1  ;;  %v6065_v10 = vpop.f32.mrb[13].mxu1 }
 0x25c   :  { %v6074_v14 = vmul.f32 %v6059_v6, %v6065_v10  ;;  %v1096_v15 = vpop.f32.mrb[14].mxu1 }
 0x25d   :  { %v6082_v8 = vmul.f32 %v6070_v11, %v1096_v15  ;;  %2045 = vrot.lane.b32.xlu1 %v1096_v15, %s5640_s1  ;;  %v6085_v17 = vpop.f32.mrb[15].mxu1 }
 0x25e   :  { %v6089_v1 = vmul.f32 %v6079_v16, %v6085_v17 }
 0x285   :  { %v1244_v19 = vpop.permute.xlu0 %1243 }
 0x286   :  { %v1251_v0 = vmul.f32 %v1244_v19, %v1211_v18 }
 0x287   :  { %v1246_v22 = vpop.permute.xlu1 %1245 }
 0x288   :  { %v6097_v25 = vadd.f32 %v1251_v0, %v1239_v21  ;;  %v1252_v7 = vmul.f32 %v1246_v22, %v1212_v20 }
 0x289   :  { %v1307_v26 = vpop.permute.xlu0 %1306 }
 0x28a   :  { %v6102_v28 = vadd.f32 %v1252_v7, %v1240_v13  ;;  %v1322_v29 = vmul.f32 %v1307_v26, %v6093_v5  ;;  %v1259_v31 = vmul.f32 %v6097_v25, %v6097_v25 }
 0x28b   :  { %v1309_v33 = vpop.permute.xlu1 %1308 }
 0x28c   :  { %v6110_v30 = vadd.f32 %v1322_v29, %v1298_v27  ;;  %v1323_v35 = vmul.f32 %v1309_v33, %v6099_v12  ;;  %1263 = vadd.xlane.f32.xlu0 %v1259_v31  ;;  %v1260_v32 = vmul.f32 %v6102_v28, %v6102_v28  ;;  %v6140_v31 = vld [vmem:[#allocation14 + $0x10] sm:$0xff] }
 0x28d   :  { %v1315_v40 = vpop.permute.xlu0 %1314 }
 0x28e   :  { %v6118_v51 = vadd.f32 %v1323_v35, %v1299_v55  ;;  %v1326_v58 = vmul.f32 %v1315_v40, %v6107_v54  ;;  %1265 = vadd.xlane.f32.xlu1 %v1260_v32  ;;  %v1338_v2 = vmul.f32 %v6110_v30, %v6110_v30  ;;  %v1213_v55 = vld [vmem:[#allocation13 + $0x10] sm:$0xff]  ;;  %v1241_v32 = vmul.f32 %v5987_v37, %v5991_v39 }
 0x28f   :  { %v1317_v23 = vpop.permute.xlu1 %1316 }
 0x290   :  { %v6124_v4 = vadd.f32 %v1326_v58, %v1302_v48  ;;  %v1327_v15 = vmul.f32 %v1317_v23, %v6115_v47  ;;  %1346 = vadd.xlane.f32.xlu0 %v1338_v2  ;;  %v1339_v19 = vmul.f32 %v6118_v51, %v6118_v51  ;;  %v6150_v58 = vld [vmem:[#allocation11 + $0x18] sm:$0xff] }
 0x291   :  { %v1976_v34 = vpop.permute.xlu0 %1975  ;;  %v6152_v23 = vld [vmem:[#allocation13 + $0x18] sm:$0xff]  ;;  %v1242_v37 = vmul.f32 %v6150_v58, %v6002_v44 }
 0x292   :  { %v6129_v49 = vadd.f32 %v1327_v15, %v1303_v62  ;;  %v1983_v21 = vmul.f32 %v1976_v34, %v1211_v18  ;;  %v1188_v0 = vpop.f32.mrb[16].mxu1  ;;  %1348 = vadd.xlane.f32.xlu1 %v1339_v19  ;;  %v1342_v22 = vmul.f32 %v6124_v4, %v6124_v4 }
 0x293   :  { %1290 = vst [vmem:[#allocation19] sm:$0xff] %v1188_v0  ;;  %v1190_v13 = vpop.f32.mrb[17].mxu1  ;;  %v1978_v59 = vpop.permute.xlu1 %1977 }
 0x294   :  { %v6134_v60 = vadd.f32 %v1983_v21, %v5970_v24  ;;  %2023 = vst [vmem:[#allocation19 + $0x10] sm:$0xff] %v1190_v13  ;;  %v1984_v7 = vmul.f32 %v1978_v59, %v1212_v20  ;;  %v1192_v26 = vpop.f32.mrb[18].mxu1  ;;  %1354 = vadd.xlane.f32.xlu0 %v1342_v22  ;;  %v1343_v27 = vmul.f32 %v6129_v49, %v6129_v49  ;;  %v1226_v59 = vld [vmem:[#allocation14 + $0x18] sm:$0xff] }
 0x295   :  { %1291 = vst [vmem:[#allocation19 + $0x8] sm:$0xff] %v1192_v26  ;;  %v6138_v18 = vpack.c.bf16 %v1192_v26, %v1188_v0  ;;  %v1194_v29 = vpop.f32.mrb[19].mxu1  ;;  %v1311_v33 = vpop.permute.xlu0 %1310 }
 0x296   :  { %v6143_v35 = vadd.f32 %v1984_v7, %v5981_v36  ;;  %2024 = vst [vmem:[#allocation19 + $0x18] sm:$0xff] %v1194_v29  ;;  %v6145_v24 = vpack.c.bf16 %v1194_v29, %v1190_v13  ;;  %1356 = vadd.xlane.f32.xlu1 %v1343_v27  ;;  %v1324_v40 = vmul.f32 %v1311_v33, %v6140_v31 }
 0x297   :  { %v1248_v20 = vpop.permute.xlu1 %1247  ;;  %v1300_v36 = vmul.f32 %v6054_v3, %v5989_v38  ;;  %v1301_v27 = vmul.f32 %v6070_v11, %v6000_v43 }
 0x298   :  { %v1253_v48 = vmul.f32 %v1248_v20, %v1213_v55 }
 0x299   :  { %v1319_v2 = vpop.permute.xlu0 %1318  ;;  %v6160_v39 = vadd.f32 %v1324_v40, %v1300_v36 }
 0x29a   :  { %v6156_v62 = vadd.f32 %v1253_v48, %v1241_v32  ;;  %v1198_v15 = vpop.f32.mrb[20].mxu1 }
 0x29b   :  { %1296 = vst [vmem:[#allocation19 + $0x20] sm:$0xff] %v1198_v15  ;;  %v1200_v19 = vpop.f32.mrb[21].mxu1  ;;  %v1250_v34 = vpop.permute.xlu1 %1249  ;;  %v1340_v32 = vmul.f32 %v6160_v39, %v6160_v39 }
 0x29c   :  { %2029 = vst [vmem:[#allocation19 + $0x30] sm:$0xff] %v1200_v19  ;;  %v1254_v21 = vmul.f32 %v1250_v34, %v6152_v23  ;;  %v1202_v0 = vpop.f32.mrb[22].mxu1  ;;  %v1261_v22 = vmul.f32 %v6156_v62, %v6156_v62 }
 0x29d   :  { %1297 = vst [vmem:[#allocation19 + $0x28] sm:$0xff] %v1202_v0  ;;  %v6165_v38 = vpack.c.bf16 %v1202_v0, %v1198_v15  ;;  %v1204_v3 = vpop.f32.mrb[23].mxu1  ;;  %v1980_v13 = vpop.permute.xlu0 %1979 }
 0x29e   :  { %v6167_v7 = vadd.f32 %v1254_v21, %v1242_v37  ;;  %2030 = vst [vmem:[#allocation19 + $0x38] sm:$0xff] %v1204_v3  ;;  %v6169_v26 = vpack.c.bf16 %v1204_v3, %v1200_v19  ;;  %v1985_v44 = vmul.f32 %v1980_v13, %v1213_v55  ;;  %1267 = vadd.xlane.f32.xlu0 %v1261_v22  ;;  %v6193_v21 = vld [vmem:[#allocation14 + $0x30] sm:$0xff]  ;;  %v6204_v13 = vld [vmem:[#allocation14 + $0x38] sm:$0xff] }
 0x29f   :  { %v1313_v29 = vpop.permute.xlu1 %1312  ;;  %v1328_v3 = vmul.f32 %v1319_v2, %v6193_v21 }
 0x2a0   :  { %v6174_v33 = vadd.f32 %v1985_v44, %v5998_v42  ;;  %v1325_v20 = vmul.f32 %v1313_v29, %v1226_v59  ;;  %v1262_v40 = vmul.f32 %v6167_v7, %v6167_v7 }
 0x2a2   :  { %v6180_v48 = vadd.f32 %v1325_v20, %v1301_v27  ;;  %1350 = vadd.xlane.f32.xlu0 %v1340_v32  ;;  %1269 = vadd.xlane.f32.xlu1 %v1262_v40 }
 0x2a3   :  { %v1321_v42 = vpop.permute.xlu1 %1320 }
 0x2a4   :  { %v1341_v55 = vmul.f32 %v6180_v48, %v6180_v48 }
 0x2a6   :  { %1352 = vadd.xlane.f32.xlu1 %v1341_v55 }
 0x2a7   :  { %v1982_v43 = vpop.permute.xlu1 %1981 }
 0x2b7   :  { %2053 = vrot.lane.b32.xlu1 %v6085_v17, %s5640_s1 }
 0x2b8   :  { %2051 = vrot.lane.b32.xlu0 %v6065_v10, %s5640_s1 }
 0x2c5   :  { %v2040_v11 = vpop.permute.xlu0 %2039 }
 0x2c6   :  { %v2055_v36 = vmul.f32 %v2040_v11, %v6093_v5 }
 0x2c7   :  { %v2042_v15 = vpop.permute.xlu1 %2041 }
 0x2c8   :  { %v6190_v19 = vadd.f32 %v2055_v36, %v6033_v50  ;;  %v2056_v34 = vmul.f32 %v2042_v15, %v6099_v12 }
 0x2c9   :  { %v2048_v37 = vpop.permute.xlu0 %2047 }
 0x2ca   :  { %v6196_v0 = vadd.f32 %v2056_v34, %v6044_v61  ;;  %v2059_v17 = vmul.f32 %v2048_v37, %v6107_v54  ;;  %v1304_v61 = vmul.f32 %v6059_v6, %v5995_v41  ;;  %v1974_v6 = vmul.f32 %v6150_v58, %v6006_v45 }
 0x2cb   :  { %v2050_v10 = vpop.permute.xlu1 %2049  ;;  %v1993_v45 = vmul.f32 %v6174_v33, %v6174_v33 }
 0x2cc   :  { %v6200_v22 = vadd.f32 %v2059_v17, %v6039_v52  ;;  %v2060_v5 = vmul.f32 %v2050_v10, %v6115_v47  ;;  %v6215_v29 = vadd.f32 %v1328_v3, %v1304_v61  ;;  %v1329_v47 = vmul.f32 %v1321_v42, %v6204_v13 }
 0x2cd   :  { %v2044_v50 = vpop.permute.xlu0 %2043  ;;  %v2072_v58 = vmul.f32 %v6196_v0, %v6196_v0 }
 0x2ce   :  { %v6207_v12 = vadd.f32 %v2060_v5, %v6047_v63  ;;  %v2057_v44 = vmul.f32 %v2044_v50, %v6140_v31  ;;  %v1305_v63 = vmul.f32 %v6079_v16, %v6008_v46  ;;  %v1986_v31 = vmul.f32 %v1982_v43, %v6152_v23 }
 0x2cf   :  { %v2046_v54 = vpop.permute.xlu1 %2045  ;;  %v1344_v41 = vmul.f32 %v6215_v29, %v6215_v29  ;;  %v1992_v46 = vmul.f32 %v6143_v35, %v6143_v35  ;;  %v2071_v23 = vmul.f32 %v6190_v19, %v6190_v19  ;;  %v2075_v42 = vmul.f32 %v6200_v22, %v6200_v22 }
 0x2d0   :  { %v6213_v27 = vadd.f32 %v2057_v44, %v6062_v9  ;;  %v2058_v52 = vmul.f32 %v2046_v54, %v1226_v59  ;;  %v6223_v20 = vadd.f32 %v1329_v47, %v1305_v63  ;;  %v6230_v9 = vadd.f32 %v1986_v31, %v1974_v6 }
 0x2d1   :  { %v2076_v55 = vmul.f32 %v6207_v12, %v6207_v12 }
 0x2d2   :  { %v6219_v2 = vadd.f32 %v2058_v52, %v6082_v8  ;;  %v1991_v8 = vmul.f32 %v6134_v60, %v6134_v60  ;;  %v1345_v59 = vmul.f32 %v6223_v20, %v6223_v20  ;;  %v1994_v16 = vmul.f32 %v6230_v9, %v6230_v9 }
 0x2d3   :  { %v2073_v40 = vmul.f32 %v6213_v27, %v6213_v27 }
 0x2d4   :  { %v2074_v32 = vmul.f32 %v6219_v2, %v6219_v2 }
 0x2d7   :  { %1358 = vadd.xlane.f32.xlu0 %v1344_v41 }
 0x2db   :  { %1995 = vadd.xlane.f32.xlu0 %v1991_v8  ;;  %1360 = vadd.xlane.f32.xlu1 %v1345_v59 }
 0x2df   :  { %1997 = vadd.xlane.f32.xlu0 %v1992_v46  ;;  %2001 = vadd.xlane.f32.xlu1 %v1994_v16 }
 0x2e3   :  { %1999 = vadd.xlane.f32.xlu0 %v1993_v45  ;;  %2081 = vadd.xlane.f32.xlu1 %v2072_v58 }
 0x2e7   :  { %2079 = vadd.xlane.f32.xlu0 %v2071_v23  ;;  %2085 = vadd.xlane.f32.xlu1 %v2074_v32 }
 0x2eb   :  { %2083 = vadd.xlane.f32.xlu0 %v2073_v40  ;;  %2089 = vadd.xlane.f32.xlu1 %v2076_v55 }
 0x2ef   :  { %2087 = vadd.xlane.f32.xlu0 %v2075_v42 }
 0x319   :  { %v1264_v43 = vpop.xlane.xlu0 %1263 }
 0x31a   :  { %v1272_v11 = vmul.f32 0.0078125, %v1264_v43 }
 0x31b   :  { %v1266_v36 = vpop.xlane.xlu1 %1265 }
 0x31c   :  { %v1276_v15 = vadd.f32 1e-06, %v1272_v11  ;;  %v1273_v34 = vmul.f32 0.0078125, %v1266_v36 }
 0x31d   :  { %v1347_v37 = vpop.xlane.xlu0 %1346 }
 0x31e   :  { %5180 = vrsqrt.f32 %v1276_v15  ;;  %v1277_v17 = vadd.f32 1e-06, %v1273_v34  ;;  %v1362_v10 = vmul.f32 0.0078125, %v1347_v37 }
 0x31f   :  { %v1349_v5 = vpop.xlane.xlu1 %1348 }
 0x320   :  { %5182 = vrsqrt.f32 %v1277_v17  ;;  %v1370_v3 = vadd.f32 1e-06, %v1362_v10  ;;  %v1363_v50 = vmul.f32 0.0078125, %v1349_v5 }
 0x321   :  { %v1355_v61 = vpop.xlane.xlu0 %1354 }
 0x322   :  { %5184 = vrsqrt.f32 %v1370_v3  ;;  %v1371_v44 = vadd.f32 1e-06, %v1363_v50  ;;  %v1366_v36 = vmul.f32 0.0078125, %v1355_v61 }
 0x323   :  { %v1357_v63 = vpop.xlane.xlu1 %1356 }
 0x324   :  { %5186 = vrsqrt.f32 %v1371_v44  ;;  %v1367_v55 = vmul.f32 0.0078125, %v1357_v63  ;;  %v1374_v5 = vadd.f32 1e-06, %v1366_v36 }
 0x326   :  { %v1375_v37 = vadd.f32 1e-06, %v1367_v55 }
 0x328   :  { %v5181_v54 = vpop.eup %5180 }
 0x329   :  { %v1284_v52 = vmul.f32 %v5181_v54, %v6097_v25 }
 0x32a   :  { %v5183_v47 = vpop.eup %5182 }
 0x32b   :  { %v1268_v31 = vpop.xlane.xlu0 %1267  ;;  %v1285_v41 = vmul.f32 %v5183_v47, %v6102_v28  ;;  %1288 = vst [vmem:[#allocation17] sm:$0xff] %v1284_v52 }
 0x32c   :  { %v5185_v6 = vpop.eup %5184  ;;  %v1274_v8 = vmul.f32 0.0078125, %v1268_v31 }
 0x32d   :  { %1289 = vst [vmem:[#allocation17 + $0x8] sm:$0xff] %v1285_v41  ;;  %v1398_v59 = vpack.c.bf16 %v1285_v41, %v1284_v52  ;;  %v1386_v23 = vmul.f32 %v5185_v6, %v6110_v30 }
 0x32e   :  { %v5187_v46 = vpop.eup %5186  ;;  %v1278_v16 = vadd.f32 1e-06, %v1274_v8 }
 0x32f   :  { %v1351_v45 = vpop.xlane.xlu0 %1350  ;;  %4873 = vmatprep.subr.bf16.mxu0 %v1398_v59  ;;  %v1270_v58 = vpop.xlane.xlu1 %1269  ;;  %v1387_v32 = vmul.f32 %v5187_v46, %v6118_v51 }
 0x330   :  { %5188 = vrsqrt.f32 %v1278_v16  ;;  %v1275_v25 = vmul.f32 0.0078125, %v1270_v58  ;;  %4874 = vmatpush3.bf16.xpose.msra.mxu0 %v1398_v59  ;;  %v1364_v42 = vmul.f32 0.0078125, %v1351_v45 }
 0x331   :  { %v1394_v40 = vpack.c.bf16 %v1387_v32, %v1386_v23 }
 0x332   :  { %v1279_v28 = vadd.f32 1e-06, %v1275_v25  ;;  %v1372_v17 = vadd.f32 1e-06, %v1364_v42 }
 0x333   :  { %v2052_v43 = vpop.permute.xlu0 %2051  ;;  %4877 = vmatprep.mubr.bf16.mxu0 %v1394_v40  ;;  %v1353_v11 = vpop.xlane.xlu1 %1352 }
 0x334   :  { %v2061_v15 = vmul.f32 %v2052_v43, %v6193_v21  ;;  %v1365_v34 = vmul.f32 0.0078125, %v1353_v11  ;;  %5190 = vrsqrt.f32 %v1279_v28 }
 0x336   :  { %v6260_v30 = vadd.f32 %v2061_v15, %v6074_v14  ;;  %v1373_v51 = vadd.f32 1e-06, %v1365_v34 }
 0x337   :  { %v2054_v10 = vpop.permute.xlu1 %2053 }
 0x338   :  { %v2062_v3 = vmul.f32 %v2054_v10, %v6204_v13  ;;  %v2077_v50 = vmul.f32 %v6260_v30, %v6260_v30  ;;  %5192 = vrsqrt.f32 %v1373_v51 }
 0x339   :  { %5194 = vrsqrt.f32 %v1375_v37 }
 0x33a   :  { %v5189_v44 = vpop.eup %5188  ;;  %v6266_v21 = vadd.f32 %v2062_v3, %v6089_v1  ;;  %2091 = vadd.xlane.f32.xlu0 %v2077_v50  ;;  %5196 = vrsqrt.f32 %v1372_v17 }
 0x33b   :  { %v1286_v14 = vmul.f32 %v5189_v44, %v6156_v62  ;;  %5198 = vrsqrt.f32 %v1374_v5 }
 0x33c   :  { %v2078_v61 = vmul.f32 %v6266_v21, %v6266_v21 }
 0x33d   :  { %1293 = vst [vmem:[#allocation17 + $0x20] sm:$0xff] %v1286_v14 }
 0x33e   :  { %2093 = vadd.xlane.f32.xlu1 %v2078_v61  ;;  %v5191_v13 = vpop.eup %5190 }
 0x33f   :  { %v1287_v54 = vmul.f32 %v5191_v13, %v6167_v7 }
 0x341   :  { %1294 = vst [vmem:[#allocation17 + $0x28] sm:$0xff] %v1287_v54  ;;  %v1399_v52 = vpack.c.bf16 %v1287_v54, %v1286_v14 }
 0x342   :  { %v5193_v47 = vpop.eup %5192 }
 0x343   :  { %v5195_v63 = vpop.eup %5194  ;;  %4875 = vmatprep.subr.bf16.mxu0 %v1399_v52  ;;  %v1389_v41 = vmul.f32 %v5193_v47, %v6180_v48 }
 0x344   :  { %v5197_v1 = vpop.eup %5196  ;;  %4876 = vmatpush3.bf16.xpose.msra.mxu0 %v1399_v52  ;;  %v1391_v62 = vmul.f32 %v5195_v63, %v6129_v49 }
 0x345   :  { %v5199_v31 = vpop.eup %5198  ;;  %4885 = vmatprep.subr.bf16.mxu0 %v6138_v18  ;;  %v1388_v6 = vmul.f32 %v5197_v1, %v6160_v39 }
 0x346   :  { %v1390_v8 = vmul.f32 %v5199_v31, %v6124_v4 }
 0x347   :  { %v1395_v59 = vpack.c.bf16 %v1389_v41, %v1388_v6 }
 0x348   :  { %v1396_v7 = vpack.c.bf16 %v1391_v62, %v1390_v8 }
 0x34b   :  { %4878 = vmatmul.mubr.bf16.vlgmr.msra.gmra.mrb[8].mxu0 %v1395_v59 }
 0x34c   :  { %4881 = vmatprep.mubr.bf16.mxu0 %v1396_v7  ;;  %4886 = vmatpush3.bf16.msra.mxu0 %v6138_v18 }
 0x34d   :  { %4887 = vmatprep.subr.bf16.mxu0 %v6165_v38 }
 0x350   :  { %4888 = vmatpush3.bf16.msra.mxu0 %v6165_v38 }
 0x364   :  { %v1359_v46 = vpop.xlane.xlu0 %1358 }
 0x365   :  { %v1368_v48 = vmul.f32 0.0078125, %v1359_v46 }
 0x367   :  { %v1376_v16 = vadd.f32 1e-06, %v1368_v48 }
 0x368   :  { %v1996_v45 = vpop.xlane.xlu0 %1995  ;;  %v1361_v58 = vpop.xlane.xlu1 %1360 }
 0x369   :  { %v2003_v49 = vmul.f32 0.0078125, %v1996_v45  ;;  %v1369_v23 = vmul.f32 0.0078125, %v1361_v58  ;;  %5200 = vrsqrt.f32 %v1376_v16 }
 0x36b   :  { %v2007_v39 = vadd.f32 1e-06, %v2003_v49  ;;  %v1377_v4 = vadd.f32 1e-06, %v1369_v23 }
 0x36c   :  { %v1998_v32 = vpop.xlane.xlu0 %1997  ;;  %v2002_v25 = vpop.xlane.xlu1 %2001 }
 0x36d   :  { %5202 = vrsqrt.f32 %v2007_v39  ;;  %v2004_v40 = vmul.f32 0.0078125, %v1998_v32  ;;  %v2006_v55 = vmul.f32 0.0078125, %v2002_v25 }
 0x36e   :  { %5204 = vrsqrt.f32 %v1377_v4 }
 0x36f   :  { %v2008_v18 = vadd.f32 1e-06, %v2004_v40  ;;  %v2010_v28 = vadd.f32 1e-06, %v2006_v55 }
 0x370   :  { %v2000_v42 = vpop.xlane.xlu0 %1999  ;;  %v2082_v38 = vpop.xlane.xlu1 %2081 }
 0x371   :  { %5206 = vrsqrt.f32 %v2008_v18  ;;  %v2005_v43 = vmul.f32 0.0078125, %v2000_v42  ;;  %v2096_v11 = vmul.f32 0.0078125, %v2082_v38 }
 0x372   :  { %5208 = vrsqrt.f32 %v2010_v28 }
 0x373   :  { %v2009_v36 = vadd.f32 1e-06, %v2005_v43  ;;  %v2104_v15 = vadd.f32 1e-06, %v2096_v11  ;;  %v5201_v51 = vpop.eup %5200 }
 0x374   :  { %v2080_v34 = vpop.xlane.xlu0 %2079  ;;  %v2086_v37 = vpop.xlane.xlu1 %2085  ;;  %v1392_v61 = vmul.f32 %v5201_v51, %v6215_v29 }
 0x375   :  { %5210 = vrsqrt.f32 %v2009_v36  ;;  %v2095_v17 = vmul.f32 0.0078125, %v2080_v34  ;;  %v2098_v10 = vmul.f32 0.0078125, %v2086_v37 }
 0x376   :  { %5212 = vrsqrt.f32 %v2104_v15 }
 0x377   :  { %v5203_v5 = vpop.eup %5202  ;;  %v2103_v3 = vadd.f32 1e-06, %v2095_v17  ;;  %v2106_v63 = vadd.f32 1e-06, %v2098_v10  ;;  %v1232_v10 = vld [vmem:[%s6702_s11 + $0x8] sm:$0xff] }
 0x378   :  { %v5205_v50 = vpop.eup %5204  ;;  %v2084_v44 = vpop.xlane.xlu0 %2083  ;;  %v2015_v13 = vmul.f32 %v5203_v5, %v6134_v60 }
 0x379   :  { %v2090_v14 = vpop.xlane.xlu1 %2089  ;;  %5214 = vrsqrt.f32 %v2103_v3  ;;  %v2097_v54 = vmul.f32 0.0078125, %v2084_v44  ;;  %v1393_v47 = vmul.f32 %v5205_v50, %v6223_v20  ;;  %v1234_v50 = vld [vmem:[%s6702_s11 + $0x18] sm:$0xff] }
 0x37a   :  { %v2100_v52 = vmul.f32 0.0078125, %v2090_v14  ;;  %2020 = vst [vmem:[#allocation17 + $0x10] sm:$0xff] %v2015_v13 }
 0x37b   :  { %v5207_v1 = vpop.eup %5206  ;;  %v2105_v31 = vadd.f32 1e-06, %v2097_v54  ;;  %v1397_v62 = vpack.c.bf16 %v1393_v47, %v1392_v61 }
 0x37c   :  { %v2108_v41 = vadd.f32 1e-06, %v2100_v52  ;;  %v5209_v6 = vpop.eup %5208  ;;  %v2088_v8 = vpop.xlane.xlu0 %2087  ;;  %v2016_v59 = vmul.f32 %v5207_v1, %v6143_v35 }
 0x37d   :  { %5216 = vrsqrt.f32 %v2105_v31  ;;  %v2099_v7 = vmul.f32 0.0078125, %v2088_v8  ;;  %4882 = vmatmul.mubr.bf16.gmra.mrb[12].mxu0 %v1397_v62  ;;  %v2018_v60 = vmul.f32 %v5209_v6, %v6230_v9  ;;  %v6329_v31 = vld [vmem:[%s6702_s11 + $0x20] sm:$0xff] }
 0x37e   :  { %5218 = vrsqrt.f32 %v2106_v63  ;;  %2021 = vst [vmem:[#allocation17 + $0x18] sm:$0xff] %v2016_v59  ;;  %v2131_v29 = vpack.c.bf16 %v2016_v59, %v2015_v13  ;;  %v6334_v59 = vld [vmem:[%s6702_s11 + $0x28] sm:$0xff] }
 0x37f   :  { %v5211_v46 = vpop.eup %5210  ;;  %5220 = vrsqrt.f32 %v2108_v41  ;;  %v2107_v20 = vadd.f32 1e-06, %v2099_v7  ;;  %2027 = vst [vmem:[#allocation17 + $0x38] sm:$0xff] %v2018_v60  ;;  %v6339_v7 = vld [vmem:[%s6702_s11 + $0x30] sm:$0xff] }
 0x380   :  { %4897 = vmatprep.subr.bf16.mxu1 %v2131_v29  ;;  %v2017_v48 = vmul.f32 %v5211_v46, %v6174_v33  ;;  %v5213_v16 = vpop.eup %5212 }
 0x381   :  { %5222 = vrsqrt.f32 %v2107_v20  ;;  %4898 = vmatpush3.bf16.xpose.msra.mxu1 %v2131_v29  ;;  %v2120_v9 = vmul.f32 %v5213_v16, %v6196_v0  ;;  %v6347_v20 = vld [vmem:[%s6702_s11 + $0x38] sm:$0xff] }
 0x382   :  { %2026 = vst [vmem:[#allocation17 + $0x30] sm:$0xff] %v2017_v48  ;;  %v2132_v35 = vpack.c.bf16 %v2018_v60, %v2017_v48 }
 0x383   :  { %v5215_v45 = vpop.eup %5214 }
 0x384   :  { %4899 = vmatprep.subr.bf16.mxu1 %v2132_v35  ;;  %v2119_v58 = vmul.f32 %v5215_v45, %v6190_v19 }
 0x386   :  { %v2127_v49 = vpack.c.bf16 %v2120_v9, %v2119_v58 }
 0x387   :  { %v5217_v23 = vpop.eup %5216 }
 0x388   :  { %v5219_v39 = vpop.eup %5218  ;;  %4901 = vmatprep.mubr.bf16.mxu1 %v2127_v49  ;;  %v2121_v32 = vmul.f32 %v5217_v23, %v6213_v27 }
 0x389   :  { %v5221_v4 = vpop.eup %5220  ;;  %4900 = vmatpush3.bf16.xpose.msra.mxu1 %v2132_v35  ;;  %v2122_v25 = vmul.f32 %v5219_v39, %v6219_v2 }
 0x38a   :  { %4909 = vmatprep.subr.bf16.mxu1 %v6145_v24  ;;  %v2124_v55 = vmul.f32 %v5221_v4, %v6207_v12 }
 0x38b   :  { %v5223_v33 = vpop.eup %5222  ;;  %v2128_v19 = vpack.c.bf16 %v2122_v25, %v2121_v32 }
 0x38c   :  { %v2123_v40 = vmul.f32 %v5223_v33, %v6200_v22 }
 0x38e   :  { %v2129_v18 = vpack.c.bf16 %v2124_v55, %v2123_v40 }
 0x390   :  { %4902 = vmatmul.mubr.bf16.vlgmr.msra.gmra.mrb[24].mxu1 %v2128_v19 }
 0x391   :  { %4905 = vmatprep.mubr.bf16.mxu1 %v2129_v18  ;;  %4910 = vmatpush3.bf16.msra.mxu1 %v6145_v24 }
 0x392   :  { %4911 = vmatprep.subr.bf16.mxu1 %v6169_v26 }
 0x395   :  { %4912 = vmatpush3.bf16.msra.mxu1 %v6169_v26  ;;  %v1231_v26 = vld [vmem:[%s6702_s11] sm:$0xff] }
 0x3c7   :  { %v2092_v0 = vpop.xlane.xlu0 %2091 }
 0x3c8   :  { %v2101_v27 = vmul.f32 0.0078125, %v2092_v0 }
 0x3ca   :  { %v2109_v28 = vadd.f32 1e-06, %v2101_v27 }
 0x3cb   :  { %v2094_v42 = vpop.xlane.xlu1 %2093 }
 0x3cc   :  { %v2102_v38 = vmul.f32 0.0078125, %v2094_v42  ;;  %5224 = vrsqrt.f32 %v2109_v28 }
 0x3ce   :  { %v2110_v2 = vadd.f32 1e-06, %v2102_v38 }
 0x3d0   :  { %5226 = vrsqrt.f32 %v2110_v2 }
 0x3d6   :  { %v5225_v22 = vpop.eup %5224 }
 0x3d7   :  { %v2125_v43 = vmul.f32 %v5225_v22, %v6260_v30  ;;  %v1233_v30 = vld [vmem:[%s6702_s11 + $0x10] sm:$0xff] }
 0x3da   :  { %v5227_v12 = vpop.eup %5226 }
 0x3db   :  { %v2126_v11 = vmul.f32 %v5227_v12, %v6266_v21 }
 0x3dd   :  { %v2130_v36 = vpack.c.bf16 %v2126_v11, %v2125_v43 }
 0x3df   :  { %4906 = vmatmul.mubr.bf16.gmra.mrb[28].mxu1 %v2130_v36 }
 0x41e   :  { %v4879_v24 = vpop.f32.mrb[8].mxu0 }
 0x41f   :  { %v1434_v15 = vpop.f32.mrb[9].mxu0  ;;  %v1467_v34 = vmul.f32 0.088388346, %v4879_v24 }
 0x420   :  { %v1465_v37 = vmul.f32 0.088388346, %v1434_v15  ;;  %v4880_v51 = vpop.f32.mrb[10].mxu0 }
 0x421   :  { %v1437_v17 = vpop.f32.mrb[11].mxu0  ;;  %v1468_v21 = vmul.f32 0.088388346, %v4880_v51  ;;  %v6316_v61 = vadd.f32 %v1467_v34, %v1233_v30 }
 0x422   :  { %v1466_v5 = vmul.f32 0.088388346, %v1437_v17  ;;  %v6307_v3 = vadd.f32 %v1465_v37, %v1231_v26 }
 0x423   :  { %v6320_v54 = vadd.f32 %v1468_v21, %v1234_v50  ;;  %v1488_v52 = vsel %vm1481_vm0, %v6316_v61, -inf }
 0x424   :  { %v1482_v44 = vsel %vm1481_vm0, %v6307_v3, -inf  ;;  %v6314_v14 = vadd.f32 %v1466_v5, %v1232_v10 }
 0x425   :  { %1483 = vmax.xlane.f32.xlu0 %v1482_v44  ;;  %v1491_v47 = vsel %vm1481_vm0, %v6320_v54, -inf }
 0x426   :  { %v1485_v13 = vsel %vm1481_vm0, %v6314_v14, -inf }
 0x427   :  { %1486 = vmax.xlane.f32.xlu1 %v1485_v13 }
 0x429   :  { %1489 = vmax.xlane.f32.xlu0 %v1488_v52 }
 0x42b   :  { %1492 = vmax.xlane.f32.xlu1 %v1491_v47 }
 0x450   :  { %v4883_v63 = vpop.f32.mrb[12].mxu0 }
 0x451   :  { %v1450_v1 = vpop.f32.mrb[13].mxu0  ;;  %v1471_v41 = vmul.f32 0.088388346, %v4883_v63 }
 0x452   :  { %v1469_v62 = vmul.f32 0.088388346, %v1450_v1  ;;  %v4884_v6 = vpop.f32.mrb[14].mxu0 }
 0x453   :  { %v1453_v8 = vpop.f32.mrb[15].mxu0  ;;  %v1472_v60 = vmul.f32 0.088388346, %v4884_v6  ;;  %v6355_v35 = vadd.f32 %v1471_v41, %v6339_v7 }
 0x454   :  { %v1470_v29 = vmul.f32 0.088388346, %v1453_v8  ;;  %v6342_v46 = vadd.f32 %v1469_v62, %v6329_v31 }
 0x455   :  { %v6360_v58 = vadd.f32 %v1472_v60, %v6347_v20  ;;  %v1500_v9 = vsel %vm1481_vm0, %v6355_v35, -inf }
 0x456   :  { %v1494_v48 = vsel %vm1481_vm0, %v6342_v46, -inf  ;;  %v6352_v16 = vadd.f32 %v1470_v29, %v6334_v59 }
 0x457   :  { %1495 = vmax.xlane.f32.xlu0 %v1494_v48  ;;  %v1503_v49 = vsel %vm1481_vm0, %v6360_v58, -inf }
 0x458   :  { %v1497_v45 = vsel %vm1481_vm0, %v6352_v16, -inf }
 0x459   :  { %1498 = vmax.xlane.f32.xlu1 %v1497_v45 }
 0x45b   :  { %1501 = vmax.xlane.f32.xlu0 %v1500_v9 }
 0x45d   :  { %1504 = vmax.xlane.f32.xlu1 %v1503_v49 }
 0x463   :  { %v4903_v23 = vpop.f32.mrb[24].mxu1 }
 0x464   :  { %v2167_v39 = vpop.f32.mrb[25].mxu1  ;;  %v2200_v4 = vmul.f32 0.088388346, %v4903_v23 }
 0x465   :  { %v2198_v32 = vmul.f32 0.088388346, %v2167_v39  ;;  %v4904_v33 = vpop.f32.mrb[26].mxu1 }
 0x466   :  { %v2170_v25 = vpop.f32.mrb[27].mxu1  ;;  %v2201_v40 = vmul.f32 0.088388346, %v4904_v33  ;;  %v6372_v27 = vadd.f32 %v2200_v4, %v1233_v30 }
 0x467   :  { %v2199_v55 = vmul.f32 0.088388346, %v2170_v25  ;;  %v6366_v19 = vadd.f32 %v2198_v32, %v1231_v26 }
 0x468   :  { %v6376_v42 = vadd.f32 %v2201_v40, %v1234_v50  ;;  %v2220_v38 = vsel %vm1481_vm0, %v6372_v27, -inf }
 0x469   :  { %v2214_v18 = vsel %vm1481_vm0, %v6366_v19, -inf  ;;  %v6370_v0 = vadd.f32 %v2199_v55, %v1232_v10 }
 0x46a   :  { %2215 = vmax.xlane.f32.xlu0 %v2214_v18  ;;  %v2223_v2 = vsel %vm1481_vm0, %v6376_v42, -inf }
 0x46b   :  { %v2217_v28 = vsel %vm1481_vm0, %v6370_v0, -inf }
 0x46c   :  { %2218 = vmax.xlane.f32.xlu1 %v2217_v28 }
 0x46e   :  { %2221 = vmax.xlane.f32.xlu0 %v2220_v38 }
 0x470   :  { %2224 = vmax.xlane.f32.xlu1 %v2223_v2 }
 0x4b2   :  { %v4907_v22 = vpop.f32.mrb[28].mxu1  ;;  %v1484_v12 = vpop.xlane.xlu0 %1483 }
 0x4b3   :  { %v2183_v43 = vpop.f32.mrb[29].mxu1  ;;  %v1506_v36 = vsub.f32 %v6307_v3, %v1484_v12  ;;  %v2204_v47 = vmul.f32 0.088388346, %v4907_v22 }
 0x4b4   :  { %v4908_v11 = vpop.f32.mrb[30].mxu1  ;;  %v1487_v24 = vpop.xlane.xlu1 %1486  ;;  %v2202_v44 = vmul.f32 0.088388346, %v2183_v43 }
 0x4b5   :  { %v2186_v15 = vpop.f32.mrb[31].mxu1  ;;  %v1507_v34 = vsub.f32 %v6314_v14, %v1487_v24  ;;  %v1514_v51 = vmul.f32 1.442695, %v1506_v36  ;;  %v2205_v41 = vmul.f32 0.088388346, %v4908_v11  ;;  %v6411_v60 = vadd.f32 %v2204_v47, %v6339_v7 }
 0x4b6   :  { %v1490_v26 = vpop.xlane.xlu0 %1489  ;;  %v2203_v13 = vmul.f32 0.088388346, %v2186_v15  ;;  %v6401_v1 = vadd.f32 %v2202_v44, %v6329_v31 }
 0x4b7   :  { %v1508_v37 = vsub.f32 %v6316_v61, %v1490_v26  ;;  %v1516_v21 = vmul.f32 1.442695, %v1507_v34  ;;  %v6416_v29 = vadd.f32 %v2205_v41, %v6347_v20  ;;  %v2232_v48 = vsel %vm1481_vm0, %v6411_v60, -inf }
 0x4b8   :  { %v1493_v17 = vpop.xlane.xlu1 %1492  ;;  %v6406_v6 = vadd.f32 %v2203_v13, %v6334_v59  ;;  %v2226_v8 = vsel %vm1481_vm0, %v6401_v1, -inf }
 0x4b9   :  { %v1518_v10 = vmul.f32 1.442695, %v1508_v37  ;;  %v1509_v30 = vsub.f32 %v6320_v54, %v1493_v17  ;;  %v2235_v59 = vsel %vm1481_vm0, %v6416_v29, -inf }
 0x4ba   :  { %v2229_v31 = vsel %vm1481_vm0, %v6406_v6, -inf }
 0x4bb   :  { %5228 = vpow2.f32 %v1518_v10  ;;  %v1520_v5 = vmul.f32 1.442695, %v1509_v30 }
 0x4bc   :  { %5230 = vpow2.f32 %v1514_v51 }
 0x4bd   :  { %5232 = vpow2.f32 %v1520_v5 }
 0x4be   :  { %5234 = vpow2.f32 %v1516_v21 }
 0x4c5   :  { %v6386_v50 = vpop.eup %5228 }
 0x4c6   :  { %v6388_v3 = vpop.eup %5230  ;;  %v1536_v14 = vsel %vm1481_vm0, %v6386_v50, 0.0 }
 0x4c7   :  { %v6392_v61 = vpop.eup %5232  ;;  %1537 = vadd.xlane.f32.xlu0 %v1536_v14  ;;  %v1530_v63 = vsel %vm1481_vm0, %v6388_v3, 0.0 }
 0x4c8   :  { %v1539_v54 = vsel %vm1481_vm0, %v6392_v61, 0.0  ;;  %v6396_v52 = vpop.eup %5234 }
 0x4c9   :  { %1540 = vadd.xlane.f32.xlu1 %v1539_v54  ;;  %v1533_v62 = vsel %vm1481_vm0, %v6396_v52, 0.0 }
 0x4cb   :  { %1531 = vadd.xlane.f32.xlu0 %v1530_v63 }
 0x4cd   :  { %1534 = vadd.xlane.f32.xlu1 %v1533_v62 }
 0x4cf   :  { %2227 = vmax.xlane.f32.xlu0 %v2226_v8 }
 0x4d1   :  { %2230 = vmax.xlane.f32.xlu1 %v2229_v31 }
 0x4d3   :  { %2233 = vmax.xlane.f32.xlu0 %v2232_v48 }
 0x4d5   :  { %2236 = vmax.xlane.f32.xlu1 %v2235_v59 }
 0x4e4   :  { %v1496_v45 = vpop.xlane.xlu0 %1495 }
 0x4e5   :  { %v1510_v7 = vsub.f32 %v6342_v46, %v1496_v45 }
 0x4e6   :  { %v1499_v9 = vpop.xlane.xlu1 %1498 }
 0x4e7   :  { %v1522_v49 = vmul.f32 1.442695, %v1510_v7  ;;  %v1511_v23 = vsub.f32 %v6352_v16, %v1499_v9 }
 0x4e8   :  { %v1502_v39 = vpop.xlane.xlu0 %1501 }
 0x4e9   :  { %5236 = vpow2.f32 %v1522_v49  ;;  %v1524_v20 = vmul.f32 1.442695, %v1511_v23  ;;  %v1512_v4 = vsub.f32 %v6355_v35, %v1502_v39 }
 0x4ea   :  { %v1505_v32 = vpop.xlane.xlu1 %1504 }
 0x4eb   :  { %5238 = vpow2.f32 %v1524_v20  ;;  %v1526_v33 = vmul.f32 1.442695, %v1512_v4  ;;  %v1513_v25 = vsub.f32 %v6360_v58, %v1505_v32 }
 0x4ed   :  { %5240 = vpow2.f32 %v1526_v33  ;;  %v1528_v40 = vmul.f32 1.442695, %v1513_v25 }
 0x4ef   :  { %5242 = vpow2.f32 %v1528_v40 }
 0x4f3   :  { %v6426_v55 = vpop.eup %5236 }
 0x4f4   :  { %v1542_v46 = vsel %vm1481_vm0, %v6426_v55, 0.0 }
 0x4f5   :  { %v6430_v18 = vpop.eup %5238  ;;  %1543 = vadd.xlane.f32.xlu0 %v1542_v46 }
 0x4f6   :  { %v1545_v16 = vsel %vm1481_vm0, %v6430_v18, 0.0 }
 0x4f7   :  { %v6434_v35 = vpop.eup %5240  ;;  %1546 = vadd.xlane.f32.xlu1 %v1545_v16  ;;  %v2216_v28 = vpop.xlane.xlu0 %2215 }
 0x4f8   :  { %v2238_v58 = vsub.f32 %v6366_v19, %v2216_v28  ;;  %v1548_v38 = vsel %vm1481_vm0, %v6434_v35, 0.0 }
 0x4f9   :  { %v6439_v2 = vpop.eup %5242  ;;  %1549 = vadd.xlane.f32.xlu0 %v1548_v38  ;;  %v2219_v22 = vpop.xlane.xlu1 %2218 }
 0x4fa   :  { %v2246_v12 = vmul.f32 1.442695, %v2238_v58  ;;  %v2239_v43 = vsub.f32 %v6370_v0, %v2219_v22  ;;  %v1551_v11 = vsel %vm1481_vm0, %v6439_v2, 0.0 }
 0x4fb   :  { %1552 = vadd.xlane.f32.xlu1 %v1551_v11  ;;  %v2222_v36 = vpop.xlane.xlu0 %2221 }
 0x4fc   :  { %5244 = vpow2.f32 %v2246_v12  ;;  %v2248_v24 = vmul.f32 1.442695, %v2239_v43  ;;  %v2240_v15 = vsub.f32 %v6372_v27, %v2222_v36 }
 0x4fd   :  { %v2225_v19 = vpop.xlane.xlu1 %2224 }
 0x4fe   :  { %5246 = vpow2.f32 %v2248_v24  ;;  %v2250_v26 = vmul.f32 1.442695, %v2240_v15  ;;  %v2241_v34 = vsub.f32 %v6376_v42, %v2225_v19  ;;  %v4980_v24 = vld [vmem:[#allocation7] ss:$8 sps:$4 sm:$0xff]   ;;  %v4982_v15 = vld [vmem:[#allocation7 + $0x4] ss:$8 sps:$4 sm:$0xff]  }
 0x4ff   :  { %1751 = vmatprep.subr.bf16.mxu0 %v4982_v15  ;;  %v5015_v15 = vld [vmem:[#allocation7 + $0xb4] ss:$8 sps:$4 sm:$0xff]  }
 0x500   :  { %5248 = vpow2.f32 %v2250_v26  ;;  %v2252_v37 = vmul.f32 1.442695, %v2241_v34  ;;  %v4985_v26 = vld [vmem:[#allocation7 + $0x14] ss:$8 sps:$4 sm:$0xff]  }
 0x502   :  { %5250 = vpow2.f32 %v2252_v37 }
 0x506   :  { %v6446_v51 = vpop.eup %5244 }
 0x507   :  { %v2262_v0 = vsel %vm1481_vm0, %v6446_v51, 0.0 }
 0x508   :  { %v6450_v17 = vpop.eup %5246  ;;  %2263 = vadd.xlane.f32.xlu0 %v2262_v0 }
 0x509   :  { %v2265_v10 = vsel %vm1481_vm0, %v6450_v17, 0.0 }
 0x50a   :  { %v6454_v27 = vpop.eup %5248  ;;  %2266 = vadd.xlane.f32.xlu1 %v2265_v10 }
 0x50b   :  { %v2268_v42 = vsel %vm1481_vm0, %v6454_v27, 0.0 }
 0x50c   :  { %v6458_v30 = vpop.eup %5250  ;;  %2269 = vadd.xlane.f32.xlu0 %v2268_v42  ;;  %v4983_v42 = vld [vmem:[#allocation7 + $0x10] ss:$8 sps:$4 sm:$0xff]  }
 0x50d   :  { %v2271_v21 = vsel %vm1481_vm0, %v6458_v30, 0.0 }
 0x50e   :  { %2272 = vadd.xlane.f32.xlu1 %v2271_v21 }
 0x554   :  { %v1538_v5 = vpop.xlane.xlu0 %1537 }
 0x556   :  { %v1541_v44 = vpop.xlane.xlu1 %1540 }
 0x557   :  { %5252 = vrcp.f32 %v1541_v44  ;;  %v4986_v44 = vld [vmem:[#allocation7 + $0x20] ss:$8 sps:$4 sm:$0xff]  }
 0x558   :  { %v1532_v14 = vpop.xlane.xlu0 %1531 }
 0x559   :  { %5254 = vrcp.f32 %v1532_v14  ;;  %v4991_v14 = vld [vmem:[#allocation7 + $0x34] ss:$8 sps:$4 sm:$0xff]  }
 0x55a   :  { %5256 = vrcp.f32 %v1538_v5  ;;  %v1535_v13 = vpop.xlane.xlu1 %1534 }
 0x55b   :  { %5258 = vrcp.f32 %v1535_v13  ;;  %v4994_v13 = vld [vmem:[#allocation7 + $0x44] ss:$8 sps:$4 sm:$0xff]  }
 0x55c   :  { %v2228_v54 = vpop.xlane.xlu0 %2227 }
 0x55d   :  { %v2242_v47 = vsub.f32 %v6401_v1, %v2228_v54 }
 0x55e   :  { %v2231_v63 = vpop.xlane.xlu1 %2230 }
 0x55f   :  { %v2254_v41 = vmul.f32 1.442695, %v2242_v47  ;;  %v2243_v62 = vsub.f32 %v6406_v6, %v2231_v63  ;;  %v4992_v47 = vld [vmem:[#allocation7 + $0x40] ss:$8 sps:$4 sm:$0xff]  }
 0x560   :  { %v2234_v8 = vpop.xlane.xlu0 %2233 }
 0x561   :  { %5260 = vpow2.f32 %v2254_v41  ;;  %v2256_v31 = vmul.f32 1.442695, %v2243_v62  ;;  %v2244_v48 = vsub.f32 %v6411_v60, %v2234_v8  ;;  %v5253_v59 = vpop.eup %5252  ;;  %v4997_v41 = vld [vmem:[#allocation7 + $0x54] ss:$8 sps:$4 sm:$0xff]  }
 0x562   :  { %v2237_v45 = vpop.xlane.xlu1 %2236  ;;  %v1565_v1 = vmul.f32 %v5253_v59, %v6392_v61  ;;  %v4995_v59 = vld [vmem:[#allocation7 + $0x50] ss:$8 sps:$4 sm:$0xff]  }
 0x563   :  { %v5255_v7 = vpop.eup %5254  ;;  %5262 = vpow2.f32 %v2256_v31  ;;  %v2258_v9 = vmul.f32 1.442695, %v2244_v48  ;;  %v2245_v49 = vsub.f32 %v6416_v29, %v2237_v45 }
 0x564   :  { %v5257_v23 = vpop.eup %5256  ;;  %v1562_v6 = vmul.f32 %v5255_v7, %v6388_v3  ;;  %v5000_v7 = vld [vmem:[#allocation7 + $0x64] ss:$8 sps:$4 sm:$0xff]  }
 0x565   :  { %v5259_v39 = vpop.eup %5258  ;;  %5264 = vpow2.f32 %v2258_v9  ;;  %v2260_v20 = vmul.f32 1.442695, %v2245_v49  ;;  %v1564_v32 = vmul.f32 %v5257_v23, %v6386_v50 }
 0x566   :  { %v1563_v4 = vmul.f32 %v5259_v39, %v6396_v52  ;;  %v4998_v39 = vld [vmem:[#allocation7 + $0x60] ss:$8 sps:$4 sm:$0xff]  }
 0x567   :  { %5266 = vpow2.f32 %v2260_v20  ;;  %v1571_v33 = vpack.c.bf16 %v1565_v1, %v1564_v32  ;;  %v5641_v1 = vmov 0   ;;  %v5006_v20 = vld [vmem:[#allocation7 + $0x84] ss:$8 sps:$4 sm:$0xff]  }
 0x568   :  { %v1570_v60 = vpack.c.bf16 %v1563_v4, %v1562_v6 }
 0x56a   :  { %4889 = vmatprep.mubr.msk.bf16.mxu0 %vm1481_vm0, %v1570_v60 }
 0x56b   :  { %v6471_v25 = vpop.eup %5260  ;;  %4890 = vmatmul.mubr.msk.bf16.vlgmr.msra.gmra.mrb[16].mxu0 %vm1481_vm0, %v1571_v33 }
 0x56c   :  { %v2274_v61 = vsel %vm1481_vm0, %v6471_v25, 0.0  ;;  %1752 = vmatpush1.bf16.msra.mxu0 %v4980_v24  ;;  %v5007_v24 = vld [vmem:[#allocation7 + $0x90] ss:$8 sps:$4 sm:$0xff]  }
 0x56d   :  { %v6476_v29 = vpop.eup %5262  ;;  %2275 = vadd.xlane.f32.xlu0 %v2274_v61  ;;  %1753 = vmatprep.subr.bf16.mxu0 %v4985_v26  ;;  %v5018_v26 = vld [vmem:[#allocation7 + $0xc4] ss:$8 sps:$4 sm:$0xff]  }
 0x56e   :  { %v2277_v3 = vsel %vm1481_vm0, %v6476_v29, 0.0 }
 0x56f   :  { %v6480_v52 = vpop.eup %5264  ;;  %2278 = vadd.xlane.f32.xlu1 %v2277_v3 }
 0x570   :  { %v2280_v50 = vsel %vm1481_vm0, %v6480_v52, 0.0  ;;  %1754 = vmatpush1.bf16.msra.mxu0 %v4983_v42  ;;  %v5022_v42 = vld [vmem:[#allocation7 + $0xe0] ss:$8 sps:$4 sm:$0xff]  }
 0x571   :  { %v6484_v40 = vpop.eup %5266  ;;  %2281 = vadd.xlane.f32.xlu0 %v2280_v50 }
 0x572   :  { %v2283_v46 = vsel %vm1481_vm0, %v6484_v40, 0.0 }
 0x573   :  { %2284 = vadd.xlane.f32.xlu1 %v2283_v46 }
 0x582   :  { %v1544_v16 = vpop.xlane.xlu0 %1543 }
 0x583   :  { %5268 = vrcp.f32 %v1544_v16 }
 0x584   :  { %v1547_v28 = vpop.xlane.xlu1 %1546 }
 0x585   :  { %5270 = vrcp.f32 %v1547_v28 }
 0x586   :  { %v1550_v58 = vpop.xlane.xlu0 %1549 }
 0x587   :  { %5272 = vrcp.f32 %v1550_v58 }
 0x588   :  { %v1553_v38 = vpop.xlane.xlu1 %1552 }
 0x589   :  { %5274 = vrcp.f32 %v1553_v38 }
 0x58d   :  { %v5269_v22 = vpop.eup %5268 }
 0x58e   :  { %v1566_v43 = vmul.f32 %v5269_v22, %v6426_v55 }
 0x58f   :  { %v5271_v12 = vpop.eup %5270 }
 0x590   :  { %v1567_v11 = vmul.f32 %v5271_v12, %v6430_v18  ;;  %v4988_v18 = vld [vmem:[#allocation7 + $0x24] ss:$8 sps:$4 sm:$0xff]  }
 0x591   :  { %v5273_v36 = vpop.eup %5272  ;;  %1755 = vmatprep.subr.bf16.mxu0 %v4988_v18  ;;  %v5025_v18 = vld [vmem:[#allocation7 + $0xf0] ss:$8 sps:$4 sm:$0xff]  }
 0x592   :  { %v1572_v19 = vpack.c.bf16 %v1567_v11, %v1566_v43  ;;  %v1568_v37 = vmul.f32 %v5273_v36, %v6434_v35  ;;  %1756 = vmatpush1.bf16.msra.mxu0 %v4986_v44 }
 0x593   :  { %v5275_v34 = vpop.eup %5274  ;;  %1757 = vmatprep.subr.bf16.mxu0 %v4991_v14 }
 0x594   :  { %4893 = vmatprep.mubr.msk.bf16.mxu0 %vm1481_vm0, %v1572_v19  ;;  %v1569_v0 = vmul.f32 %v5275_v34, %v6439_v2  ;;  %v4989_v2 = vld [vmem:[#allocation7 + $0x30] ss:$8 sps:$4 sm:$0xff]   ;;  %v5016_v34 = vld [vmem:[#allocation7 + $0xc0] ss:$8 sps:$4 sm:$0xff]  }
 0x595   :  { %v2264_v10 = vpop.xlane.xlu0 %2263  ;;  %v5013_v19 = vld [vmem:[#allocation7 + $0xb0] ss:$8 sps:$4 sm:$0xff]  }
 0x596   :  { %5276 = vrcp.f32 %v2264_v10  ;;  %v1573_v55 = vpack.c.bf16 %v1569_v0, %v1568_v37  ;;  %1758 = vmatpush1.bf16.msra.mxu0 %v4989_v2  ;;  %v5021_v37 = vld [vmem:[#allocation7 + $0xd4] ss:$8 sps:$4 sm:$0xff]   ;;  %v5019_v0 = vld [vmem:[#allocation7 + $0xd0] ss:$8 sps:$4 sm:$0xff]   ;;  %v5024_v10 = vld [vmem:[#allocation7 + $0xe4] ss:$8 sps:$4 sm:$0xff]  }
 0x597   :  { %v2267_v21 = vpop.xlane.xlu1 %2266  ;;  %1759 = vmatprep.subr.bf16.mxu0 %v4994_v13  ;;  %v5028_v13 = vld [vmem:[#allocation7 + $0x100] ss:$8 sps:$4 sm:$0xff]  }
 0x598   :  { %4894 = vmatmul.mubr.msk.bf16.gmra.mrb[20].mxu0 %vm1481_vm0, %v1573_v55  ;;  %5278 = vrcp.f32 %v2267_v21  ;;  %v5027_v55 = vld [vmem:[#allocation7 + $0xf4] ss:$8 sps:$4 sm:$0xff]   ;;  %v5030_v21 = vld [vmem:[#allocation7 + $0x104] ss:$8 sps:$4 sm:$0xff]  }
 0x599   :  { %v2270_v5 = vpop.xlane.xlu0 %2269  ;;  %1783 = vmatprep.mubr.bf16.mxu0 %v5641_v1 }
 0x59a   :  { %5280 = vrcp.f32 %v2270_v5  ;;  %1760 = vmatpush1.bf16.msra.mxu0 %v4992_v47  ;;  %v5033_v47 = vld [vmem:[#allocation7 + $0x114] ss:$8 sps:$4 sm:$0xff]  }
 0x59b   :  { %v2273_v35 = vpop.xlane.xlu1 %2272  ;;  %1761 = vmatprep.subr.bf16.mxu0 %v4997_v41  ;;  %v5036_v41 = vld [vmem:[#allocation7 + $0x124] ss:$8 sps:$4 sm:$0xff]  }
 0x59c   :  { %5282 = vrcp.f32 %v2273_v35 }
 0x59e   :  { %1762 = vmatpush1.bf16.msra.mxu0 %v4995_v59 }
 0x59f   :  { %1763 = vmatprep.subr.bf16.mxu0 %v5000_v7 }
 0x5a0   :  { %v5277_v54 = vpop.eup %5276 }
 0x5a1   :  { %v2294_v62 = vmul.f32 %v5277_v54, %v6446_v51  ;;  %v5003_v51 = vld [vmem:[#allocation7 + $0x74] ss:$8 sps:$4 sm:$0xff]  }
 0x5a2   :  { %v5279_v63 = vpop.eup %5278  ;;  %1764 = vmatpush1.bf16.msra.mxu0 %v4998_v39 }
 0x5a3   :  { %v2295_v8 = vmul.f32 %v5279_v63, %v6450_v17  ;;  %v5001_v17 = vld [vmem:[#allocation7 + $0x70] ss:$8 sps:$4 sm:$0xff]   ;;  %1765 = vmatprep.subr.bf16.mxu0 %v5003_v51 }
 0x5a4   :  { %v5281_v31 = vpop.eup %5280  ;;  %v5031_v63 = vld [vmem:[#allocation7 + $0x110] ss:$8 sps:$4 sm:$0xff]  }
 0x5a5   :  { %v2302_v48 = vpack.c.bf16 %v2295_v8, %v2294_v62  ;;  %v2296_v9 = vmul.f32 %v5281_v31, %v6454_v27  ;;  %v5034_v62 = vld [vmem:[#allocation7 + $0x120] ss:$8 sps:$4 sm:$0xff]   ;;  %v5039_v8 = vld [vmem:[#allocation7 + $0x134] ss:$8 sps:$4 sm:$0xff]   ;;  %v5037_v31 = vld [vmem:[#allocation7 + $0x130] ss:$8 sps:$4 sm:$0xff]  }
 0x5a6   :  { %v5283_v45 = vpop.eup %5282  ;;  %1766 = vmatpush1.bf16.msra.mxu0 %v5001_v17  ;;  %v5043_v17 = vld [vmem:[#allocation7 + $0x150] ss:$8 sps:$4 sm:$0xff]  }
 0x5a7   :  { %v2297_v49 = vmul.f32 %v5283_v45, %v6458_v30  ;;  %4913 = vmatprep.mubr.msk.bf16.mxu1 %vm1481_vm0, %v2302_v48  ;;  %1910 = vmatprep.subr.bf16.mxu0 %v5006_v20  ;;  %v5042_v48 = vld [vmem:[#allocation7 + $0x144] ss:$8 sps:$4 sm:$0xff]   ;;  %v5040_v45 = vld [vmem:[#allocation7 + $0x140] ss:$8 sps:$4 sm:$0xff]  }
 0x5a8   :  { %v5048_v20 = vld [vmem:[#allocation7 + $0x164] ss:$8 sps:$4 sm:$0xff]  }
 0x5a9   :  { %v2303_v23 = vpack.c.bf16 %v2297_v49, %v2296_v9  ;;  %v5045_v9 = vld [vmem:[#allocation7 + $0x154] ss:$8 sps:$4 sm:$0xff]  }
 0x5ab   :  { %4914 = vmatmul.mubr.msk.bf16.vlgmr.msra.gmra.mrb[32].mxu1 %vm1481_vm0, %v2303_v23 }
 0x5fa   :  { %v2276_v27 = vpop.xlane.xlu0 %2275 }
 0x5fb   :  { %5284 = vrcp.f32 %v2276_v27  ;;  %v5046_v27 = vld [vmem:[#allocation7 + $0x160] ss:$8 sps:$4 sm:$0xff]  }
 0x5fc   :  { %v2279_v30 = vpop.xlane.xlu1 %2278 }
 0x5fd   :  { %5286 = vrcp.f32 %v2279_v30  ;;  %v5051_v30 = vld [vmem:[#allocation7 + $0x174] ss:$8 sps:$4 sm:$0xff]  }
 0x5fe   :  { %v2282_v6 = vpop.xlane.xlu0 %2281 }
 0x5ff   :  { %5288 = vrcp.f32 %v2282_v6  ;;  %v5049_v6 = vld [vmem:[#allocation7 + $0x170] ss:$8 sps:$4 sm:$0xff]  }
 0x600   :  { %v2285_v4 = vpop.xlane.xlu1 %2284 }
 0x601   :  { %5290 = vrcp.f32 %v2285_v4  ;;  %v5054_v4 = vld [vmem:[#allocation7 + $0x184] ss:$8 sps:$4 sm:$0xff]  }
 0x605   :  { %v5285_v32 = vpop.eup %5284 }
 0x606   :  { %v2298_v33 = vmul.f32 %v5285_v32, %v6471_v25  ;;  %v5004_v25 = vld [vmem:[#allocation7 + $0x80] ss:$8 sps:$4 sm:$0xff]  }
 0x607   :  { %v5287_v60 = vpop.eup %5286  ;;  %v5052_v32 = vld [vmem:[#allocation7 + $0x180] ss:$8 sps:$4 sm:$0xff]  }
 0x608   :  { %v2299_v61 = vmul.f32 %v5287_v60, %v6476_v29  ;;  %v5009_v29 = vld [vmem:[#allocation7 + $0x94] ss:$8 sps:$4 sm:$0xff]  }
 0x609   :  { %v5289_v3 = vpop.eup %5288  ;;  %v5057_v60 = vld [vmem:[#allocation7 + $0x194] ss:$8 sps:$4 sm:$0xff]  }
 0x60a   :  { %v2304_v50 = vpack.c.bf16 %v2299_v61, %v2298_v33  ;;  %v2300_v16 = vmul.f32 %v5289_v3, %v6480_v52  ;;  %v5012_v52 = vld [vmem:[#allocation7 + $0xa4] ss:$8 sps:$4 sm:$0xff]   ;;  %v5055_v33 = vld [vmem:[#allocation7 + $0x190] ss:$8 sps:$4 sm:$0xff]   ;;  %v5058_v3 = vld [vmem:[#allocation7 + $0x1a0] ss:$8 sps:$4 sm:$0xff]  }
 0x60b   :  { %v5291_v46 = vpop.eup %5290  ;;  %v5060_v61 = vld [vmem:[#allocation7 + $0x1a4] ss:$8 sps:$4 sm:$0xff]  }
 0x60c   :  { %4917 = vmatprep.mubr.msk.bf16.mxu1 %vm1481_vm0, %v2304_v50  ;;  %v2301_v28 = vmul.f32 %v5291_v46, %v6484_v40  ;;  %v5010_v40 = vld [vmem:[#allocation7 + $0xa0] ss:$8 sps:$4 sm:$0xff]   ;;  %v5063_v50 = vld [vmem:[#allocation7 + $0x1b4] ss:$8 sps:$4 sm:$0xff]   ;;  %v5061_v46 = vld [vmem:[#allocation7 + $0x1b0] ss:$8 sps:$4 sm:$0xff]  }
 0x60e   :  { %v2305_v58 = vpack.c.bf16 %v2301_v28, %v2300_v16  ;;  %v5066_v16 = vld [vmem:[#allocation7 + $0x1c4] ss:$8 sps:$4 sm:$0xff]   ;;  %v5064_v28 = vld [vmem:[#allocation7 + $0x1c0] ss:$8 sps:$4 sm:$0xff]  }
 0x610   :  { %4918 = vmatmul.mubr.msk.bf16.gmra.mrb[36].mxu1 %vm1481_vm0, %v2305_v58  ;;  %v5069_v58 = vld [vmem:[#allocation7 + $0x1d4] ss:$8 sps:$4 sm:$0xff]  }
 0x63e   :  { %v4891_v38 = vpop.f32.mrb[16].mxu0 }
 0x63f   :  { %v1622_v22 = vpop.f32.mrb[17].mxu0 }
 0x640   :  { %v4892_v12 = vpop.f32.mrb[18].mxu0 }
 0x641   :  { %v1654_v43 = vpack.c.bf16 %v4892_v12, %v4891_v38  ;;  %v1625_v11 = vpop.f32.mrb[19].mxu0  ;;  %v5067_v38 = vld [vmem:[#allocation7 + $0x1d0] ss:$8 sps:$4 sm:$0xff]   ;;  %v5070_v12 = vld [vmem:[#allocation7 + $0x1e0] ss:$8 sps:$4 sm:$0xff]  }
 0x642   :  { %v1653_v36 = vpack.c.bf16 %v1625_v11, %v1622_v22  ;;  %v5072_v22 = vld [vmem:[#allocation7 + $0x1e4] ss:$8 sps:$4 sm:$0xff]   ;;  %v5073_v11 = vld [vmem:[#allocation7 + $0x1f0] ss:$8 sps:$4 sm:$0xff]  }
 0x644   :  { %1784 = vmatmul.mubr.bf16.vlgmr.msra.gmra.mrb[24].mxu0 %v1653_v36 }
 0x645   :  { %1793 = vmatprep.mubr.bf16.mxu0 %v5641_v1  ;;  %1911 = vmatpush1.bf16.msra.mxu0 %v5004_v25 }
 0x646   :  { %1912 = vmatprep.subr.bf16.mxu0 %v5009_v29 }
 0x649   :  { %1913 = vmatpush1.bf16.msra.mxu0 %v5007_v24 }
 0x64a   :  { %1914 = vmatprep.subr.bf16.mxu0 %v5012_v52 }
 0x64c   :  { %1794 = vmatmul.mubr.bf16.gmra.mrb[28].mxu0 %v1654_v43  ;;  %v5075_v43 = vld [vmem:[#allocation7 + $0x1f4] ss:$8 sps:$4 sm:$0xff]  }
 0x64d   :  { %1915 = vmatpush1.bf16.msra.mxu0 %v5010_v40  ;;  %1942 = vmatprep.mubr.bf16.mxu0 %v5641_v1 }
 0x64e   :  { %1916 = vmatprep.subr.bf16.mxu0 %v5015_v15  ;;  %v2767_v15 = vld [vmem:[#allocation8] sm:$0xff] }
 0x651   :  { %1917 = vmatpush1.bf16.msra.mxu0 %v5013_v19  ;;  %v2771_v19 = vld [vmem:[#allocation8 + $0x20] sm:$0xff] }
 0x652   :  { %1918 = vmatprep.subr.bf16.mxu0 %v5018_v26  ;;  %v2769_v26 = vld [vmem:[#allocation8 + $0x10] sm:$0xff] }
 0x655   :  { %1919 = vmatpush1.bf16.msra.mxu0 %v5016_v34  ;;  %v4641_v34 = vcombine.low %v2767_v15, %v2771_v19 }
 0x656   :  { %1920 = vmatprep.subr.bf16.mxu0 %v5021_v37  ;;  %v4642_v37 = vcombine.high %v2767_v15, %v2771_v19  ;;  %v2831_v19 = vld [vmem:[#allocation8 + $0x200] sm:$0xff] }
 0x658   :  { %3535 = vmatprep.subr.bf16.mxu1 %v4642_v37  ;;  %v2837_v37 = vld [vmem:[#allocation8 + $0x230] sm:$0xff] }
 0x659   :  { %1921 = vmatpush1.bf16.msra.mxu0 %v5019_v0  ;;  %v2773_v0 = vld [vmem:[#allocation8 + $0x30] sm:$0xff]  ;;  %3536 = vmatpush1.bf16.msra.mxu1 %v4641_v34 }
 0x65a   :  { %1922 = vmatprep.subr.bf16.mxu0 %v5024_v10  ;;  %v2775_v10 = vld [vmem:[#allocation8 + $0x40] sm:$0xff]  ;;  %v2833_v34 = vld [vmem:[#allocation8 + $0x210] sm:$0xff] }
 0x65d   :  { %1923 = vmatpush1.bf16.msra.mxu0 %v5022_v42  ;;  %v2779_v42 = vld [vmem:[#allocation8 + $0x60] sm:$0xff] }
 0x65e   :  { %1924 = vmatprep.subr.bf16.mxu0 %v5027_v55  ;;  %v4645_v55 = vcombine.low %v2769_v26, %v2773_v0 }
 0x661   :  { %1925 = vmatpush1.bf16.msra.mxu0 %v5025_v18  ;;  %v4646_v18 = vcombine.high %v2769_v26, %v2773_v0  ;;  %v2835_v26 = vld [vmem:[#allocation8 + $0x220] sm:$0xff] }
 0x662   :  { %2483 = vmatprep.subr.bf16.mxu0 %v5030_v21  ;;  %v4650_v21 = vcombine.high %v2775_v10, %v2779_v42 }
 0x664   :  { %3537 = vmatprep.subr.bf16.mxu1 %v4650_v21  ;;  %v2843_v21 = vld [vmem:[#allocation8 + $0x260] sm:$0xff] }
 0x66b   :  { %v4895_v5 = vpop.f32.mrb[20].mxu0 }
 0x66c   :  { %v1638_v44 = vpop.f32.mrb[21].mxu0 }
 0x66d   :  { %v4896_v14 = vpop.f32.mrb[22].mxu0 }
 0x66e   :  { %v1813_v35 = vpack.c.bf16 %v4896_v14, %v4895_v5  ;;  %v1641_v2 = vpop.f32.mrb[23].mxu0  ;;  %v2777_v5 = vld [vmem:[#allocation8 + $0x50] sm:$0xff]  ;;  %v2783_v14 = vld [vmem:[#allocation8 + $0x80] sm:$0xff] }
 0x66f   :  { %v1812_v54 = vpack.c.bf16 %v1641_v2, %v1638_v44  ;;  %v2781_v44 = vld [vmem:[#allocation8 + $0x70] sm:$0xff]  ;;  %v2787_v2 = vld [vmem:[#allocation8 + $0xa0] sm:$0xff] }
 0x671   :  { %1943 = vmatmul.mubr.bf16.vlgmr.msra.gmra.mrb[24].mxu0 %v1812_v54  ;;  %v4649_v54 = vcombine.low %v2775_v10, %v2779_v42  ;;  %v4706_v42 = vcombine.high %v2831_v19, %v2835_v26 }
 0x672   :  { %2484 = vmatpush1.bf16.msra.mxu0 %v5028_v13  ;;  %1952 = vmatprep.mubr.bf16.mxu0 %v5641_v1  ;;  %v2785_v13 = vld [vmem:[#allocation8 + $0x90] sm:$0xff] }
 0x673   :  { %2485 = vmatprep.subr.bf16.mxu0 %v5033_v47  ;;  %v4653_v47 = vcombine.low %v2777_v5, %v2781_v44  ;;  %3538 = vmatpush1.bf16.msra.mxu1 %v4649_v54  ;;  %v2851_v54 = vld [vmem:[#allocation8 + $0x2a0] sm:$0xff] }
 0x676   :  { %2486 = vmatpush1.bf16.msra.mxu0 %v5031_v63  ;;  %v4658_v63 = vcombine.high %v2783_v14, %v2787_v2 }
 0x677   :  { %2487 = vmatprep.subr.bf16.mxu0 %v5036_v41 }
 0x678   :  { %3539 = vmatprep.subr.bf16.mxu1 %v4658_v63 }
 0x679   :  { %1953 = vmatmul.mubr.bf16.gmra.mrb[28].mxu0 %v1813_v35  ;;  %v4654_v35 = vcombine.high %v2777_v5, %v2781_v44  ;;  %v2841_v5 = vld [vmem:[#allocation8 + $0x250] sm:$0xff] }
 0x67a   :  { %2488 = vmatpush1.bf16.msra.mxu0 %v5034_v62  ;;  %2515 = vmatprep.mubr.bf16.mxu0 %v5641_v1  ;;  %v2791_v62 = vld [vmem:[#allocation8 + $0xc0] sm:$0xff]  ;;  %v2845_v44 = vld [vmem:[#allocation8 + $0x270] sm:$0xff] }
 0x67b   :  { %2489 = vmatprep.subr.bf16.mxu0 %v5039_v8  ;;  %v2795_v8 = vld [vmem:[#allocation8 + $0xe0] sm:$0xff]  ;;  %v4717_v63 = vcombine.low %v2841_v5, %v2845_v44 }
 0x67e   :  { %2490 = vmatpush1.bf16.msra.mxu0 %v5037_v31  ;;  %v4915_v59 = vpop.f32.mrb[32].mxu1  ;;  %v2793_v31 = vld [vmem:[#allocation8 + $0xd0] sm:$0xff] }
 0x67f   :  { %v2354_v7 = vpop.f32.mrb[33].mxu1  ;;  %2491 = vmatprep.subr.bf16.mxu0 %v5042_v48  ;;  %v2797_v48 = vld [vmem:[#allocation8 + $0xf0] sm:$0xff] }
 0x680   :  { %v4916_v49 = vpop.f32.mrb[34].mxu1 }
 0x681   :  { %v2386_v23 = vpack.c.bf16 %v4916_v49, %v4915_v59  ;;  %v2357_v39 = vpop.f32.mrb[35].mxu1  ;;  %v4657_v59 = vcombine.low %v2783_v14, %v2787_v2  ;;  %v2799_v49 = vld [vmem:[#allocation8 + $0x100] sm:$0xff]  ;;  %v4705_v14 = vcombine.low %v2831_v19, %v2835_v26 }
 0x682   :  { %2492 = vmatpush1.bf16.msra.mxu0 %v5040_v45  ;;  %v2385_v51 = vpack.c.bf16 %v2357_v39, %v2354_v7  ;;  %v4666_v7 = vcombine.high %v2791_v62, %v2795_v8  ;;  %v2801_v39 = vld [vmem:[#allocation8 + $0x110] sm:$0xff]  ;;  %v2855_v26 = vld [vmem:[#allocation8 + $0x2c0] sm:$0xff] }
 0x683   :  { %2493 = vmatprep.subr.bf16.mxu0 %v5045_v9  ;;  %v4670_v9 = vcombine.high %v2793_v31, %v2797_v48  ;;  %3540 = vmatpush1.bf16.msra.mxu1 %v4657_v59 }
 0x684   :  { %3541 = vmatprep.subr.bf16.mxu1 %v4666_v7 }
 0x686   :  { %2494 = vmatpush1.bf16.msra.mxu0 %v5043_v17  ;;  %v4665_v17 = vcombine.low %v2791_v62, %v2795_v8 }
 0x687   :  { %2495 = vmatprep.subr.bf16.mxu0 %v5048_v20  ;;  %v4669_v20 = vcombine.low %v2793_v31, %v2797_v48  ;;  %v5364_v31 = vld [vmem:[%s6691_s0] sm:$0xff] }
 0x688   :  { %3542 = vmatpush1.bf16.msra.mxu1 %v4665_v17  ;;  %v5367_v17 = vld [vmem:[%s6691_s0 + $0x18] sm:$0xff] }
 0x68a   :  { %2496 = vmatpush1.bf16.msra.mxu0 %v5046_v27 }
 0x68b   :  { %2497 = vmatprep.subr.bf16.mxu0 %v5051_v30 }
 0x68e   :  { %2498 = vmatpush1.bf16.msra.mxu0 %v5049_v6  ;;  %v2807_v6 = vld [vmem:[#allocation8 + $0x140] sm:$0xff] }
 0x68f   :  { %2642 = vmatprep.subr.bf16.mxu0 %v5054_v4  ;;  %v2811_v4 = vld [vmem:[#allocation8 + $0x160] sm:$0xff] }
 0x691   :  { %2516 = vmatmul.mubr.bf16.vlgmr.msra.gmra.mrb[24].mxu0 %v2385_v51  ;;  %v2805_v51 = vld [vmem:[#allocation8 + $0x130] sm:$0xff] }
 0x692   :  { %2525 = vmatprep.mubr.bf16.mxu0 %v5641_v1  ;;  %2643 = vmatpush1.bf16.msra.mxu0 %v5052_v32  ;;  %v4678_v30 = vcombine.high %v2801_v39, %v2805_v51  ;;  %v2809_v32 = vld [vmem:[#allocation8 + $0x150] sm:$0xff] }
 0x693   :  { %2644 = vmatprep.subr.bf16.mxu0 %v5057_v60  ;;  %v2813_v60 = vld [vmem:[#allocation8 + $0x170] sm:$0xff] }
 0x696   :  { %2645 = vmatpush1.bf16.msra.mxu0 %v5055_v33 }
 0x697   :  { %2646 = vmatprep.subr.bf16.mxu0 %v5060_v61  ;;  %v4677_v61 = vcombine.low %v2801_v39, %v2805_v51 }
 0x699   :  { %2526 = vmatmul.mubr.bf16.gmra.mrb[28].mxu0 %v2386_v23  ;;  %v2803_v23 = vld [vmem:[#allocation8 + $0x120] sm:$0xff] }
 0x69a   :  { %2647 = vmatpush1.bf16.msra.mxu0 %v5058_v3  ;;  %2674 = vmatprep.mubr.bf16.mxu0 %v5641_v1  ;;  %v4674_v27 = vcombine.high %v2799_v49, %v2803_v23  ;;  %v4673_v33 = vcombine.low %v2799_v49, %v2803_v23  ;;  %v4682_v3 = vcombine.high %v2807_v6, %v2811_v4  ;;  %v5366_v49 = vld [vmem:[%s6691_s0 + $0x10] sm:$0xff] }
 0x69b   :  { %2648 = vmatprep.subr.bf16.mxu0 %v5063_v50  ;;  %v4686_v50 = vcombine.high %v2809_v32, %v2813_v60 }
 0x69c   :  { %3543 = vmatprep.subr.bf16.mxu1 %v4674_v27 }
 0x69d   :  { %3544 = vmatpush1.bf16.msra.mxu1 %v4673_v33  ;;  %v5368_v33 = vld [vmem:[%s6691_s0 + $0x20] sm:$0xff] }
 0x69e   :  { %2649 = vmatpush1.bf16.msra.mxu0 %v5061_v46  ;;  %v2815_v46 = vld [vmem:[#allocation8 + $0x180] sm:$0xff]  ;;  %3545 = vmatprep.subr.bf16.mxu1 %v4682_v3 }
 0x69f   :  { %2650 = vmatprep.subr.bf16.mxu0 %v5066_v16  ;;  %v2819_v16 = vld [vmem:[#allocation8 + $0x1a0] sm:$0xff] }
 0x6a2   :  { %2651 = vmatpush1.bf16.msra.mxu0 %v5064_v28  ;;  %v2817_v28 = vld [vmem:[#allocation8 + $0x190] sm:$0xff] }
 0x6a3   :  { %2652 = vmatprep.subr.bf16.mxu0 %v5069_v58  ;;  %v2821_v58 = vld [vmem:[#allocation8 + $0x1b0] sm:$0xff] }
 0x6a6   :  { %2653 = vmatpush1.bf16.msra.mxu0 %v5067_v38  ;;  %v4681_v38 = vcombine.low %v2807_v6, %v2811_v4 }
 0x6a7   :  { %2654 = vmatprep.subr.bf16.mxu0 %v5072_v22  ;;  %v4685_v22 = vcombine.low %v2809_v32, %v2813_v60 }
 0x6a8   :  { %3546 = vmatpush1.bf16.msra.mxu1 %v4681_v38 }
 0x6aa   :  { %2655 = vmatpush1.bf16.msra.mxu0 %v5070_v12  ;;  %v4690_v12 = vcombine.high %v2815_v46, %v2819_v16 }
 0x6ab   :  { %2656 = vmatprep.subr.bf16.mxu0 %v5075_v43  ;;  %v4694_v43 = vcombine.high %v2817_v28, %v2821_v58 }
 0x6ac   :  { %3547 = vmatprep.subr.bf16.mxu1 %v4690_v12  ;;  %v5371_v12 = vld [vmem:[%s6691_s0 + $0x38] sm:$0xff] }
 0x6ae   :  { %2657 = vmatpush1.bf16.msra.mxu0 %v5073_v11  ;;  %v2823_v11 = vld [vmem:[#allocation8 + $0x1c0] sm:$0xff] }
 0x6af   :  { %3641 = vmatprep.subr.bf16.mxu0 %v4646_v18  ;;  %v2839_v18 = vld [vmem:[#allocation8 + $0x240] sm:$0xff] }
 0x6b0   :  { %v4714_v2 = vcombine.high %v2839_v18, %v2843_v21 }
 0x6e3   :  { %v4919_v25 = vpop.f32.mrb[36].mxu1 }
 0x6e4   :  { %v2370_v36 = vpop.f32.mrb[37].mxu1 }
 0x6e5   :  { %v4920_v29 = vpop.f32.mrb[38].mxu1 }
 0x6e6   :  { %v2545_v24 = vpack.c.bf16 %v4920_v29, %v4919_v25  ;;  %v2373_v52 = vpop.f32.mrb[39].mxu1  ;;  %v2827_v25 = vld [vmem:[#allocation8 + $0x1e0] sm:$0xff]  ;;  %v2829_v29 = vld [vmem:[#allocation8 + $0x1f0] sm:$0xff] }
 0x6e7   :  { %v2544_v40 = vpack.c.bf16 %v2373_v52, %v2370_v36  ;;  %v2825_v36 = vld [vmem:[#allocation8 + $0x1d0] sm:$0xff]  ;;  %v4693_v52 = vcombine.low %v2817_v28, %v2821_v58  ;;  %v4697_v0 = vcombine.low %v2823_v11, %v2827_v25 }
 0x6e8   :  { %v4702_v15 = vcombine.high %v2825_v36, %v2829_v29  ;;  %v4701_v10 = vcombine.low %v2825_v36, %v2829_v29  ;;  %v5370_v28 = vld [vmem:[%s6691_s0 + $0x30] sm:$0xff] }
 0x6e9   :  { %2675 = vmatmul.mubr.bf16.vlgmr.msra.gmra.mrb[24].mxu0 %v2544_v40  ;;  %v4698_v40 = vcombine.high %v2823_v11, %v2827_v25 }
 0x6ea   :  { %2684 = vmatprep.mubr.bf16.mxu0 %v5641_v1  ;;  %v2789_v1 = vld [vmem:[#allocation8 + $0xb0] sm:$0xff]  ;;  %3642 = vmatpush1.bf16.msra.mxu0 %v4645_v55  ;;  %v4710_v55 = vcombine.high %v2833_v34, %v2837_v37 }
 0x6eb   :  { %3643 = vmatprep.subr.bf16.mxu0 %v4654_v35  ;;  %v4662_v41 = vcombine.high %v2785_v13, %v2789_v1  ;;  %v4661_v45 = vcombine.low %v2785_v13, %v2789_v1  ;;  %v4709_v35 = vcombine.low %v2833_v34, %v2837_v37  ;;  %v4718_v13 = vcombine.high %v2841_v5, %v2845_v44  ;;  %v2847_v1 = vld [vmem:[#allocation8 + $0x280] sm:$0xff] }
 0x6ec   :  { %v4721_v62 = vcombine.low %v2847_v1, %v2851_v54  ;;  %v2859_v34 = vld [vmem:[#allocation8 + $0x2e0] sm:$0xff] }
 0x6ed   :  { %v4730_v37 = vcombine.high %v2855_v26, %v2859_v34  ;;  %v2867_v5 = vld [vmem:[#allocation8 + $0x320] sm:$0xff] }
 0x6ee   :  { %3644 = vmatpush1.bf16.msra.mxu0 %v4653_v47  ;;  %v4713_v47 = vcombine.low %v2839_v18, %v2843_v21  ;;  %v2863_v21 = vld [vmem:[#allocation8 + $0x300] sm:$0xff] }
 0x6ef   :  { %3645 = vmatprep.subr.bf16.mxu0 %v4662_v41  ;;  %v4722_v41 = vcombine.high %v2847_v1, %v2851_v54  ;;  %v4738_v44 = vcombine.high %v2863_v21, %v2867_v5  ;;  %v2871_v54 = vld [vmem:[#allocation8 + $0x340] sm:$0xff] }
 0x6f1   :  { %2685 = vmatmul.mubr.bf16.gmra.mrb[28].mxu0 %v2545_v24  ;;  %v4689_v24 = vcombine.low %v2815_v46, %v2819_v16 }
 0x6f2   :  { %3646 = vmatpush1.bf16.msra.mxu0 %v4661_v45  ;;  %v5365_v45 = vld [vmem:[%s6691_s0 + $0x8] sm:$0xff] }
 0x6f3   :  { %3647 = vmatprep.subr.bf16.mxu0 %v4670_v9  ;;  %3548 = vmatpush1.bf16.msra.mxu1 %v4689_v24 }
 0x6f4   :  { %3549 = vmatprep.subr.bf16.mxu1 %v4698_v40  ;;  %v2853_v40 = vld [vmem:[#allocation8 + $0x2b0] sm:$0xff] }
 0x6f6   :  { %3648 = vmatpush1.bf16.msra.mxu0 %v4669_v20 }
 0x6f7   :  { %3649 = vmatprep.subr.bf16.mxu0 %v4678_v30  ;;  %3550 = vmatpush1.bf16.msra.mxu1 %v4697_v0  ;;  %v2857_v0 = vld [vmem:[#allocation8 + $0x2d0] sm:$0xff] }
 0x6f8   :  { %3551 = vmatprep.subr.bf16.mxu1 %v4706_v42  ;;  %v4729_v42 = vcombine.low %v2855_v26, %v2859_v34 }
 0x6fa   :  { %3650 = vmatpush1.bf16.msra.mxu0 %v4677_v61 }
 0x6fb   :  { %3651 = vmatprep.subr.bf16.mxu0 %v4686_v50  ;;  %3552 = vmatpush1.bf16.msra.mxu1 %v4705_v14  ;;  %v5369_v50 = vld [vmem:[%s6691_s0 + $0x28] sm:$0xff]  ;;  %v2865_v14 = vld [vmem:[#allocation8 + $0x310] sm:$0xff]  ;;  %s5642_s0 = smov [#allocation17]  }
 0x6fc   :  { %3553 = vmatprep.subr.bf16.mxu1 %v4714_v2  ;;  %v4737_v2 = vcombine.low %v2863_v21, %v2867_v5  ;;  %s4406_s1 = sshll.u32 %s5642_s0, 4  ;;  %s4407_s1 = int_to_ptr.vmem [resolvable:$true] %s4406_s1 }
 0x6fd   :  { %s5548_s3 = scalar_lea.vmem %s4407_s1, 1024  ;;  %p5553_p9 = scmp.lt.s32.totalorder %s4407_s1, %s4407_s1 }
 0x6fe   :  { %3652 = vmatpush1.bf16.msra.mxu0 %v4685_v22  ;;  %p5549_p8 = scmp.ne.s32.totalorder %s4407_s1, %s5548_s3  ;;  %p5554_p10 = scmp.lt.s32.totalorder %s5548_s3, %s5548_s3 }
 0x6ff   :  { %3653 = vmatprep.subr.bf16.mxu0 %v4694_v43  ;;  %3554 = vmatpush1.bf16.msra.mxu1 %v4713_v47  ;;  %v2875_v47 = vld [vmem:[#allocation8 + $0x360] sm:$0xff] }
 0x700   :  { %3555 = vmatprep.subr.bf16.mxu1 %v4722_v41  ;;  %v2873_v41 = vld [vmem:[#allocation8 + $0x350] sm:$0xff]  ;;  %p5555_p11 = por %p5554_p10, %p5553_p9 }
 0x702   :  { %3654 = vmatpush1.bf16.msra.mxu0 %v4693_v52  ;;  %v2849_v52 = vld [vmem:[#allocation8 + $0x290] sm:$0xff]  ;;  %p5556_p12 = pnand %p5555_p11, %p5549_p8 }
 0x703   :  { %3655 = vmatprep.subr.bf16.mxu0 %v4702_v15  ;;  %3556 = vmatpush1.bf16.msra.mxu1 %v4721_v62  ;;  %v4726_v15 = vcombine.high %v2849_v52, %v2853_v40  ;;  %v4725_v19 = vcombine.low %v2849_v52, %v2853_v40  ;;  %v2877_v62 = vld [vmem:[#allocation8 + $0x370] sm:$0xff] }
 0x704   :  { %3557 = vmatprep.subr.bf16.mxu1 %v4730_v37 }
 0x706   :  { %3656 = vmatpush1.bf16.msra.mxu0 %v4701_v10  ;;  %v2861_v10 = vld [vmem:[#allocation8 + $0x2f0] sm:$0xff] }
 0x707   :  { %3657 = vmatprep.subr.bf16.mxu0 %v4710_v55  ;;  %v4734_v55 = vcombine.high %v2857_v0, %v2861_v10  ;;  %v4733_v18 = vcombine.low %v2857_v0, %v2861_v10  ;;  %3558 = vmatpush1.bf16.msra.mxu1 %v4729_v42  ;;  %v2743_v0 = vld [vmem:[#allocation2] sm:$0x3] }
 0x708   :  { %3559 = vmatprep.subr.bf16.mxu1 %v4738_v44  ;;  %v2752_v21 = vrot.slane %v2743_v0, %v211_v56  ;;  %v2784_v56 = vld [vmem:[#allocation8 + $0x88] sm:$0xff] }
 0x70a   :  { %3658 = vmatpush1.bf16.msra.mxu0 %v4709_v35  ;;  %v2869_v35 = vld [vmem:[#allocation8 + $0x330] sm:$0xff] }
 0x70b   :  { %3659 = vmatprep.subr.bf16.mxu0 %v4718_v13  ;;  %v4742_v13 = vcombine.high %v2865_v14, %v2869_v35  ;;  %v4741_v1 = vcombine.low %v2865_v14, %v2869_v35  ;;  %3560 = vmatpush1.bf16.msra.mxu1 %v4737_v2 }
 0x70e   :  { %3660 = vmatpush1.bf16.msra.mxu0 %v4717_v63  ;;  %v4746_v63 = vcombine.high %v2871_v54, %v2875_v47 }
 0x70f   :  { %3661 = vmatprep.subr.bf16.mxu0 %v4726_v15 }
 0x710   :  { %3561 = vmatprep.subr.bf16.mxu1 %v4746_v63 }
 0x712   :  { %3662 = vmatpush1.bf16.msra.mxu0 %v4725_v19 }
 0x713   :  { %3663 = vmatprep.subr.bf16.mxu0 %v4734_v55 }
 0x716   :  { %3664 = vmatpush1.bf16.msra.mxu0 %v4733_v18  ;;  %v2748_v18 = vrot.slane %v2743_v0, %v207_v57 }
 0x717   :  { %3665 = vmatprep.subr.bf16.mxu0 %v4742_v13 }
 0x71a   :  { %3666 = vmatpush1.bf16.msra.mxu0 %v4741_v1 }
 0x7bc   :  { %v2676_v8 = vpop.f32.mrb[24].mxu0 }
 0x7bd   :  { %v6517_v48 = vadd.f32 %v5364_v31, %v2676_v8  ;;  %v2678_v59 = vpop.f32.mrb[25].mxu0  ;;  %v4745_v8 = vcombine.low %v2871_v54, %v2875_v47  ;;  %v4750_v31 = vcombine.high %v2873_v41, %v2877_v62  ;;  %v2776_v54 = vld [vmem:[#allocation8 + $0x48] sm:$0xff] }
 0x7be   :  { %v6522_v7 = vadd.f32 %v5365_v45, %v2678_v59  ;;  %v2680_v9 = vpop.f32.mrb[26].mxu0  ;;  %v4749_v59 = vcombine.low %v2873_v41, %v2877_v62  ;;  %v2879_v45 = vld [vmem:[#allocation8 + $0x380] sm:$0xff]  ;;  %v2780_v47 = vld [vmem:[#allocation8 + $0x68] sm:$0xff] }
 0x7bf   :  { %v6527_v23 = vadd.f32 %v5366_v49, %v2680_v9  ;;  %v2682_v39 = vpop.f32.mrb[27].mxu0  ;;  %v2703_v51 = vmul.f32 %v6517_v48, %v6517_v48  ;;  %3562 = vmatpush1.bf16.msra.mxu1 %v4745_v8  ;;  %3667 = vmatprep.subr.bf16.mxu0 %v4750_v31  ;;  %v2883_v9 = vld [vmem:[#allocation8 + $0x3a0] sm:$0xff]  ;;  %v4652_v57 = vcombine.high %v2776_v54, %v2780_v47  ;;  %v2788_v8 = vld [vmem:[#allocation8 + $0xa8] sm:$0xff] }
 0x7c0   :  { %v6534_v20 = vadd.f32 %v5367_v17, %v2682_v39  ;;  %v2704_v27 = vmul.f32 %v6522_v7, %v6522_v7  ;;  %3668 = vmatpush1.bf16.msra.mxu0 %v4749_v59  ;;  %v4754_v49 = vcombine.high %v2879_v45, %v2883_v9  ;;  %v2881_v39 = vld [vmem:[#allocation8 + $0x390] sm:$0xff]  ;;  %v4753_v17 = vcombine.low %v2879_v45, %v2883_v9 }
 0x7c1   :  { %v2705_v30 = vmul.f32 %v6527_v23, %v6527_v23  ;;  %v4651_v45 = vcombine.low %v2776_v54, %v2780_v47  ;;  %v2840_v54 = vld [vmem:[#allocation8 + $0x248] sm:$0xff] }
 0x7c2   :  { %v2711_v6 = vadd.f32 %v2704_v27, %v2703_v51  ;;  %v2706_v4 = vmul.f32 %v6534_v20, %v6534_v20  ;;  %v2885_v51 = vld [vmem:[#allocation8 + $0x3b0] sm:$0xff]  ;;  %3563 = vmatprep.subr.bf16.mxu1 %v4754_v49  ;;  %v2844_v47 = vld [vmem:[#allocation8 + $0x268] sm:$0xff] }
 0x7c3   :  { %v4758_v27 = vcombine.high %v2881_v39, %v2885_v51  ;;  %3564 = vmatpush1.bf16.msra.mxu1 %v4753_v17 }
 0x7c4   :  { %2712 = vadd.xlane.f32.xlu0 %v2711_v6  ;;  %v2686_v32 = vpop.f32.mrb[28].mxu0  ;;  %v2714_v60 = vadd.f32 %v2706_v4, %v2705_v30  ;;  %v4757_v30 = vcombine.low %v2881_v39, %v2885_v51  ;;  %v2887_v6 = vld [vmem:[#allocation8 + $0x3c0] sm:$0xff]  ;;  %v4660_v39 = vcombine.high %v2784_v56, %v2788_v8 }
 0x7c5   :  { %v6545_v61 = vadd.f32 %v5368_v33, %v2686_v32  ;;  %v2688_v3 = vpop.f32.mrb[29].mxu0  ;;  %3669 = vmatprep.subr.bf16.mxu0 %v4758_v27  ;;  %v2891_v4 = vld [vmem:[#allocation8 + $0x3e0] sm:$0xff]  ;;  %v2889_v32 = vld [vmem:[#allocation8 + $0x3d0] sm:$0xff] }
 0x7c6   :  { %v6550_v46 = vadd.f32 %v5369_v50, %v2688_v3  ;;  %2715 = vadd.xlane.f32.xlu1 %v2714_v60  ;;  %v2690_v16 = vpop.f32.mrb[30].mxu0  ;;  %3670 = vmatpush1.bf16.msra.mxu0 %v4757_v30  ;;  %v4761_v60 = vcombine.low %v2887_v6, %v2891_v4  ;;  %v4762_v33 = vcombine.high %v2887_v6, %v2891_v4  ;;  %v2893_v3 = vld [vmem:[#allocation8 + $0x3f0] sm:$0xff]  ;;  %v2792_v6 = vld [vmem:[#allocation8 + $0xc8] sm:$0xff] }
 0x7c7   :  { %v6555_v58 = vadd.f32 %v5370_v28, %v2690_v16  ;;  %v2692_v38 = vpop.f32.mrb[31].mxu0  ;;  %v2707_v22 = vmul.f32 %v6545_v61, %v6545_v61  ;;  %v4765_v50 = vcombine.low %v2889_v32, %v2893_v3  ;;  %v4766_v16 = vcombine.high %v2889_v32, %v2893_v3  ;;  %v2768_v28 = vld [vmem:[#allocation8 + $0x8] sm:$0xff] }
 0x7c8   :  { %v6562_v43 = vadd.f32 %v5371_v12, %v2692_v38  ;;  %v2708_v11 = vmul.f32 %v6550_v46, %v6550_v46  ;;  %3565 = vmatprep.subr.bf16.mxu1 %v4762_v33  ;;  %v2772_v38 = vld [vmem:[#allocation8 + $0x28] sm:$0xff] }
 0x7c9   :  { %v2709_v25 = vmul.f32 %v6555_v58, %v6555_v58  ;;  %3566 = vmatpush1.bf16.msra.mxu1 %v4761_v60  ;;  %3671 = vmatprep.subr.bf16.mxu0 %v4766_v16  ;;  %v4643_v12 = vcombine.low %v2768_v28, %v2772_v38  ;;  %v2796_v4 = vld [vmem:[#allocation8 + $0xe8] sm:$0xff]  ;;  %v4659_v60 = vcombine.low %v2784_v56, %v2788_v8 }
 0x7ca   :  { %v2717_v36 = vadd.f32 %v2708_v11, %v2707_v22  ;;  %v2710_v29 = vmul.f32 %v6562_v43, %v6562_v43  ;;  %3672 = vmatpush1.bf16.msra.mxu0 %v4765_v50  ;;  %v4644_v22 = vcombine.high %v2768_v28, %v2772_v38  ;;  %v4668_v3 = vcombine.high %v2792_v6, %v2796_v4  ;;  %v2800_v50 = vld [vmem:[#allocation8 + $0x108] sm:$0xff] }
 0x7cb   :  { %v2804_v16 = vld [vmem:[#allocation8 + $0x128] sm:$0xff]  ;;  %v4716_v56 = vcombine.high %v2840_v54, %v2844_v47 }
 0x7cc   :  { %2718 = vadd.xlane.f32.xlu0 %v2717_v36  ;;  %v2720_v24 = vadd.f32 %v2710_v29, %v2709_v25  ;;  %3588 = vmatprep.subr.bf16.mxu1 %v4644_v22  ;;  %v5076_v28 = vld [vmem:[#allocation10] ss:$8 sps:$4 sm:$0xff]   ;;  %v5078_v38 = vld [vmem:[#allocation10 + $0x4] ss:$8 sps:$4 sm:$0xff]   ;;  %v4667_v22 = vcombine.low %v2792_v6, %v2796_v4 }
 0x7cd   :  { %4267 = vmatprep.subr.bf16.mxu0 %v5078_v38  ;;  %v2848_v8 = vld [vmem:[#allocation8 + $0x288] sm:$0xff] }
 0x7ce   :  { %2721 = vadd.xlane.f32.xlu1 %v2720_v24  ;;  %v2884_v38 = vld [vmem:[#allocation8 + $0x3a8] sm:$0xff] }
 0x851   :  { %v2713_v11 = vpop.xlane.xlu0 %2712 }
 0x852   :  { %v2723_v25 = vmul.f32 0.00390625, %v2713_v11  ;;  %v4676_v11 = vcombine.high %v2800_v50, %v2804_v16 }
 0x853   :  { %v2716_v36 = vpop.xlane.xlu1 %2715 }
 0x854   :  { %v2727_v29 = vadd.f32 1e-05, %v2723_v25  ;;  %v2724_v24 = vmul.f32 0.00390625, %v2716_v36  ;;  %v2808_v25 = vld [vmem:[#allocation8 + $0x148] sm:$0xff] }
 0x855   :  { %v2812_v36 = vld [vmem:[#allocation8 + $0x168] sm:$0xff] }
 0x856   :  { %5292 = vrsqrt.f32 %v2727_v29  ;;  %v2728_v52 = vadd.f32 1e-05, %v2724_v24  ;;  %v5079_v29 = vld [vmem:[#allocation10 + $0x10] ss:$8 sps:$4 sm:$0xff]   ;;  %v5084_v24 = vld [vmem:[#allocation10 + $0x24] ss:$8 sps:$4 sm:$0xff]  }
 0x858   :  { %5294 = vrsqrt.f32 %v2728_v52  ;;  %v4675_v52 = vcombine.low %v2800_v50, %v2804_v16 }
 0x859   :  { %v2719_v40 = vpop.xlane.xlu0 %2718 }
 0x85a   :  { %v2725_v15 = vmul.f32 0.00390625, %v2719_v40  ;;  %v4684_v40 = vcombine.high %v2808_v25, %v2812_v36 }
 0x85b   :  { %v2722_v19 = vpop.xlane.xlu1 %2721 }
 0x85c   :  { %v2729_v26 = vadd.f32 1e-05, %v2725_v15  ;;  %v2726_v34 = vmul.f32 0.00390625, %v2722_v19  ;;  %v2816_v15 = vld [vmem:[#allocation8 + $0x188] sm:$0xff] }
 0x85d   :  { %v2820_v19 = vld [vmem:[#allocation8 + $0x1a8] sm:$0xff] }
 0x85e   :  { %5296 = vrsqrt.f32 %v2729_v26  ;;  %v2730_v37 = vadd.f32 1e-05, %v2726_v34  ;;  %v5082_v26 = vld [vmem:[#allocation10 + $0x20] ss:$8 sps:$4 sm:$0xff]   ;;  %v5087_v34 = vld [vmem:[#allocation10 + $0x34] ss:$8 sps:$4 sm:$0xff]   ;;  %v4692_v0 = vcombine.high %v2816_v15, %v2820_v19 }
 0x860   :  { %v5293_v10 = vpop.eup %5292  ;;  %5298 = vrsqrt.f32 %v2730_v37  ;;  %v4683_v37 = vcombine.low %v2808_v25, %v2812_v36  ;;  %v2892_v25 = vld [vmem:[#allocation8 + $0x3e8] sm:$0xff] }
 0x861   :  { %v2735_v42 = vmul.f32 %v5293_v10, %v6517_v48  ;;  %v2736_v55 = vmul.f32 %v5293_v10, %v6522_v7  ;;  %v2824_v10 = vld [vmem:[#allocation8 + $0x1c8] sm:$0xff] }
 0x862   :  { %v5295_v5 = vpop.eup %5294 }
 0x863   :  { %v2737_v44 = vmul.f32 %v5295_v5, %v6527_v23  ;;  %v2738_v14 = vmul.f32 %v5295_v5, %v6534_v20  ;;  %v2756_v35 = vmul.f32 %v2752_v21, %v2736_v55  ;;  %v2755_v13 = vmul.f32 %v2748_v18, %v2735_v42  ;;  %v2828_v42 = vld [vmem:[#allocation8 + $0x1e8] sm:$0xff]  ;;  %v5085_v55 = vld [vmem:[#allocation10 + $0x30] ss:$8 sps:$4 sm:$0xff]  }
 0x864   :  { %v4700_v5 = vcombine.high %v2824_v10, %v2828_v42 }
 0x865   :  { %v2758_v2 = vmul.f32 %v2752_v21, %v2738_v14  ;;  %v2757_v1 = vmul.f32 %v2748_v18, %v2737_v44  ;;  %v2832_v44 = vld [vmem:[#allocation8 + $0x208] sm:$0xff] }
 0x866   :  { %v2836_v14 = vld [vmem:[#allocation8 + $0x228] sm:$0xff] }
 0x867   :  { %v6578_v63 = vpack.c.bf16 %v2758_v2, %v2756_v35  ;;  %v6580_v41 = vpack.c.bf16 %v2757_v1, %v2755_v13  ;;  %v5088_v35 = vld [vmem:[#allocation10 + $0x40] ss:$8 sps:$4 sm:$0xff]   ;;  %v5093_v2 = vld [vmem:[#allocation10 + $0x54] ss:$8 sps:$4 sm:$0xff]   ;;  %v4699_v13 = vcombine.low %v2824_v10, %v2828_v42  ;;  %v4708_v1 = vcombine.high %v2832_v44, %v2836_v14 }
 0x868   :  { %v5297_v62 = vpop.eup %5296  ;;  %v2790_v10 = vld [vmem:[#allocation8 + $0xb8] sm:$0xff] }
 0x869   :  { %3567 = vmatprep.mubr.bf16.mxu1 %v6578_v63  ;;  %3673 = vmatprep.mubr.bf16.mxu0 %v6578_v63  ;;  %v2740_v53 = vmul.f32 %v5297_v62, %v6550_v46  ;;  %v2739_v31 = vmul.f32 %v5297_v62, %v6545_v61  ;;  %v5091_v62 = vld [vmem:[#allocation10 + $0x50] ss:$8 sps:$4 sm:$0xff]  }
 0x86a   :  { %v5299_v59 = vpop.eup %5298  ;;  %3568 = vmatmul.mubr.bf16.vlgmr.msra.gmra.mrb[40].mxu1 %v6580_v41  ;;  %3674 = vmatmul.mubr.bf16.vlgmr.msra.gmra.mrb[32].mxu0 %v6580_v41 }
 0x86b   :  { %3589 = vmatpush1.bf16.msra.mxu1 %v4643_v12  ;;  %v2742_v9 = vmul.f32 %v5299_v59, %v6562_v43  ;;  %v2741_v49 = vmul.f32 %v5299_v59, %v6555_v58  ;;  %v2760_v51 = vmul.f32 %v2752_v21, %v2740_v53  ;;  %v2759_v27 = vmul.f32 %v2748_v18, %v2739_v31  ;;  %v5081_v12 = vld [vmem:[#allocation10 + $0x14] ss:$8 sps:$4 sm:$0xff]   ;;  %v2852_v31 = vld [vmem:[#allocation8 + $0x2a8] sm:$0xff] }
 0x86c   :  { %3590 = vmatprep.subr.bf16.mxu1 %v4652_v57  ;;  %4268 = vmatpush1.bf16.msra.mxu0 %v5076_v28  ;;  %v5096_v57 = vld [vmem:[#allocation10 + $0x64] ss:$8 sps:$4 sm:$0xff]   ;;  %v4707_v53 = vcombine.low %v2832_v44, %v2836_v14  ;;  %v5094_v59 = vld [vmem:[#allocation10 + $0x60] ss:$8 sps:$4 sm:$0xff]   ;;  %v2802_v14 = vld [vmem:[#allocation8 + $0x118] sm:$0xff] }
 0x86d   :  { %v2762_v17 = vmul.f32 %v2752_v21, %v2742_v9  ;;  %v2761_v30 = vmul.f32 %v2748_v18, %v2741_v49  ;;  %4269 = vmatprep.subr.bf16.mxu0 %v5081_v12  ;;  %v5090_v18 = vld [vmem:[#allocation10 + $0x44] ss:$8 sps:$4 sm:$0xff]   ;;  %v4691_v21 = vcombine.low %v2816_v15, %v2820_v19  ;;  %v4724_v9 = vcombine.high %v2848_v8, %v2852_v31  ;;  %v2778_v19 = vld [vmem:[#allocation8 + $0x58] sm:$0xff] }
 0x86e   :  { %v2856_v49 = vld [vmem:[#allocation8 + $0x2c8] sm:$0xff] }
 0x86f   :  { %3591 = vmatpush1.bf16.msra.mxu1 %v4651_v45  ;;  %v6590_v32 = vpack.c.bf16 %v2762_v17, %v2760_v51  ;;  %v6592_v33 = vpack.c.bf16 %v2761_v30, %v2759_v27  ;;  %v4715_v45 = vcombine.low %v2840_v54, %v2844_v47  ;;  %v4723_v51 = vcombine.low %v2848_v8, %v2852_v31  ;;  %v2864_v27 = vld [vmem:[#allocation8 + $0x308] sm:$0xff]  ;;  %v2814_v54 = vld [vmem:[#allocation8 + $0x178] sm:$0xff] }
 0x870   :  { %3592 = vmatprep.subr.bf16.mxu1 %v4660_v39  ;;  %4270 = vmatpush1.bf16.msra.mxu0 %v5079_v29  ;;  %v2860_v39 = vld [vmem:[#allocation8 + $0x2e8] sm:$0xff]  ;;  %v2826_v31 = vld [vmem:[#allocation8 + $0x1d8] sm:$0xff] }
 0x871   :  { %3577 = vmatprep.mubr.bf16.mxu1 %v6590_v32  ;;  %3683 = vmatprep.mubr.bf16.mxu0 %v6590_v32  ;;  %v4732_v17 = vcombine.high %v2856_v49, %v2860_v39  ;;  %v2868_v30 = vld [vmem:[#allocation8 + $0x328] sm:$0xff]  ;;  %v4731_v6 = vcombine.low %v2856_v49, %v2860_v39  ;;  %v2834_v39 = vld [vmem:[#allocation8 + $0x218] sm:$0xff] }
 0x872   :  { %3578 = vmatmul.mubr.bf16.gmra.mrb[44].mxu1 %v6592_v33  ;;  %3684 = vmatmul.mubr.bf16.gmra.mrb[36].mxu0 %v6592_v33  ;;  %v4740_v4 = vcombine.high %v2864_v27, %v2868_v30  ;;  %v4739_v50 = vcombine.low %v2864_v27, %v2868_v30  ;;  %v2880_v28 = vld [vmem:[#allocation8 + $0x388] sm:$0xff] }
 0x873   :  { %3593 = vmatpush1.bf16.msra.mxu1 %v4659_v60  ;;  %3620 = vmatprep.mubr.bf16.mxu1 %v6578_v63  ;;  %v2872_v60 = vld [vmem:[#allocation8 + $0x348] sm:$0xff]  ;;  %v4756_v12 = vcombine.high %v2880_v28, %v2884_v38  ;;  %v4755_v36 = vcombine.low %v2880_v28, %v2884_v38  ;;  %v2850_v38 = vld [vmem:[#allocation8 + $0x298] sm:$0xff] }
 0x874   :  { %3594 = vmatprep.subr.bf16.mxu1 %v4668_v3  ;;  %4271 = vmatprep.subr.bf16.mxu0 %v5084_v24  ;;  %v2876_v3 = vld [vmem:[#allocation8 + $0x368] sm:$0xff]  ;;  %v2770_v24 = vld [vmem:[#allocation8 + $0x18] sm:$0xff] }
 0x875   :  { %4272 = vmatpush1.bf16.msra.mxu0 %v5082_v26  ;;  %v4748_v16 = vcombine.high %v2872_v60, %v2876_v3  ;;  %v2782_v26 = vld [vmem:[#allocation8 + $0x78] sm:$0xff]  ;;  %v5100_v27 = vld [vmem:[#allocation10 + $0x80] ss:$8 sps:$4 sm:$0xff]  }
 0x876   :  { %4273 = vmatprep.subr.bf16.mxu0 %v5087_v34  ;;  %v4655_v42 = vcombine.low %v2778_v19, %v2782_v26 }
 0x877   :  { %3595 = vmatpush1.bf16.msra.mxu1 %v4667_v22  ;;  %v4747_v22 = vcombine.low %v2872_v60, %v2876_v3  ;;  %v2846_v60 = vld [vmem:[#allocation8 + $0x278] sm:$0xff] }
 0x878   :  { %3596 = vmatprep.subr.bf16.mxu1 %v4676_v11  ;;  %v2888_v11 = vld [vmem:[#allocation8 + $0x3c8] sm:$0xff]  ;;  %v5105_v3 = vld [vmem:[#allocation10 + $0x94] ss:$8 sps:$4 sm:$0xff]  }
 0x879   :  { %4274 = vmatpush1.bf16.msra.mxu0 %v5085_v55  ;;  %v4764_v29 = vcombine.high %v2888_v11, %v2892_v25 }
 0x87a   :  { %4275 = vmatprep.subr.bf16.mxu0 %v5090_v18  ;;  %v2794_v18 = vld [vmem:[#allocation8 + $0xd8] sm:$0xff] }
 0x87b   :  { %3597 = vmatpush1.bf16.msra.mxu1 %v4675_v52  ;;  %v2774_v52 = vld [vmem:[#allocation8 + $0x38] sm:$0xff] }
 0x87c   :  { %3598 = vmatprep.subr.bf16.mxu1 %v4684_v40  ;;  %v4763_v40 = vcombine.low %v2888_v11, %v2892_v25  ;;  %v4648_v15 = vcombine.high %v2770_v24, %v2774_v52  ;;  %v4647_v34 = vcombine.low %v2770_v24, %v2774_v52  ;;  %v5106_v11 = vld [vmem:[#allocation10 + $0xa0] ss:$8 sps:$4 sm:$0xff]   ;;  %v2862_v24 = vld [vmem:[#allocation8 + $0x2f8] sm:$0xff] }
 0x87d   :  { %4276 = vmatpush1.bf16.msra.mxu0 %v5088_v35  ;;  %v2806_v35 = vld [vmem:[#allocation8 + $0x138] sm:$0xff] }
 0x87e   :  { %4277 = vmatprep.subr.bf16.mxu0 %v5093_v2  ;;  %v4679_v47 = vcombine.low %v2802_v14, %v2806_v35  ;;  %v5111_v52 = vld [vmem:[#allocation10 + $0xb4] ss:$8 sps:$4 sm:$0xff]  }
 0x87f   :  { %3599 = vmatpush1.bf16.msra.mxu1 %v4683_v37  ;;  %v4656_v37 = vcombine.high %v2778_v19, %v2782_v26  ;;  %v2866_v26 = vld [vmem:[#allocation8 + $0x318] sm:$0xff] }
 0x880   :  { %3600 = vmatprep.subr.bf16.mxu1 %v4692_v0  ;;  %v2786_v0 = vld [vmem:[#allocation8 + $0x98] sm:$0xff] }
 0x881   :  { %4278 = vmatpush1.bf16.msra.mxu0 %v5091_v62  ;;  %v4664_v55 = vcombine.high %v2786_v0, %v2790_v10 }
 0x882   :  { %4279 = vmatprep.subr.bf16.mxu0 %v5096_v57  ;;  %v2818_v57 = vld [vmem:[#allocation8 + $0x198] sm:$0xff] }
 0x883   :  { %3601 = vmatpush1.bf16.msra.mxu1 %v4691_v21  ;;  %v2798_v21 = vld [vmem:[#allocation8 + $0xf8] sm:$0xff] }
 0x884   :  { %3602 = vmatprep.subr.bf16.mxu1 %v4700_v5  ;;  %v4663_v5 = vcombine.low %v2786_v0, %v2790_v10  ;;  %v4672_v44 = vcombine.high %v2794_v18, %v2798_v21  ;;  %v4671_v2 = vcombine.low %v2794_v18, %v2798_v21  ;;  %v5112_v0 = vld [vmem:[#allocation10 + $0xc0] ss:$8 sps:$4 sm:$0xff]   ;;  %v2878_v18 = vld [vmem:[#allocation8 + $0x378] sm:$0xff] }
 0x885   :  { %4280 = vmatpush1.bf16.msra.mxu0 %v5094_v59  ;;  %v2830_v59 = vld [vmem:[#allocation8 + $0x1f8] sm:$0xff] }
 0x886   :  { %v4704_v49 = vcombine.high %v2826_v31, %v2830_v59  ;;  %v4703_v30 = vcombine.low %v2826_v31, %v2830_v59  ;;  %v5117_v21 = vld [vmem:[#allocation10 + $0xd4] ss:$8 sps:$4 sm:$0xff]  }
 0x887   :  { %3603 = vmatpush1.bf16.msra.mxu1 %v4699_v13  ;;  %v4680_v13 = vcombine.high %v2802_v14, %v2806_v35  ;;  %v2882_v35 = vld [vmem:[#allocation8 + $0x398] sm:$0xff] }
 0x888   :  { %3604 = vmatprep.subr.bf16.mxu1 %v4708_v1  ;;  %v2810_v1 = vld [vmem:[#allocation8 + $0x158] sm:$0xff] }
 0x889   :  { %v4688_v62 = vcombine.high %v2810_v1, %v2814_v54 }
 0x88b   :  { %3605 = vmatpush1.bf16.msra.mxu1 %v4707_v53  ;;  %v2822_v53 = vld [vmem:[#allocation8 + $0x1b8] sm:$0xff] }
 0x88c   :  { %3606 = vmatprep.subr.bf16.mxu1 %v4716_v56  ;;  %v4687_v56 = vcombine.low %v2810_v1, %v2814_v54  ;;  %v4696_v8 = vcombine.high %v2818_v57, %v2822_v53  ;;  %v5118_v1 = vld [vmem:[#allocation10 + $0xe0] ss:$8 sps:$4 sm:$0xff]  }
 0x88f   :  { %3607 = vmatpush1.bf16.msra.mxu1 %v4715_v45  ;;  %v5099_v45 = vld [vmem:[#allocation10 + $0x74] ss:$8 sps:$4 sm:$0xff]  }
 0x890   :  { %3608 = vmatprep.subr.bf16.mxu1 %v4724_v9  ;;  %v5097_v9 = vld [vmem:[#allocation10 + $0x70] ss:$8 sps:$4 sm:$0xff]   ;;  %4281 = vmatprep.subr.bf16.mxu0 %v5099_v45  ;;  %v5126_v45 = vld [vmem:[#allocation10 + $0x104] ss:$8 sps:$4 sm:$0xff]  }
 0x891   :  { %4282 = vmatpush1.bf16.msra.mxu0 %v5097_v9 }
 0x893   :  { %3609 = vmatpush1.bf16.msra.mxu1 %v4723_v51  ;;  %v2838_v51 = vld [vmem:[#allocation8 + $0x238] sm:$0xff] }
 0x894   :  { %3610 = vmatprep.subr.bf16.mxu1 %v4732_v17  ;;  %v5102_v17 = vld [vmem:[#allocation10 + $0x84] ss:$8 sps:$4 sm:$0xff]  }
 0x895   :  { %4283 = vmatprep.subr.bf16.mxu0 %v5102_v17 }
 0x896   :  { %4284 = vmatpush1.bf16.msra.mxu0 %v5100_v27 }
 0x897   :  { %3611 = vmatpush1.bf16.msra.mxu1 %v4731_v6  ;;  %v4712_v6 = vcombine.high %v2834_v39, %v2838_v51  ;;  %4285 = vmatprep.subr.bf16.mxu0 %v5105_v3 }
 0x898   :  { %3612 = vmatprep.subr.bf16.mxu1 %v4740_v4  ;;  %v2842_v4 = vld [vmem:[#allocation8 + $0x258] sm:$0xff] }
 0x899   :  { %v4720_v28 = vcombine.high %v2842_v4, %v2846_v60  ;;  %v4719_v25 = vcombine.low %v2842_v4, %v2846_v60 }
 0x89b   :  { %3613 = vmatpush1.bf16.msra.mxu1 %v4739_v50  ;;  %v5103_v50 = vld [vmem:[#allocation10 + $0x90] ss:$8 sps:$4 sm:$0xff]  }
 0x89c   :  { %3614 = vmatprep.subr.bf16.mxu1 %v4748_v16  ;;  %v4711_v16 = vcombine.low %v2834_v39, %v2838_v51  ;;  %4286 = vmatpush1.bf16.msra.mxu0 %v5103_v50 }
 0x89f   :  { %3615 = vmatpush1.bf16.msra.mxu1 %v4747_v22  ;;  %v2854_v22 = vld [vmem:[#allocation8 + $0x2b8] sm:$0xff] }
 0x8a0   :  { %3616 = vmatprep.subr.bf16.mxu1 %v4756_v12  ;;  %v5108_v12 = vld [vmem:[#allocation10 + $0xa4] ss:$8 sps:$4 sm:$0xff]  }
 0x8a1   :  { %4287 = vmatprep.subr.bf16.mxu0 %v5108_v12 }
 0x8a2   :  { %4288 = vmatpush1.bf16.msra.mxu0 %v5106_v11 }
 0x8a3   :  { %3617 = vmatpush1.bf16.msra.mxu1 %v4755_v36  ;;  %v4728_v36 = vcombine.high %v2850_v38, %v2854_v22  ;;  %4289 = vmatprep.subr.bf16.mxu0 %v5111_v52 }
 0x8a4   :  { %3618 = vmatprep.subr.bf16.mxu1 %v4764_v29  ;;  %v2858_v29 = vld [vmem:[#allocation8 + $0x2d8] sm:$0xff] }
 0x8a5   :  { %v4736_v19 = vcombine.high %v2858_v29, %v2862_v24  ;;  %v4735_v10 = vcombine.low %v2858_v29, %v2862_v24 }
 0x8a7   :  { %3619 = vmatpush1.bf16.msra.mxu1 %v4763_v40  ;;  %v5109_v40 = vld [vmem:[#allocation10 + $0xb0] ss:$8 sps:$4 sm:$0xff]  }
 0x8a8   :  { %3694 = vmatprep.subr.bf16.mxu1 %v4648_v15  ;;  %v4727_v15 = vcombine.low %v2850_v38, %v2854_v22  ;;  %4290 = vmatpush1.bf16.msra.mxu0 %v5109_v40 }
 0x8aa   :  { %3621 = vmatmul.mubr.bf16.vlgmr.msra.gmra.mrb[48].mxu1 %v6580_v41 }
 0x8ab   :  { %3630 = vmatprep.mubr.bf16.mxu1 %v6590_v32  ;;  %3695 = vmatpush1.bf16.msra.mxu1 %v4647_v34  ;;  %v2870_v34 = vld [vmem:[#allocation8 + $0x338] sm:$0xff] }
 0x8ac   :  { %3696 = vmatprep.subr.bf16.mxu1 %v4656_v37  ;;  %v5114_v37 = vld [vmem:[#allocation10 + $0xc4] ss:$8 sps:$4 sm:$0xff]  }
 0x8ad   :  { %4291 = vmatprep.subr.bf16.mxu0 %v5114_v37 }
 0x8ae   :  { %4292 = vmatpush1.bf16.msra.mxu0 %v5112_v0 }
 0x8af   :  { %3697 = vmatpush1.bf16.msra.mxu1 %v4655_v42  ;;  %v4744_v42 = vcombine.high %v2866_v26, %v2870_v34  ;;  %4293 = vmatprep.subr.bf16.mxu0 %v5117_v21 }
 0x8b0   :  { %3698 = vmatprep.subr.bf16.mxu1 %v4664_v55  ;;  %v2874_v55 = vld [vmem:[#allocation8 + $0x358] sm:$0xff] }
 0x8b1   :  { %v4752_v14 = vcombine.high %v2874_v55, %v2878_v18  ;;  %v4751_v54 = vcombine.low %v2874_v55, %v2878_v18 }
 0x8b2   :  { %3631 = vmatmul.mubr.bf16.gmra.mrb[52].mxu1 %v6592_v33 }
 0x8b3   :  { %3699 = vmatpush1.bf16.msra.mxu1 %v4663_v5  ;;  %3726 = vmatprep.mubr.bf16.mxu1 %v6578_v63  ;;  %v4695_v63 = vcombine.low %v2818_v57, %v2822_v53  ;;  %v5115_v5 = vld [vmem:[#allocation10 + $0xd0] ss:$8 sps:$4 sm:$0xff]   ;;  %v5123_v53 = vld [vmem:[#allocation10 + $0xf4] ss:$8 sps:$4 sm:$0xff]  }
 0x8b4   :  { %3700 = vmatprep.subr.bf16.mxu1 %v4672_v44  ;;  %v4743_v44 = vcombine.low %v2866_v26, %v2870_v34  ;;  %4294 = vmatpush1.bf16.msra.mxu0 %v5115_v5  ;;  %v2894_v57 = vld [vmem:[#allocation8 + $0x3f8] sm:$0xff] }
 0x8b7   :  { %3701 = vmatpush1.bf16.msra.mxu1 %v4671_v2  ;;  %v2886_v2 = vld [vmem:[#allocation8 + $0x3b8] sm:$0xff] }
 0x8b8   :  { %3702 = vmatprep.subr.bf16.mxu1 %v4680_v13  ;;  %v5120_v13 = vld [vmem:[#allocation10 + $0xe4] ss:$8 sps:$4 sm:$0xff]  }
 0x8b9   :  { %4295 = vmatprep.subr.bf16.mxu0 %v5120_v13 }
 0x8ba   :  { %4296 = vmatpush1.bf16.msra.mxu0 %v5118_v1 }
 0x8bb   :  { %3703 = vmatpush1.bf16.msra.mxu1 %v4679_v47  ;;  %v4760_v47 = vcombine.high %v2882_v35, %v2886_v2  ;;  %4297 = vmatprep.subr.bf16.mxu0 %v5123_v53 }
 0x8bc   :  { %3704 = vmatprep.subr.bf16.mxu1 %v4688_v62  ;;  %v2890_v62 = vld [vmem:[#allocation8 + $0x3d8] sm:$0xff] }
 0x8bd   :  { %v4768_v31 = vcombine.high %v2890_v62, %v2894_v57  ;;  %v4767_v59 = vcombine.low %v2890_v62, %v2894_v57 }
 0x8bf   :  { %3705 = vmatpush1.bf16.msra.mxu1 %v4687_v56  ;;  %v5121_v56 = vld [vmem:[#allocation10 + $0xf0] ss:$8 sps:$4 sm:$0xff]  }
 0x8c0   :  { %3706 = vmatprep.subr.bf16.mxu1 %v4696_v8  ;;  %v4759_v8 = vcombine.low %v2882_v35, %v2886_v2  ;;  %4298 = vmatpush1.bf16.msra.mxu0 %v5121_v56 }
 0x8c1   :  { %4320 = vmatprep.subr.bf16.mxu0 %v5126_v45  ;;  %v5124_v45 = vld [vmem:[#allocation10 + $0x100] ss:$8 sps:$4 sm:$0xff]  }
 0x8c3   :  { %3707 = vmatpush1.bf16.msra.mxu1 %v4695_v63 }
 0x8c4   :  { %3708 = vmatprep.subr.bf16.mxu1 %v4704_v49 }
 0x8c7   :  { %3709 = vmatpush1.bf16.msra.mxu1 %v4703_v30 }
 0x8c8   :  { %3710 = vmatprep.subr.bf16.mxu1 %v4712_v6 }
 0x8cb   :  { %3711 = vmatpush1.bf16.msra.mxu1 %v4711_v16 }
 0x8cc   :  { %3712 = vmatprep.subr.bf16.mxu1 %v4720_v28 }
 0x8cf   :  { %3713 = vmatpush1.bf16.msra.mxu1 %v4719_v25 }
 0x8d0   :  { %3714 = vmatprep.subr.bf16.mxu1 %v4728_v36 }
 0x8d3   :  { %3715 = vmatpush1.bf16.msra.mxu1 %v4727_v15 }
 0x8d4   :  { %3716 = vmatprep.subr.bf16.mxu1 %v4736_v19 }
 0x8d7   :  { %3717 = vmatpush1.bf16.msra.mxu1 %v4735_v10 }
 0x8d8   :  { %3718 = vmatprep.subr.bf16.mxu1 %v4744_v42 }
 0x8db   :  { %3719 = vmatpush1.bf16.msra.mxu1 %v4743_v44 }
 0x8dc   :  { %3720 = vmatprep.subr.bf16.mxu1 %v4752_v14 }
 0x8df   :  { %3721 = vmatpush1.bf16.msra.mxu1 %v4751_v54 }
 0x8e0   :  { %3722 = vmatprep.subr.bf16.mxu1 %v4760_v47 }
 0x8e3   :  { %3723 = vmatpush1.bf16.msra.mxu1 %v4759_v8 }
 0x8e4   :  { %3724 = vmatprep.subr.bf16.mxu1 %v4768_v31 }
 0x8e7   :  { %3725 = vmatpush1.bf16.msra.mxu1 %v4767_v59 }
 0x8ea   :  { %3727 = vmatmul.mubr.bf16.vlgmr.msra.gmra.mrb[56].mxu1 %v6580_v41 }
 0x8eb   :  { %3736 = vmatprep.mubr.bf16.mxu1 %v6590_v32 }
 0x8f2   :  { %3737 = vmatmul.mubr.bf16.gmra.mrb[60].mxu1 %v6592_v33 }
 0x93d   :  { %v3569_v9 = vpop.f32.mrb[40].mxu1  ;;  %v3675_v63 = vpop.f32.mrb[32].mxu0 }
 0x93e   :  { %v4769_v49 = vmul.f32 -1.442695, %v3569_v9  ;;  %v3571_v39 = vpop.f32.mrb[41].mxu1  ;;  %v3677_v51 = vpop.f32.mrb[33].mxu0 }
 0x93f   :  { %v4770_v17 = vmul.f32 -1.442695, %v3571_v39  ;;  %v3573_v27 = vpop.f32.mrb[42].mxu1  ;;  %v3679_v30 = vpop.f32.mrb[34].mxu0 }
 0x940   :  { %5300 = vpow2.f32 %v4769_v49  ;;  %v4773_v6 = vmul.f32 -1.442695, %v3573_v27  ;;  %v3575_v4 = vpop.f32.mrb[43].mxu1  ;;  %v3681_v60 = vpop.f32.mrb[35].mxu0 }
 0x941   :  { %5302 = vpow2.f32 %v4770_v17  ;;  %v4774_v41 = vmul.f32 -1.442695, %v3575_v4 }
 0x942   :  { %5304 = vpow2.f32 %v4773_v6  ;;  %v5129_v6 = vld [vmem:[#allocation10 + $0x114] ss:$8 sps:$4 sm:$0xff]  }
 0x943   :  { %5306 = vpow2.f32 %v4774_v41 }
 0x945   :  { %v3579_v32 = vpop.f32.mrb[44].mxu1  ;;  %v3685_v33 = vpop.f32.mrb[36].mxu0 }
 0x946   :  { %v4777_v3 = vmul.f32 -1.442695, %v3579_v32  ;;  %v3581_v50 = vpop.f32.mrb[45].mxu1  ;;  %v3687_v16 = vpop.f32.mrb[37].mxu0 }
 0x947   :  { %v4778_v28 = vmul.f32 -1.442695, %v3581_v50  ;;  %v3583_v38 = vpop.f32.mrb[46].mxu1  ;;  %v6606_v22 = vpop.f32.mrb[38].mxu0 }
 0x948   :  { %5308 = vpow2.f32 %v4777_v3  ;;  %v4781_v12 = vmul.f32 -1.442695, %v3583_v38  ;;  %v3585_v11 = vpop.f32.mrb[47].mxu1  ;;  %v3691_v25 = vpop.f32.mrb[39].mxu0 }
 0x949   :  { %5310 = vpow2.f32 %v4778_v28  ;;  %v4782_v36 = vmul.f32 -1.442695, %v3585_v11 }
 0x94a   :  { %v5301_v29 = vpop.eup %5300  ;;  %5312 = vpow2.f32 %v4781_v12 }
 0x94b   :  { %v5303_v24 = vpop.eup %5302  ;;  %v3795_v52 = vadd.f32 1.0, %v5301_v29  ;;  %5314 = vpow2.f32 %v4782_v36  ;;  %v5142_v29 = vld [vmem:[#allocation10 + $0x160] ss:$8 sps:$4 sm:$0xff]  }
 0x94c   :  { %v5305_v40 = vpop.eup %5304  ;;  %v3796_v15 = vadd.f32 1.0, %v5303_v24  ;;  %v5147_v24 = vld [vmem:[#allocation10 + $0x174] ss:$8 sps:$4 sm:$0xff]  }
 0x94d   :  { %v5307_v19 = vpop.eup %5306  ;;  %5316 = vrcp.f32 %v3795_v52  ;;  %v3799_v26 = vadd.f32 1.0, %v5305_v40  ;;  %v5145_v52 = vld [vmem:[#allocation10 + $0x170] ss:$8 sps:$4 sm:$0xff]   ;;  %v5150_v40 = vld [vmem:[#allocation10 + $0x184] ss:$8 sps:$4 sm:$0xff]  }
 0x94e   :  { %5318 = vrcp.f32 %v3796_v15  ;;  %v3800_v34 = vadd.f32 1.0, %v5307_v19 }
 0x94f   :  { %5320 = vrcp.f32 %v3799_v26 }
 0x950   :  { %5322 = vrcp.f32 %v3800_v34  ;;  %v5148_v34 = vld [vmem:[#allocation10 + $0x180] ss:$8 sps:$4 sm:$0xff]  }
 0x952   :  { %v5309_v37 = vpop.eup %5308 }
 0x953   :  { %v5311_v0 = vpop.eup %5310  ;;  %v3803_v10 = vadd.f32 1.0, %v5309_v37 }
 0x954   :  { %v5313_v42 = vpop.eup %5312  ;;  %v3804_v55 = vadd.f32 1.0, %v5311_v0  ;;  %v5153_v0 = vld [vmem:[#allocation10 + $0x194] ss:$8 sps:$4 sm:$0xff]  }
 0x955   :  { %v5315_v18 = vpop.eup %5314  ;;  %5324 = vrcp.f32 %v3803_v10  ;;  %v3807_v21 = vadd.f32 1.0, %v5313_v42  ;;  %v5151_v10 = vld [vmem:[#allocation10 + $0x190] ss:$8 sps:$4 sm:$0xff]   ;;  %v5156_v42 = vld [vmem:[#allocation10 + $0x1a4] ss:$8 sps:$4 sm:$0xff]  }
 0x956   :  { %5326 = vrcp.f32 %v3804_v55  ;;  %v3808_v5 = vadd.f32 1.0, %v5315_v18 }
 0x957   :  { %v5317_v44 = vpop.eup %5316  ;;  %5328 = vrcp.f32 %v3807_v21 }
 0x958   :  { %v5319_v14 = vpop.eup %5318  ;;  %v3843_v35 = vmul.f32 %v5317_v44, %v3569_v9  ;;  %5330 = vrcp.f32 %v3808_v5  ;;  %v5154_v5 = vld [vmem:[#allocation10 + $0x1a0] ss:$8 sps:$4 sm:$0xff]  }
 0x959   :  { %v5321_v2 = vpop.eup %5320  ;;  %v3844_v13 = vmul.f32 %v5319_v14, %v3571_v39  ;;  %v5159_v14 = vld [vmem:[#allocation10 + $0x1b4] ss:$8 sps:$4 sm:$0xff]  }
 0x95a   :  { %v5323_v1 = vpop.eup %5322  ;;  %v3859_v54 = vmul.f32 %v3843_v35, %v3675_v63  ;;  %v3847_v47 = vmul.f32 %v5321_v2, %v3573_v27  ;;  %v5157_v35 = vld [vmem:[#allocation10 + $0x1b0] ss:$8 sps:$4 sm:$0xff]   ;;  %v5162_v2 = vld [vmem:[#allocation10 + $0x1c4] ss:$8 sps:$4 sm:$0xff]  }
 0x95b   :  { %v3860_v62 = vmul.f32 %v3844_v13, %v3677_v51  ;;  %v3848_v57 = vmul.f32 %v5323_v1, %v3575_v4  ;;  %v5127_v51 = vld [vmem:[#allocation10 + $0x110] ss:$8 sps:$4 sm:$0xff]   ;;  %v5132_v4 = vld [vmem:[#allocation10 + $0x124] ss:$8 sps:$4 sm:$0xff]   ;;  %v5160_v13 = vld [vmem:[#allocation10 + $0x1c0] ss:$8 sps:$4 sm:$0xff]  }
 0x95c   :  { %v3863_v53 = vmul.f32 %v3847_v47, %v3679_v30  ;;  %v5165_v1 = vld [vmem:[#allocation10 + $0x1d4] ss:$8 sps:$4 sm:$0xff]   ;;  %v5168_v47 = vld [vmem:[#allocation10 + $0x1e4] ss:$8 sps:$4 sm:$0xff]  }
 0x95d   :  { %v3864_v56 = vmul.f32 %v3848_v57, %v3681_v60  ;;  %v5171_v57 = vld [vmem:[#allocation10 + $0x1f4] ss:$8 sps:$4 sm:$0xff]  }
 0x95e   :  { %v3875_v8 = vpack.c.bf16 %v3863_v53, %v3859_v54  ;;  %v5163_v54 = vld [vmem:[#allocation10 + $0x1d0] ss:$8 sps:$4 sm:$0xff]  }
 0x95f   :  { %v5325_v31 = vpop.eup %5324  ;;  %v3876_v59 = vpack.c.bf16 %v3864_v56, %v3860_v62  ;;  %v5166_v62 = vld [vmem:[#allocation10 + $0x1e0] ss:$8 sps:$4 sm:$0xff]  }
 0x960   :  { %v5327_v49 = vpop.eup %5326  ;;  %v3851_v17 = vmul.f32 %v5325_v31, %v3579_v32  ;;  %v5130_v32 = vld [vmem:[#allocation10 + $0x120] ss:$8 sps:$4 sm:$0xff]  }
 0x961   :  { %v5329_v41 = vpop.eup %5328  ;;  %v3852_v3 = vmul.f32 %v5327_v49, %v3581_v50  ;;  %4299 = vmatprep.mubr.bf16.mxu0 %v3876_v59  ;;  %v5135_v50 = vld [vmem:[#allocation10 + $0x134] ss:$8 sps:$4 sm:$0xff]  }
 0x962   :  { %v5331_v9 = vpop.eup %5330  ;;  %v3867_v28 = vmul.f32 %v3851_v17, %v3685_v33  ;;  %v3855_v39 = vmul.f32 %v5329_v41, %v3583_v38  ;;  %4300 = vmatmul.mubr.bf16.vlgmr.msra.gmra.mrb[40].mxu0 %v3875_v8  ;;  %v5133_v33 = vld [vmem:[#allocation10 + $0x130] ss:$8 sps:$4 sm:$0xff]   ;;  %v5136_v38 = vld [vmem:[#allocation10 + $0x140] ss:$8 sps:$4 sm:$0xff]  }
 0x963   :  { %v3868_v63 = vmul.f32 %v3852_v3, %v3687_v16  ;;  %v3856_v27 = vmul.f32 %v5331_v9, %v3585_v11  ;;  %4321 = vmatpush1.bf16.msra.mxu0 %v5124_v45  ;;  %v5138_v16 = vld [vmem:[#allocation10 + $0x144] ss:$8 sps:$4 sm:$0xff]   ;;  %v5141_v11 = vld [vmem:[#allocation10 + $0x154] ss:$8 sps:$4 sm:$0xff]   ;;  %v5169_v8 = vld [vmem:[#allocation10 + $0x1f0] ss:$8 sps:$4 sm:$0xff]  }
 0x964   :  { %v3871_v30 = vmul.f32 %v3855_v39, %v6606_v22  ;;  %4322 = vmatprep.subr.bf16.mxu0 %v5129_v6  ;;  %v5139_v22 = vld [vmem:[#allocation10 + $0x150] ss:$8 sps:$4 sm:$0xff]  }
 0x965   :  { %v3872_v60 = vmul.f32 %v3856_v27, %v3691_v25  ;;  %v5144_v25 = vld [vmem:[#allocation10 + $0x164] ss:$8 sps:$4 sm:$0xff]  }
 0x966   :  { %v3879_v12 = vpack.c.bf16 %v3871_v30, %v3867_v28 }
 0x967   :  { %v3880_v36 = vpack.c.bf16 %v3872_v60, %v3868_v63  ;;  %4323 = vmatpush1.bf16.msra.mxu0 %v5127_v51 }
 0x968   :  { %4324 = vmatprep.subr.bf16.mxu0 %v5132_v4 }
 0x969   :  { %4309 = vmatprep.mubr.bf16.mxu0 %v3880_v36 }
 0x96a   :  { %4310 = vmatmul.mubr.bf16.gmra.mrb[44].mxu0 %v3879_v12 }
 0x96b   :  { %4325 = vmatpush1.bf16.msra.mxu0 %v5130_v32 }
 0x96c   :  { %4326 = vmatprep.subr.bf16.mxu0 %v5135_v50 }
 0x96f   :  { %4327 = vmatpush1.bf16.msra.mxu0 %v5133_v33 }
 0x970   :  { %4328 = vmatprep.subr.bf16.mxu0 %v5138_v16 }
 0x973   :  { %4329 = vmatpush1.bf16.msra.mxu0 %v5136_v38 }
 0x974   :  { %4330 = vmatprep.subr.bf16.mxu0 %v5141_v11 }
 0x977   :  { %4331 = vmatpush1.bf16.msra.mxu0 %v5139_v22 }
 0x978   :  { %4332 = vmatprep.subr.bf16.mxu0 %v5144_v25 }
 0x97b   :  { %4333 = vmatpush1.bf16.msra.mxu0 %v5142_v29 }
 0x97c   :  { %4334 = vmatprep.subr.bf16.mxu0 %v5147_v24 }
 0x97d   :  { %v6609_v15 = vpop.f32.mrb[48].mxu1 }
 0x97e   :  { %v6611_v19 = vpop.f32.mrb[49].mxu1  ;;  %v4771_v53 = vmul.f32 -1.442695, %v6609_v15 }
 0x97f   :  { %v6613_v26 = vpop.f32.mrb[50].mxu1  ;;  %4335 = vmatpush1.bf16.msra.mxu0 %v5145_v52  ;;  %v4772_v56 = vmul.f32 -1.442695, %v6611_v19 }
 0x980   :  { %v6615_v37 = vpop.f32.mrb[51].mxu1  ;;  %4336 = vmatprep.subr.bf16.mxu0 %v5150_v40  ;;  %v4775_v31 = vmul.f32 -1.442695, %v6613_v26  ;;  %5332 = vpow2.f32 %v4771_v53 }
 0x981   :  { %v4776_v59 = vmul.f32 -1.442695, %v6615_v37  ;;  %5334 = vpow2.f32 %v4772_v56 }
 0x982   :  { %5336 = vpow2.f32 %v4775_v31 }
 0x983   :  { %4337 = vmatpush1.bf16.msra.mxu0 %v5148_v34  ;;  %5338 = vpow2.f32 %v4776_v59 }
 0x984   :  { %4338 = vmatprep.subr.bf16.mxu0 %v5153_v0 }
 0x985   :  { %v6617_v55 = vpop.f32.mrb[52].mxu1 }
 0x986   :  { %v6619_v18 = vpop.f32.mrb[53].mxu1  ;;  %v4779_v45 = vmul.f32 -1.442695, %v6617_v55 }
 0x987   :  { %v6621_v21 = vpop.f32.mrb[54].mxu1  ;;  %4339 = vmatpush1.bf16.msra.mxu0 %v5151_v10  ;;  %v4780_v49 = vmul.f32 -1.442695, %v6619_v18 }
 0x988   :  { %v6623_v44 = vpop.f32.mrb[55].mxu1  ;;  %4340 = vmatprep.subr.bf16.mxu0 %v5156_v42  ;;  %v4783_v17 = vmul.f32 -1.442695, %v6621_v21  ;;  %5340 = vpow2.f32 %v4779_v45 }
 0x989   :  { %v4784_v6 = vmul.f32 -1.442695, %v6623_v44  ;;  %5342 = vpow2.f32 %v4780_v49 }
 0x98a   :  { %v5333_v41 = vpop.eup %5332  ;;  %5344 = vpow2.f32 %v4783_v17 }
 0x98b   :  { %4341 = vmatpush1.bf16.msra.mxu0 %v5154_v5  ;;  %v5335_v3 = vpop.eup %5334  ;;  %5346 = vpow2.f32 %v4784_v6  ;;  %v3797_v39 = vadd.f32 1.0, %v5333_v41 }
 0x98c   :  { %4342 = vmatprep.subr.bf16.mxu0 %v5159_v14  ;;  %v5337_v9 = vpop.eup %5336  ;;  %v3798_v63 = vadd.f32 1.0, %v5335_v3 }
 0x98d   :  { %v5339_v28 = vpop.eup %5338  ;;  %v3801_v27 = vadd.f32 1.0, %v5337_v9  ;;  %5348 = vrcp.f32 %v3797_v39 }
 0x98e   :  { %v3802_v51 = vadd.f32 1.0, %v5339_v28  ;;  %5350 = vrcp.f32 %v3798_v63 }
 0x98f   :  { %4343 = vmatpush1.bf16.msra.mxu0 %v5157_v35  ;;  %5352 = vrcp.f32 %v3801_v27 }
 0x990   :  { %4344 = vmatprep.subr.bf16.mxu0 %v5162_v2  ;;  %5354 = vrcp.f32 %v3802_v51 }
 0x992   :  { %v5341_v30 = vpop.eup %5340 }
 0x993   :  { %4345 = vmatpush1.bf16.msra.mxu0 %v5160_v13  ;;  %v5343_v4 = vpop.eup %5342  ;;  %v3805_v36 = vadd.f32 1.0, %v5341_v30 }
 0x994   :  { %4346 = vmatprep.subr.bf16.mxu0 %v5165_v1  ;;  %v5345_v60 = vpop.eup %5344  ;;  %v3806_v32 = vadd.f32 1.0, %v5343_v4 }
 0x995   :  { %v5347_v12 = vpop.eup %5346  ;;  %v3809_v50 = vadd.f32 1.0, %v5345_v60  ;;  %5356 = vrcp.f32 %v3805_v36 }
 0x996   :  { %v3810_v33 = vadd.f32 1.0, %v5347_v12  ;;  %5358 = vrcp.f32 %v3806_v32 }
 0x997   :  { %4347 = vmatpush1.bf16.msra.mxu0 %v5163_v54  ;;  %v5349_v16 = vpop.eup %5348  ;;  %5360 = vrcp.f32 %v3809_v50 }
 0x998   :  { %4348 = vmatprep.subr.bf16.mxu0 %v5168_v47  ;;  %v5351_v38 = vpop.eup %5350  ;;  %5362 = vrcp.f32 %v3810_v33  ;;  %v3845_v25 = vmul.f32 %v5349_v16, %v6609_v15 }
 0x999   :  { %v5353_v11 = vpop.eup %5352  ;;  %v3846_v29 = vmul.f32 %v5351_v38, %v6611_v19 }
 0x99a   :  { %v5355_v22 = vpop.eup %5354  ;;  %v3849_v52 = vmul.f32 %v5353_v11, %v6613_v26 }
 0x99b   :  { %4349 = vmatpush1.bf16.msra.mxu0 %v5166_v62  ;;  %v3850_v0 = vmul.f32 %v5355_v22, %v6615_v37 }
 0x99c   :  { %4350 = vmatprep.subr.bf16.mxu0 %v5171_v57 }
 0x99f   :  { %4351 = vmatpush1.bf16.msra.mxu0 %v5169_v8  ;;  %v5357_v35 = vpop.eup %5356 }
 0x9a0   :  { %v5359_v13 = vpop.eup %5358  ;;  %v3853_v19 = vmul.f32 %v5357_v35, %v6617_v55 }
 0x9a1   :  { %v5361_v54 = vpop.eup %5360  ;;  %v3854_v62 = vmul.f32 %v5359_v13, %v6619_v18 }
 0x9a2   :  { %v5363_v15 = vpop.eup %5362  ;;  %v3857_v57 = vmul.f32 %v5361_v54, %v6621_v21 }
 0x9a3   :  { %v3858_v56 = vmul.f32 %v5363_v15, %v6623_v44 }
 0x9bd   :  { %v3728_v24 = vpop.f32.mrb[56].mxu1 }
 0x9be   :  { %v3861_v40 = vmul.f32 %v3845_v25, %v3728_v24  ;;  %v3730_v34 = vpop.f32.mrb[57].mxu1 }
 0x9bf   :  { %v3862_v10 = vmul.f32 %v3846_v29, %v3730_v34  ;;  %v3732_v42 = vpop.f32.mrb[58].mxu1 }
 0x9c0   :  { %v3865_v5 = vmul.f32 %v3849_v52, %v3732_v42  ;;  %v3734_v14 = vpop.f32.mrb[59].mxu1 }
 0x9c1   :  { %v3866_v2 = vmul.f32 %v3850_v0, %v3734_v14 }
 0x9c2   :  { %v3877_v1 = vpack.c.bf16 %v3865_v5, %v3861_v40 }
 0x9c3   :  { %v3878_v47 = vpack.c.bf16 %v3866_v2, %v3862_v10 }
 0x9c5   :  { %v3738_v26 = vpop.f32.mrb[60].mxu1  ;;  %4352 = vmatprep.mubr.bf16.mxu0 %v3878_v47 }
 0x9c6   :  { %v3869_v37 = vmul.f32 %v3853_v19, %v3738_v26  ;;  %v3740_v53 = vpop.f32.mrb[61].mxu1  ;;  %4353 = vmatmul.mubr.bf16.vlgmr.msra.gmra.mrb[40].mxu0 %v3877_v1 }
 0x9c7   :  { %v3870_v8 = vmul.f32 %v3854_v62, %v3740_v53  ;;  %v3742_v31 = vpop.f32.mrb[62].mxu1 }
 0x9c8   :  { %v3873_v59 = vmul.f32 %v3857_v57, %v3742_v31  ;;  %v3744_v45 = vpop.f32.mrb[63].mxu1 }
 0x9c9   :  { %v3874_v49 = vmul.f32 %v3858_v56, %v3744_v45 }
 0x9ca   :  { %v3881_v17 = vpack.c.bf16 %v3873_v59, %v3869_v37 }
 0x9cb   :  { %v3882_v6 = vpack.c.bf16 %v3874_v49, %v3870_v8 }
 0x9cd   :  { %4362 = vmatprep.mubr.bf16.mxu0 %v3882_v6 }
 0x9ce   :  { %4363 = vmatmul.mubr.bf16.gmra.mrb[44].mxu0 %v3881_v17 }
 0x9cf   :  { %5559 = shalt.err (!%p5556_p12)
}
 0x9d0   :  { %s5560_s30 = scalar_lea.hbm %s6704_s13, 1024 }
 0x9d1   :  { %p5561_p13 = scmp.ne.s32.totalorder %s6704_s13, %s5560_s30  ;;  %p5564_p0 = scmp.lt.u32.totalorder %s5560_s30, %s6704_s13 }
 0x9d3   :  { %p5566_p1 = pnand %p5564_p0, %p5561_p13 }
 0x9d5   :  { %5569 = shalt.err (!%p5566_p1)
}
 0x9d6   :  { %4412 = dma.vmem_to_hbm [thread:$0]  %s4407_s1, 1024, %s6704_s13, [#allocation18], %s5634_s23, %s5634_s23, %s5635_s24  }
 0x9d7   :  { %s5643_s26 = smov [#allocation19]  }
 0x9d8   :  { %s4418_s16 = sshll.u32 %s5643_s26, 4  ;;  %s4419_s16 = int_to_ptr.vmem [resolvable:$true] %s4418_s16 }
 0x9d9   :  { %s5570_s17 = scalar_lea.vmem %s4419_s16, 1024  ;;  %p5575_p3 = scmp.lt.s32.totalorder %s4419_s16, %s4419_s16 }
 0x9da   :  { %p5571_p2 = scmp.ne.s32.totalorder %s4419_s16, %s5570_s17  ;;  %p5576_p4 = scmp.lt.s32.totalorder %s5570_s17, %s5570_s17 }
 0x9dc   :  { %p5577_p5 = por %p5576_p4, %p5575_p3 }
 0x9de   :  { %p5578_p6 = pnand %p5577_p5, %p5571_p2 }
 0x9e0   :  { %5581 = shalt.err (!%p5578_p6)
}
 0x9e1   :  { %s5582_s5 = scalar_lea.hbm %s6705_s14, 1024 }
 0x9e2   :  { %p5583_p7 = scmp.ne.s32.totalorder %s6705_s14, %s5582_s5  ;;  %p5586_p8 = scmp.lt.u32.totalorder %s5582_s5, %s6705_s14 }
 0x9e4   :  { %p5588_p9 = pnand %p5586_p8, %p5583_p7 }
 0x9e6   :  { %5591 = shalt.err (!%p5588_p9)
}
 0x9e7   :  { %4424 = dma.vmem_to_hbm [thread:$0]  %s4419_s16, 1024, %s6705_s14, [#allocation18], %s5634_s23, %s5634_s23, %s5635_s24  }
 0x9e8   :  { %s5644_s21 = smov [#allocation16]  }
 0x9e9   :  { %s4394_s4 = sshll.u32 %s5644_s21, 4  ;;  %s4395_s4 = int_to_ptr.vmem [resolvable:$true] %s4394_s4 }
 0x9ea   :  { %s5592_s14 = scalar_lea.vmem %s4395_s4, 1024  ;;  %p5597_p11 = scmp.lt.s32.totalorder %s4395_s4, %s4395_s4 }
 0x9eb   :  { %p5593_p10 = scmp.ne.s32.totalorder %s4395_s4, %s5592_s14  ;;  %p5598_p12 = scmp.lt.s32.totalorder %s5592_s14, %s5592_s14 }
 0x9ed   :  { %p5599_p13 = por %p5598_p12, %p5597_p11 }
 0x9ef   :  { %p5600_p0 = pnand %p5599_p13, %p5593_p10 }
 0xa99   :  { %v4354_v55 = vpop.f32.mrb[40].mxu0 }
 0xa9a   :  { %v4373_v18 = vadd.f32 %v6517_v48, %v4354_v55  ;;  %v4356_v21 = vpop.f32.mrb[41].mxu0 }
 0xa9b   :  { %v4374_v44 = vadd.f32 %v6522_v7, %v4356_v21  ;;  %v4358_v41 = vpop.f32.mrb[42].mxu0 }
 0xa9c   :  { %4381 = vst [vmem:[#allocation16] sm:$0xff] %v4373_v18  ;;  %v4375_v3 = vadd.f32 %v6527_v23, %v4358_v41  ;;  %v4360_v9 = vpop.f32.mrb[43].mxu0 }
 0xa9d   :  { %4382 = vst [vmem:[#allocation16 + $0x8] sm:$0xff] %v4374_v44  ;;  %v4376_v28 = vadd.f32 %v6534_v20, %v4360_v9 }
 0xa9e   :  { %4383 = vst [vmem:[#allocation16 + $0x10] sm:$0xff] %v4375_v3 }
 0xa9f   :  { %4384 = vst [vmem:[#allocation16 + $0x18] sm:$0xff] %v4376_v28 }
 0xaa1   :  { %v4364_v39 = vpop.f32.mrb[44].mxu0 }
 0xaa2   :  { %v4377_v63 = vadd.f32 %v6545_v61, %v4364_v39  ;;  %v4366_v27 = vpop.f32.mrb[45].mxu0 }
 0xaa3   :  { %v4378_v48 = vadd.f32 %v6550_v46, %v4366_v27  ;;  %v4368_v51 = vpop.f32.mrb[46].mxu0 }
 0xaa4   :  { %4385 = vst [vmem:[#allocation16 + $0x20] sm:$0xff] %v4377_v63  ;;  %v4379_v7 = vadd.f32 %v6555_v58, %v4368_v51  ;;  %v4370_v30 = vpop.f32.mrb[47].mxu0 }
 0xaa5   :  { %4386 = vst [vmem:[#allocation16 + $0x28] sm:$0xff] %v4378_v48  ;;  %v4380_v23 = vadd.f32 %v6562_v43, %v4370_v30 }
 0xaa6   :  { %4387 = vst [vmem:[#allocation16 + $0x30] sm:$0xff] %v4379_v7 }
 0xaa7   :  { %4388 = vst [vmem:[#allocation16 + $0x38] sm:$0xff] %v4380_v23 }
 0xaa8   :  { %5603 = shalt.err (!%p5600_p0)
}
 0xaa9   :  { %s5604_s19 = scalar_lea.hbm %s6703_s12, 1024 }
 0xaaa   :  { %p5605_p1 = scmp.ne.s32.totalorder %s6703_s12, %s5604_s19  ;;  %p5608_p2 = scmp.lt.u32.totalorder %s5604_s19, %s6703_s12 }
 0xaac   :  { %p5610_p3 = pnand %p5608_p2, %p5605_p1 }
 0xaae   :  { %5613 = shalt.err (!%p5610_p3)
}
 0xaaf   :  { %s5645_s8 = smov 256   ;;  %s5646_s30 = smov 16  }
 0xab0   :  { %4400 = dma.vmem_to_hbm [thread:$0]  %s4395_s4, 1024, %s6703_s12, [#allocation4], %s5645_s8, %s5645_s8, %s5646_s30  }
 0xab1   :  { %5624 = dma.done.wait [#allocation4], 1024  }
 0xab2   :  { %5625 = vsyncadd [#allocation4], 4294966272 }
 0xab3   :  { %5626 = dma.done.wait [#allocation18], 2048  }
 0xab4   :  { %5627 = vsyncadd [#allocation18], 4294965248 }
 0xab5   :  { %4434 = vsyncpa [#allocation3], 1 }
 0xab6   :  { %4435 = vsyncpa [#allocation6], 1 }
 0xab7   :  { %4436 = vsyncpa [#allocation9], 1 }
 0xab8   :  { %4437 = vsyncpa [#allocation12], 1 }
 0xab9   :  { %4438 = vsyncpa [#allocation15], 1 }
 0xaba   :  { %4439 = vsyncpa [#allocation4], 1 }
 0xabb   :  { %4440 = vsyncpa [#allocation18], 1 }

</bundles_post_ra>
